<compile_context>
chip_gen: v7x
topology: tpu7x:2x2x1
jax: 0.10.0
libtpu: 0.0.40
codegen_flags: <defaults>
</compile_context>

<pallas_src>
import functools
import math

import jax
import jax.numpy as jnp
from jax.experimental import pallas as pl
from jax.experimental.pallas import tpu as pltpu

# ---------------- Synthetic ViT config (small, forward-consistent) ----------
IMG = 16            # image spatial size
PATCH = 8           # patch size -> 2x2 = 4 patches
CHANNELS = 3        # RGB like CLIP
HIDDEN = 128        # hidden size (score_layer: Linear(HIDDEN, 1))
HEADS = 4
HEAD_DIM = HIDDEN // HEADS
MLP_DIM = 256
LAYERS = 2
BATCH = 2
NUM_PATCHES = (IMG // PATCH) ** 2
SEQ = NUM_PATCHES + 1               # CLS + patches (= 5)
SEQ_PAD = 8                         # per-image token rows padded to a sublane multiple
CPP = CHANNELS * PATCH * PATCH      # flattened patch feature size (= 192)
CPP_PAD = 256                       # lane-dense padding of the patch feature dim
LN_EPS = 1e-5


# ---------------------------- shared math helpers ---------------------------
def _layernorm(x, g, b):
    """LayerNorm over the last axis (used both inside the kernel and in the reference)."""
    mu = jnp.mean(x, axis=-1, keepdims=True)
    var = jnp.mean((x - mu) ** 2, axis=-1, keepdims=True)
    return (x - mu) * jax.lax.rsqrt(var + LN_EPS) * g + b


def _patchify(x):
    """NCHW -> (B, NUM_PATCHES, C*P*P), feature order (C, ph, pw) == Conv2d(k=s=PATCH)."""
    B = x.shape[0]
    gp = IMG // PATCH
    xp = x.reshape(B, CHANNELS, gp, PATCH, gp, PATCH)
    xp = xp.transpose(0, 2, 4, 1, 3, 5)
    return xp.reshape(B, NUM_PATCHES, CPP)


# ---------------------------- the fused Pallas kernel ------------------------
def _pairwise_vit_kernel(
    tok_ref, patch_w_ref, pos_ref, pre_g_ref, pre_b_ref,
    ln1_g_ref, ln1_b_ref, wqkv_ref, bqkv_ref, wo_ref, bo_ref,
    ln2_g_ref, ln2_b_ref, w1_ref, b1_ref, w2_ref, b2_ref,
    score_w_ref, score_b_ref,
    scores_ref,
    *, n_img):
    """Full CLIP-ViT encoder + score head for all 2*B images of the pair in one step."""
    n_tok = n_img * SEQ_PAD

    # ---- patch embed + positional/CLS embed + CLIP pre-LN (all value-resident) ----
    h = jnp.dot(tok_ref[...], patch_w_ref[...], preferred_element_type=jnp.float32)
    h = h + pos_ref[...]
    h = _layernorm(h, pre_g_ref[...], pre_b_ref[...])

    # Key-padding mask: rows SEQ..SEQ_PAD-1 of each image are padding and must not act
    # as attention keys.  Hoisted (and pre-broadcast) out of the layer loop.
    kidx = jax.lax.broadcasted_iota(jnp.int32, (1, SEQ_PAD), 1)
    key_mask = jnp.broadcast_to(
        jnp.where(kidx < SEQ, 0.0, -1e9).astype(jnp.float32)[None],
        (n_img, SEQ_PAD, SEQ_PAD))

    for l in range(LAYERS):
        # ---- self-attention block (pre-LN, fused QKV, image-batched per head) ----
        xn = _layernorm(h, ln1_g_ref[l:l + 1, :], ln1_b_ref[l:l + 1, :])
        qkv = (jnp.dot(xn, wqkv_ref[l], preferred_element_type=jnp.float32)
               + bqkv_ref[l:l + 1, :])
        qkv3 = qkv.reshape(n_img, SEQ_PAD, 3 * HIDDEN)          # sublane split only
        o_heads = []
        for hh in range(HEADS):                                  # 4 static iterations
            c = hh * HEAD_DIM
            q = qkv3[:, :, c:c + HEAD_DIM]                       # 1/sqrt(hd) folded into Wq/bq
            k = qkv3[:, :, HIDDEN + c:HIDDEN + c + HEAD_DIM]
            v = qkv3[:, :, 2 * HIDDEN + c:2 * HIDDEN + c + HEAD_DIM]
            s = jnp.einsum("nqd,nkd->nqk", q, k, preferred_element_type=jnp.float32)
            s = s + key_mask
            s = s - jnp.max(s, axis=-1, keepdims=True)
            p = jnp.exp(s)
            p = p * pl.reciprocal(jnp.sum(p, axis=-1, keepdims=True), approx=True)
            o_heads.append(jnp.einsum("nqk,nkd->nqd", p, v,
                                      preferred_element_type=jnp.float32))
        # Heads reassembled into full-128-lane rows; no scratch stores, one out-proj matmul.
        ao = jnp.concatenate(o_heads, axis=-1).reshape(n_tok, HIDDEN)
        h = h + (jnp.dot(ao, wo_ref[l], preferred_element_type=jnp.float32)
                 + bo_ref[l:l + 1, :])

        # ---- MLP block (pre-LN, quick-GELU, residual) ----
        xn = _layernorm(h, ln2_g_ref[l:l + 1, :], ln2_b_ref[l:l + 1, :])
        m = jnp.dot(xn, w1_ref[l], preferred_element_type=jnp.float32) + b1_ref[l:l + 1, :]
        m = m * jax.nn.sigmoid(1.702 * m)                        # CLIP QuickGELU
        h = h + (jnp.dot(m, w2_ref[l], preferred_element_type=jnp.float32)
                 + b2_ref[l:l + 1, :])

    # ---- score head: lane-padded weights, computed for every row so the output store is
    # fully lane/sublane dense; the wrapper picks CLS rows (i*SEQ_PAD) and column 0. ----
    scores_ref[...] = (jnp.dot(h, score_w_ref[...], preferred_element_type=jnp.float32)
                       + score_b_ref[...])


def _full(shape):
    """Whole-array block (fetched once into VMEM; trivial index map for grid=(1,))."""
    zeros = (0,) * len(shape)
    return pl.BlockSpec(shape, lambda g: zeros)


# ---------------------------- public forward --------------------------------
def pairwise_vit_forward(x1, x2, params):
    """Mirrors PairwiseViT.forward: (sigmoid(o1 - o2), o1, o2)."""
    B = x1.shape[0]
    n_img = 2 * B
    n_tok = n_img * SEQ_PAD
    scale = 1.0 / math.sqrt(HEAD_DIM)

    def tokens(x):  # (B,C,H,W) -> (B, SEQ_PAD, CPP_PAD); CLS / pad rows and pad lanes = 0
        xp = _patchify(x)                                        # (B, NP, CPP)
        t = jnp.zeros((B, SEQ_PAD, CPP_PAD), jnp.float32)
        return t.at[:, 1:1 + NUM_PATCHES, :CPP].set(xp)

    # Both image-sets go through the encoder in ONE fused step.
    tok = jnp.concatenate([tokens(x1), tokens(x2)], axis=0).reshape(n_tok, CPP_PAD)

    # CLS embedding folded into row 0 of the per-image positional embedding; pad rows zero.
    pos_cls = params["pos"].at[0].add(params["cls"][0])
    pos_tiled = jnp.tile(jnp.pad(pos_cls, ((0, SEQ_PAD - SEQ), (0, 0))), (n_img, 1))

    # Lane-dense patch-embedding weight (zero rows for the padded features).
    patch_w_pad = jnp.zeros((CPP_PAD, HIDDEN), jnp.float32).at[:CPP].set(params["patch_w"])

    # Fold the 1/sqrt(head_dim) attention scale into the Q part of the fused QKV weights.
    wqkv = params["wqkv"].at[:, :, :HIDDEN].multiply(scale)
    bqkv = params["bqkv"].at[:, :HIDDEN].multiply(scale)

    # Lane-padded score head (real weights live in column 0).
    score_w_pad = jnp.zeros((HIDDEN, 128), jnp.float32).at[:, 0:1].set(params["score_w"])
    score_b_pad = jnp.zeros((1, 128), jnp.float32).at[0, 0].set(params["score_b"][0, 0])

    kernel = functools.partial(_pairwise_vit_kernel, n_img=n_img)
    scores_all = pl.pallas_call(
        kernel,
        out_shape=jax.ShapeDtypeStruct((n_tok, 128), jnp.float32),
        grid=(1,),                       # single fused step for the whole pair
        in_specs=[
            _full((n_tok, CPP_PAD)),                              # stacked tokens
            _full((CPP_PAD, HIDDEN)),                             # patch_w (lane-padded)
            _full((n_tok, HIDDEN)),                               # pos (+ CLS) tiled
            _full((1, HIDDEN)), _full((1, HIDDEN)),               # pre-LN
            _full((LAYERS, HIDDEN)), _full((LAYERS, HIDDEN)),     # ln1
            _full((LAYERS, HIDDEN, 3 * HIDDEN)), _full((LAYERS, 3 * HIDDEN)),  # fused QKV
            _full((LAYERS, HIDDEN, HIDDEN)), _full((LAYERS, HIDDEN)),          # out proj
            _full((LAYERS, HIDDEN)), _full((LAYERS, HIDDEN)),     # ln2
            _full((LAYERS, HIDDEN, MLP_DIM)), _full((LAYERS, MLP_DIM)),        # mlp fc1
            _full((LAYERS, MLP_DIM, HIDDEN)), _full((LAYERS, HIDDEN)),         # mlp fc2
            _full((HIDDEN, 128)), _full((1, 128)),                # score head (lane-padded)
        ],
        out_specs=_full((n_tok, 128)),
        compiler_params=pltpu.CompilerParams(
            dimension_semantics=("arbitrary",)),
    )(tok, patch_w_pad, pos_tiled,
      params["pre_ln_g"], params["pre_ln_b"],
      params["ln1_g"], params["ln1_b"], wqkv, bqkv,
      params["wo"], params["bo"], params["ln2_g"], params["ln2_b"],
      params["w1"], params["b1"], params["w2"], params["b2"],
      score_w_pad, score_b_pad)

    cls_scores = scores_all[::SEQ_PAD, 0]        # CLS rows (i*SEQ_PAD), column 0 -> (n_img,)
    o1 = cls_scores[:B].reshape(B, 1)
    o2 = cls_scores[B:].reshape(B, 1)
    out = jax.nn.sigmoid(o1 - o2)                # 2 scalars: plain JAX per the perf review
    return out, o1, o2


# ---------------------------- pure-JAX reference -----------------------------
def _reference_forward(x1, x2, params):
    P = jax.lax.Precision.HIGHEST

    def encode(x):
        B = x.shape[0]
        xp = _patchify(x)
        pe = jnp.einsum("bpc,cd->bpd", xp, params["patch_w"], precision=P)
        cls = jnp.broadcast_to(params["cls"][None], (B, 1, HIDDEN))
        h = jnp.concatenate([cls, pe], axis=1) + params["pos"][None]
        h = _layernorm(h, params["pre_ln_g"][0], params["pre_ln_b"][0])
        for l in range(LAYERS):
            xn = _layernorm(h, params["ln1_g"][l], params["ln1_b"][l])
            qkv = jnp.einsum("bsd,de->bse", xn, params["wqkv"][l], precision=P) + params["bqkv"][l]
            q, k, v = jnp.split(qkv, 3, axis=-1)

            def heads(t):
                return t.reshape(B, SEQ, HEADS, HEAD_DIM).transpose(0, 2, 1, 3)

            q, k, v = heads(q), heads(k), heads(v)
            s = jnp.einsum("bhqd,bhkd->bhqk", q, k, precision=P) / math.sqrt(HEAD_DIM)
            p = jax.nn.softmax(s, axis=-1)
            o = jnp.einsum("bhqk,bhkd->bhqd", p, v, precision=P)
            o = o.transpose(0, 2, 1, 3).reshape(B, SEQ, HIDDEN)
            h = h + jnp.einsum("bsd,de->bse", o, params["wo"][l], precision=P) + params["bo"][l]
            xn = _layernorm(h, params["ln2_g"][l], params["ln2_b"][l])
            m = jnp.einsum("bsd,de->bse", xn, params["w1"][l], precision=P) + params["b1"][l]
            m = m * jax.nn.sigmoid(1.702 * m)
            h = h + jnp.einsum("bse,ed->bsd", m, params["w2"][l], precision=P) + params["b2"][l]
        return h

    h1, h2 = encode(x1), encode(x2)
    o1 = jnp.dot(h1[:, 0, :], params["score_w"], precision=P) + params["score_b"]
    o2 = jnp.dot(h2[:, 0, :], params["score_w"], precision=P) + params["score_b"]
    return jax.nn.sigmoid(o1 - o2), o1, o2


# ---------------------------- deterministic params --------------------------
def init_params(key):
    def nrm(k, shape, scale=0.02):
        return scale * jax.random.normal(k, shape, dtype=jnp.float32)

    ks = iter(jax.random.split(key, 24))
    return {
        "patch_w": nrm(next(ks), (CPP, HIDDEN)),                 # CLIP patch conv (no bias)
        "cls": nrm(next(ks), (1, HIDDEN)),
        "pos": nrm(next(ks), (SEQ, HIDDEN)),
        "pre_ln_g": 1.0 + nrm(next(ks), (1, HIDDEN)),
        "pre_ln_b": nrm(next(ks), (1, HIDDEN)),
        "ln1_g": 1.0 + nrm(next(ks), (LAYERS, HIDDEN)),
        "ln1_b": nrm(next(ks), (LAYERS, HIDDEN)),
        "wqkv": nrm(next(ks), (LAYERS, HIDDEN, 3 * HIDDEN)),     # fused [Wq | Wk | Wv]
        "bqkv": nrm(next(ks), (LAYERS, 3 * HIDDEN)),
        "wo": nrm(next(ks), (LAYERS, HIDDEN, HIDDEN)),
        "bo": nrm(next(ks), (LAYERS, HIDDEN)),
        "ln2_g": 1.0 + nrm(next(ks), (LAYERS, HIDDEN)),
        "ln2_b": nrm(next(ks), (LAYERS, HIDDEN)),
        "w1": nrm(next(ks), (LAYERS, HIDDEN, MLP_DIM)),
        "b1": nrm(next(ks), (LAYERS, MLP_DIM)),
        "w2": nrm(next(ks), (LAYERS, MLP_DIM, HIDDEN)),
        "b2": nrm(next(ks), (LAYERS, HIDDEN)),
        "score_w": nrm(next(ks), (HIDDEN, 1)),
        "score_b": nrm(next(ks), (1, 1)),
    }


# --------------------------------- main --------------------------------------
if __name__ == "__main__":
    params = init_params(jax.random.PRNGKey(42))

    key = jax.random.PRNGKey(0)
    k1, k2 = jax.random.split(key)
    x1 = jax.random.normal(k1, (BATCH, CHANNELS, IMG, IMG), dtype=jnp.float32)  # NCHW
    x2 = jax.random.normal(k2, (BATCH, CHANNELS, IMG, IMG), dtype=jnp.float32)  # NCHW

    out, o1, o2 = jax.jit(pairwise_vit_forward)(x1, x2, params)
    jax.block_until_ready((out, o1, o2))

    assert out.shape == (BATCH, 1) and o1.shape == (BATCH, 1) and o2.shape == (BATCH, 1)
    assert bool(jnp.all(jnp.isfinite(out)))

    # Pure-JAX reference check (same params, same math).
    ref_out, ref_o1, ref_o2 = _reference_forward(x1, x2, params)
    assert bool(jnp.allclose(o1, ref_o1, atol=5e-3, rtol=5e-2))
    assert bool(jnp.allclose(o2, ref_o2, atol=5e-3, rtol=5e-2))
    assert bool(jnp.allclose(out, ref_out, atol=5e-3, rtol=5e-2))

    print("KERNEL_OK")
</pallas_src>

<mosaic_0001>
module attributes {stable_mosaic.version = 11 : i64} {
  func.func @_pairwise_vit_kernel(%arg0: i32, %arg1: memref<32x256xf32, #tpu.memory_space<vmem>>, %arg2: memref<256x128xf32, #tpu.memory_space<vmem>>, %arg3: memref<32x128xf32, #tpu.memory_space<vmem>>, %arg4: memref<1x128xf32, #tpu.memory_space<vmem>>, %arg5: memref<1x128xf32, #tpu.memory_space<vmem>>, %arg6: memref<2x128xf32, #tpu.memory_space<vmem>>, %arg7: memref<2x128xf32, #tpu.memory_space<vmem>>, %arg8: memref<2x128x384xf32, #tpu.memory_space<vmem>>, %arg9: memref<2x384xf32, #tpu.memory_space<vmem>>, %arg10: memref<2x128x128xf32, #tpu.memory_space<vmem>>, %arg11: memref<2x128xf32, #tpu.memory_space<vmem>>, %arg12: memref<2x128xf32, #tpu.memory_space<vmem>>, %arg13: memref<2x128xf32, #tpu.memory_space<vmem>>, %arg14: memref<2x128x256xf32, #tpu.memory_space<vmem>>, %arg15: memref<2x256xf32, #tpu.memory_space<vmem>>, %arg16: memref<2x256x128xf32, #tpu.memory_space<vmem>>, %arg17: memref<2x128xf32, #tpu.memory_space<vmem>>, %arg18: memref<128x128xf32, #tpu.memory_space<vmem>>, %arg19: memref<1x128xf32, #tpu.memory_space<vmem>>, %arg20: memref<32x128xf32, #tpu.memory_space<vmem>>) attributes {dimension_semantics = [#tpu.dimension_semantics<arbitrary>], iteration_bounds = array<i64: 1>, scalar_prefetch = 0 : i64, scratch_operands = 0 : i64, tpu.core_type = #tpu.core_type<tc>, window_params = [{pipeline_mode = #tpu.pipeline_mode<synchronous>, transform_indices = @transform_0, window_bounds = array<i64: 32, 256>}, {pipeline_mode = #tpu.pipeline_mode<synchronous>, transform_indices = @transform_1, window_bounds = array<i64: 256, 128>}, {pipeline_mode = #tpu.pipeline_mode<synchronous>, transform_indices = @transform_2, window_bounds = array<i64: 32, 128>}, {pipeline_mode = #tpu.pipeline_mode<synchronous>, transform_indices = @transform_3, window_bounds = array<i64: 1, 128>}, {pipeline_mode = #tpu.pipeline_mode<synchronous>, transform_indices = @transform_4, window_bounds = array<i64: 1, 128>}, {pipeline_mode = #tpu.pipeline_mode<synchronous>, transform_indices = @transform_5, window_bounds = array<i64: 2, 128>}, {pipeline_mode = #tpu.pipeline_mode<synchronous>, transform_indices = @transform_6, window_bounds = array<i64: 2, 128>}, {pipeline_mode = #tpu.pipeline_mode<synchronous>, transform_indices = @transform_7, window_bounds = array<i64: 2, 128, 384>}, {pipeline_mode = #tpu.pipeline_mode<synchronous>, transform_indices = @transform_8, window_bounds = array<i64: 2, 384>}, {pipeline_mode = #tpu.pipeline_mode<synchronous>, transform_indices = @transform_9, window_bounds = array<i64: 2, 128, 128>}, {pipeline_mode = #tpu.pipeline_mode<synchronous>, transform_indices = @transform_10, window_bounds = array<i64: 2, 128>}, {pipeline_mode = #tpu.pipeline_mode<synchronous>, transform_indices = @transform_11, window_bounds = array<i64: 2, 128>}, {pipeline_mode = #tpu.pipeline_mode<synchronous>, transform_indices = @transform_12, window_bounds = array<i64: 2, 128>}, {pipeline_mode = #tpu.pipeline_mode<synchronous>, transform_indices = @transform_13, window_bounds = array<i64: 2, 128, 256>}, {pipeline_mode = #tpu.pipeline_mode<synchronous>, transform_indices = @transform_14, window_bounds = array<i64: 2, 256>}, {pipeline_mode = #tpu.pipeline_mode<synchronous>, transform_indices = @transform_15, window_bounds = array<i64: 2, 256, 128>}, {pipeline_mode = #tpu.pipeline_mode<synchronous>, transform_indices = @transform_16, window_bounds = array<i64: 2, 128>}, {pipeline_mode = #tpu.pipeline_mode<synchronous>, transform_indices = @transform_17, window_bounds = array<i64: 128, 128>}, {pipeline_mode = #tpu.pipeline_mode<synchronous>, transform_indices = @transform_18, window_bounds = array<i64: 1, 128>}, {pipeline_mode = #tpu.pipeline_mode<synchronous>, transform_indices = @transform_19, window_bounds = array<i64: 32, 128>}]} {
    %c0 = arith.constant 0 : index
    %c0_0 = arith.constant 0 : index
    %0 = vector.load %arg1[%c0, %c0_0] : memref<32x256xf32, #tpu.memory_space<vmem>>, vector<32x256xf32>
    %c0_1 = arith.constant 0 : index
    %c0_2 = arith.constant 0 : index
    %1 = vector.load %arg2[%c0_1, %c0_2] : memref<256x128xf32, #tpu.memory_space<vmem>>, vector<256x128xf32>
    %cst = arith.constant dense<0.000000e+00> : vector<32x128xf32>
    %2 = tpu.matmul %0, %1, %cst {dimension_numbers = #tpu.dot_dimension_numbers<[1], [0], [0], [1], [0, 0, 1, 1], [], []>} : vector<32x256xf32>, vector<256x128xf32>, vector<32x128xf32> -> vector<32x128xf32>
    %c0_3 = arith.constant 0 : index
    %c0_4 = arith.constant 0 : index
    %3 = vector.load %arg3[%c0_3, %c0_4] : memref<32x128xf32, #tpu.memory_space<vmem>>, vector<32x128xf32>
    %4 = arith.addf %2, %3 : vector<32x128xf32>
    %c0_5 = arith.constant 0 : index
    %c0_6 = arith.constant 0 : index
    %5 = vector.load %arg4[%c0_5, %c0_6] : memref<1x128xf32, #tpu.memory_space<vmem>>, vector<1x128xf32>
    %c0_7 = arith.constant 0 : index
    %c0_8 = arith.constant 0 : index
    %6 = vector.load %arg5[%c0_7, %c0_8] : memref<1x128xf32, #tpu.memory_space<vmem>>, vector<1x128xf32>
    %cst_9 = arith.constant dense<0.000000e+00> : vector<32xf32>
    %7 = vector.multi_reduction <add>, %4, %cst_9 [1] : vector<32x128xf32> to vector<32xf32>
    %8 = vector.shape_cast %7 : vector<32xf32> to vector<32x1xf32>
    %cst_10 = arith.constant 1.280000e+02 : f32
    %9 = vector.broadcast %cst_10 : f32 to vector<32x1xf32>
    %10 = arith.divf %8, %9 : vector<32x1xf32>
    %11 = vector.broadcast %10 : vector<32x1xf32> to vector<32x128xf32>
    %12 = arith.subf %4, %11 : vector<32x128xf32>
    %13 = arith.mulf %12, %12 : vector<32x128xf32>
    %cst_11 = arith.constant dense<0.000000e+00> : vector<32xf32>
    %14 = vector.multi_reduction <add>, %13, %cst_11 [1] : vector<32x128xf32> to vector<32xf32>
    %15 = vector.shape_cast %14 : vector<32xf32> to vector<32x1xf32>
    %cst_12 = arith.constant 1.280000e+02 : f32
    %16 = vector.broadcast %cst_12 : f32 to vector<32x1xf32>
    %17 = arith.divf %15, %16 : vector<32x1xf32>
    %18 = vector.broadcast %10 : vector<32x1xf32> to vector<32x128xf32>
    %19 = arith.subf %4, %18 : vector<32x128xf32>
    %cst_13 = arith.constant 9.99999974E-6 : f32
    %20 = vector.broadcast %cst_13 : f32 to vector<32x1xf32>
    %21 = arith.addf %17, %20 : vector<32x1xf32>
    %22 = math.rsqrt %21 : vector<32x1xf32>
    %23 = vector.broadcast %22 : vector<32x1xf32> to vector<32x128xf32>
    %24 = arith.mulf %19, %23 : vector<32x128xf32>
    %25 = vector.broadcast %5 : vector<1x128xf32> to vector<32x128xf32>
    %26 = arith.mulf %24, %25 : vector<32x128xf32>
    %27 = vector.broadcast %6 : vector<1x128xf32> to vector<32x128xf32>
    %28 = arith.addf %26, %27 : vector<32x128xf32>
    %29 = tpu.iota {dimensions = array<i32: 1>} : vector<1x8xi32>
    %c5_i32 = arith.constant 5 : i32
    %30 = vector.broadcast %c5_i32 : i32 to vector<1x8xi32>
    %31 = arith.cmpi slt, %29, %30 : vector<1x8xi32>
    %cst_14 = arith.constant 0.000000e+00 : f32
    %cst_15 = arith.constant -1.000000e+09 : f32
    %32 = vector.broadcast %cst_14 : f32 to vector<1x8xf32>
    %33 = vector.broadcast %cst_15 : f32 to vector<1x8xf32>
    %34 = arith.select %31, %32, %33 : vector<1x8xi1>, vector<1x8xf32>
    %35 = vector.shape_cast %34 : vector<1x8xf32> to vector<1x1x8xf32>
    %36 = vector.shape_cast %35 : vector<1x1x8xf32> to vector<1x1x8xf32>
    %37 = vector.broadcast %36 : vector<1x1x8xf32> to vector<4x8x8xf32>
    %c0_16 = arith.constant 0 : index
    %c0_17 = arith.constant 0 : index
    %38 = vector.load %arg6[%c0_16, %c0_17] : memref<2x128xf32, #tpu.memory_space<vmem>>, vector<1x128xf32>
    %c0_18 = arith.constant 0 : index
    %c0_19 = arith.constant 0 : index
    %39 = vector.load %arg7[%c0_18, %c0_19] : memref<2x128xf32, #tpu.memory_space<vmem>>, vector<1x128xf32>
    %cst_20 = arith.constant dense<0.000000e+00> : vector<32xf32>
    %40 = vector.multi_reduction <add>, %28, %cst_20 [1] : vector<32x128xf32> to vector<32xf32>
    %41 = vector.shape_cast %40 : vector<32xf32> to vector<32x1xf32>
    %cst_21 = arith.constant 1.280000e+02 : f32
    %42 = vector.broadcast %cst_21 : f32 to vector<32x1xf32>
    %43 = arith.divf %41, %42 : vector<32x1xf32>
    %44 = vector.broadcast %43 : vector<32x1xf32> to vector<32x128xf32>
    %45 = arith.subf %28, %44 : vector<32x128xf32>
    %46 = arith.mulf %45, %45 : vector<32x128xf32>
    %cst_22 = arith.constant dense<0.000000e+00> : vector<32xf32>
    %47 = vector.multi_reduction <add>, %46, %cst_22 [1] : vector<32x128xf32> to vector<32xf32>
    %48 = vector.shape_cast %47 : vector<32xf32> to vector<32x1xf32>
    %cst_23 = arith.constant 1.280000e+02 : f32
    %49 = vector.broadcast %cst_23 : f32 to vector<32x1xf32>
    %50 = arith.divf %48, %49 : vector<32x1xf32>
    %51 = vector.broadcast %43 : vector<32x1xf32> to vector<32x128xf32>
    %52 = arith.subf %28, %51 : vector<32x128xf32>
    %cst_24 = arith.constant 9.99999974E-6 : f32
    %53 = vector.broadcast %cst_24 : f32 to vector<32x1xf32>
    %54 = arith.addf %50, %53 : vector<32x1xf32>
    %55 = math.rsqrt %54 : vector<32x1xf32>
    %56 = vector.broadcast %55 : vector<32x1xf32> to vector<32x128xf32>
    %57 = arith.mulf %52, %56 : vector<32x128xf32>
    %58 = vector.broadcast %38 : vector<1x128xf32> to vector<32x128xf32>
    %59 = arith.mulf %57, %58 : vector<32x128xf32>
    %60 = vector.broadcast %39 : vector<1x128xf32> to vector<32x128xf32>
    %61 = arith.addf %59, %60 : vector<32x128xf32>
    %c0_25 = arith.constant 0 : index
    %c0_26 = arith.constant 0 : index
    %c0_27 = arith.constant 0 : index
    %62 = vector.load %arg8[%c0_25, %c0_26, %c0_27] : memref<2x128x384xf32, #tpu.memory_space<vmem>>, vector<1x128x384xf32>
    %63 = vector.shape_cast %62 : vector<1x128x384xf32> to vector<128x384xf32>
    %cst_28 = arith.constant dense<0.000000e+00> : vector<32x384xf32>
    %64 = tpu.matmul %61, %63, %cst_28 {dimension_numbers = #tpu.dot_dimension_numbers<[1], [0], [0], [1], [0, 0, 1, 1], [], []>} : vector<32x128xf32>, vector<128x384xf32>, vector<32x384xf32> -> vector<32x384xf32>
    %c0_29 = arith.constant 0 : index
    %c0_30 = arith.constant 0 : index
    %65 = vector.load %arg9[%c0_29, %c0_30] : memref<2x384xf32, #tpu.memory_space<vmem>>, vector<1x384xf32>
    %66 = vector.broadcast %65 : vector<1x384xf32> to vector<32x384xf32>
    %67 = arith.addf %64, %66 : vector<32x384xf32>
    %68 = vector.shape_cast %67 : vector<32x384xf32> to vector<4x8x384xf32>
    %69 = vector.extract_strided_slice %68 {offsets = [0, 0, 0], sizes = [4, 8, 32], strides = [1, 1, 1]} : vector<4x8x384xf32> to vector<4x8x32xf32>
    %70 = vector.extract_strided_slice %68 {offsets = [0, 0, 128], sizes = [4, 8, 32], strides = [1, 1, 1]} : vector<4x8x384xf32> to vector<4x8x32xf32>
    %71 = vector.extract_strided_slice %68 {offsets = [0, 0, 256], sizes = [4, 8, 32], strides = [1, 1, 1]} : vector<4x8x384xf32> to vector<4x8x32xf32>
    "tpu.trace_start"() <{level = 10 : i32, message = "nqd,nkd->nqk"}> : () -> ()
    %cst_31 = arith.constant dense<0.000000e+00> : vector<4x8x8xf32>
    %72 = tpu.matmul %69, %70, %cst_31 {dimension_numbers = #tpu.dot_dimension_numbers<[2], [2], [1], [1], [0, 0, 0, 1, 1, 1], [0], [0]>} : vector<4x8x32xf32>, vector<4x8x32xf32>, vector<4x8x8xf32> -> vector<4x8x8xf32>
    "tpu.trace_stop"() : () -> ()
    %73 = arith.addf %72, %37 : vector<4x8x8xf32>
    %cst_32 = arith.constant dense<0xFF800000> : vector<4x8xf32>
    %74 = vector.multi_reduction <maximumf>, %73, %cst_32 [2] : vector<4x8x8xf32> to vector<4x8xf32>
    %75 = vector.shape_cast %74 : vector<4x8xf32> to vector<4x8x1xf32>
    %76 = vector.broadcast %75 : vector<4x8x1xf32> to vector<4x8x8xf32>
    %77 = arith.subf %73, %76 : vector<4x8x8xf32>
    %78 = math.exp %77 : vector<4x8x8xf32>
    %cst_33 = arith.constant dense<0.000000e+00> : vector<4x8xf32>
    %79 = vector.multi_reduction <add>, %78, %cst_33 [2] : vector<4x8x8xf32> to vector<4x8xf32>
    %80 = vector.shape_cast %79 : vector<4x8xf32> to vector<4x8x1xf32>
    %81 = tpu.reciprocal %80 {approx = true} : vector<4x8x1xf32> -> vector<4x8x1xf32>
    %82 = vector.broadcast %81 : vector<4x8x1xf32> to vector<4x8x8xf32>
    %83 = arith.mulf %78, %82 : vector<4x8x8xf32>
    "tpu.trace_start"() <{level = 10 : i32, message = "nqk,nkd->nqd"}> : () -> ()
    %cst_34 = arith.constant dense<0.000000e+00> : vector<4x8x32xf32>
    %84 = tpu.matmul %83, %71, %cst_34 {dimension_numbers = #tpu.dot_dimension_numbers<[2], [1], [1], [2], [0, 0, 0, 1, 1, 2], [0], [0]>} : vector<4x8x8xf32>, vector<4x8x32xf32>, vector<4x8x32xf32> -> vector<4x8x32xf32>
    "tpu.trace_stop"() : () -> ()
    %85 = vector.extract_strided_slice %68 {offsets = [0, 0, 32], sizes = [4, 8, 32], strides = [1, 1, 1]} : vector<4x8x384xf32> to vector<4x8x32xf32>
    %86 = vector.extract_strided_slice %68 {offsets = [0, 0, 160], sizes = [4, 8, 32], strides = [1, 1, 1]} : vector<4x8x384xf32> to vector<4x8x32xf32>
    %87 = vector.extract_strided_slice %68 {offsets = [0, 0, 288], sizes = [4, 8, 32], strides = [1, 1, 1]} : vector<4x8x384xf32> to vector<4x8x32xf32>
    "tpu.trace_start"() <{level = 10 : i32, message = "nqd,nkd->nqk"}> : () -> ()
    %cst_35 = arith.constant dense<0.000000e+00> : vector<4x8x8xf32>
    %88 = tpu.matmul %85, %86, %cst_35 {dimension_numbers = #tpu.dot_dimension_numbers<[2], [2], [1], [1], [0, 0, 0, 1, 1, 1], [0], [0]>} : vector<4x8x32xf32>, vector<4x8x32xf32>, vector<4x8x8xf32> -> vector<4x8x8xf32>
    "tpu.trace_stop"() : () -> ()
    %89 = arith.addf %88, %37 : vector<4x8x8xf32>
    %cst_36 = arith.constant dense<0xFF800000> : vector<4x8xf32>
    %90 = vector.multi_reduction <maximumf>, %89, %cst_36 [2] : vector<4x8x8xf32> to vector<4x8xf32>
    %91 = vector.shape_cast %90 : vector<4x8xf32> to vector<4x8x1xf32>
    %92 = vector.broadcast %91 : vector<4x8x1xf32> to vector<4x8x8xf32>
    %93 = arith.subf %89, %92 : vector<4x8x8xf32>
    %94 = math.exp %93 : vector<4x8x8xf32>
    %cst_37 = arith.constant dense<0.000000e+00> : vector<4x8xf32>
    %95 = vector.multi_reduction <add>, %94, %cst_37 [2] : vector<4x8x8xf32> to vector<4x8xf32>
    %96 = vector.shape_cast %95 : vector<4x8xf32> to vector<4x8x1xf32>
    %97 = tpu.reciprocal %96 {approx = true} : vector<4x8x1xf32> -> vector<4x8x1xf32>
    %98 = vector.broadcast %97 : vector<4x8x1xf32> to vector<4x8x8xf32>
    %99 = arith.mulf %94, %98 : vector<4x8x8xf32>
    "tpu.trace_start"() <{level = 10 : i32, message = "nqk,nkd->nqd"}> : () -> ()
    %cst_38 = arith.constant dense<0.000000e+00> : vector<4x8x32xf32>
    %100 = tpu.matmul %99, %87, %cst_38 {dimension_numbers = #tpu.dot_dimension_numbers<[2], [1], [1], [2], [0, 0, 0, 1, 1, 2], [0], [0]>} : vector<4x8x8xf32>, vector<4x8x32xf32>, vector<4x8x32xf32> -> vector<4x8x32xf32>
    "tpu.trace_stop"() : () -> ()
    %101 = vector.extract_strided_slice %68 {offsets = [0, 0, 64], sizes = [4, 8, 32], strides = [1, 1, 1]} : vector<4x8x384xf32> to vector<4x8x32xf32>
    %102 = vector.extract_strided_slice %68 {offsets = [0, 0, 192], sizes = [4, 8, 32], strides = [1, 1, 1]} : vector<4x8x384xf32> to vector<4x8x32xf32>
    %103 = vector.extract_strided_slice %68 {offsets = [0, 0, 320], sizes = [4, 8, 32], strides = [1, 1, 1]} : vector<4x8x384xf32> to vector<4x8x32xf32>
    "tpu.trace_start"() <{level = 10 : i32, message = "nqd,nkd->nqk"}> : () -> ()
    %cst_39 = arith.constant dense<0.000000e+00> : vector<4x8x8xf32>
    %104 = tpu.matmul %101, %102, %cst_39 {dimension_numbers = #tpu.dot_dimension_numbers<[2], [2], [1], [1], [0, 0, 0, 1, 1, 1], [0], [0]>} : vector<4x8x32xf32>, vector<4x8x32xf32>, vector<4x8x8xf32> -> vector<4x8x8xf32>
    "tpu.trace_stop"() : () -> ()
    %105 = arith.addf %104, %37 : vector<4x8x8xf32>
    %cst_40 = arith.constant dense<0xFF800000> : vector<4x8xf32>
    %106 = vector.multi_reduction <maximumf>, %105, %cst_40 [2] : vector<4x8x8xf32> to vector<4x8xf32>
    %107 = vector.shape_cast %106 : vector<4x8xf32> to vector<4x8x1xf32>
    %108 = vector.broadcast %107 : vector<4x8x1xf32> to vector<4x8x8xf32>
    %109 = arith.subf %105, %108 : vector<4x8x8xf32>
    %110 = math.exp %109 : vector<4x8x8xf32>
    %cst_41 = arith.constant dense<0.000000e+00> : vector<4x8xf32>
    %111 = vector.multi_reduction <add>, %110, %cst_41 [2] : vector<4x8x8xf32> to vector<4x8xf32>
    %112 = vector.shape_cast %111 : vector<4x8xf32> to vector<4x8x1xf32>
    %113 = tpu.reciprocal %112 {approx = true} : vector<4x8x1xf32> -> vector<4x8x1xf32>
    %114 = vector.broadcast %113 : vector<4x8x1xf32> to vector<4x8x8xf32>
    %115 = arith.mulf %110, %114 : vector<4x8x8xf32>
    "tpu.trace_start"() <{level = 10 : i32, message = "nqk,nkd->nqd"}> : () -> ()
    %cst_42 = arith.constant dense<0.000000e+00> : vector<4x8x32xf32>
    %116 = tpu.matmul %115, %103, %cst_42 {dimension_numbers = #tpu.dot_dimension_numbers<[2], [1], [1], [2], [0, 0, 0, 1, 1, 2], [0], [0]>} : vector<4x8x8xf32>, vector<4x8x32xf32>, vector<4x8x32xf32> -> vector<4x8x32xf32>
    "tpu.trace_stop"() : () -> ()
    %117 = vector.extract_strided_slice %68 {offsets = [0, 0, 96], sizes = [4, 8, 32], strides = [1, 1, 1]} : vector<4x8x384xf32> to vector<4x8x32xf32>
    %118 = vector.extract_strided_slice %68 {offsets = [0, 0, 224], sizes = [4, 8, 32], strides = [1, 1, 1]} : vector<4x8x384xf32> to vector<4x8x32xf32>
    %119 = vector.extract_strided_slice %68 {offsets = [0, 0, 352], sizes = [4, 8, 32], strides = [1, 1, 1]} : vector<4x8x384xf32> to vector<4x8x32xf32>
    "tpu.trace_start"() <{level = 10 : i32, message = "nqd,nkd->nqk"}> : () -> ()
    %cst_43 = arith.constant dense<0.000000e+00> : vector<4x8x8xf32>
    %120 = tpu.matmul %117, %118, %cst_43 {dimension_numbers = #tpu.dot_dimension_numbers<[2], [2], [1], [1], [0, 0, 0, 1, 1, 1], [0], [0]>} : vector<4x8x32xf32>, vector<4x8x32xf32>, vector<4x8x8xf32> -> vector<4x8x8xf32>
    "tpu.trace_stop"() : () -> ()
    %121 = arith.addf %120, %37 : vector<4x8x8xf32>
    %cst_44 = arith.constant dense<0xFF800000> : vector<4x8xf32>
    %122 = vector.multi_reduction <maximumf>, %121, %cst_44 [2] : vector<4x8x8xf32> to vector<4x8xf32>
    %123 = vector.shape_cast %122 : vector<4x8xf32> to vector<4x8x1xf32>
    %124 = vector.broadcast %123 : vector<4x8x1xf32> to vector<4x8x8xf32>
    %125 = arith.subf %121, %124 : vector<4x8x8xf32>
    %126 = math.exp %125 : vector<4x8x8xf32>
    %cst_45 = arith.constant dense<0.000000e+00> : vector<4x8xf32>
    %127 = vector.multi_reduction <add>, %126, %cst_45 [2] : vector<4x8x8xf32> to vector<4x8xf32>
    %128 = vector.shape_cast %127 : vector<4x8xf32> to vector<4x8x1xf32>
    %129 = tpu.reciprocal %128 {approx = true} : vector<4x8x1xf32> -> vector<4x8x1xf32>
    %130 = vector.broadcast %129 : vector<4x8x1xf32> to vector<4x8x8xf32>
    %131 = arith.mulf %126, %130 : vector<4x8x8xf32>
    "tpu.trace_start"() <{level = 10 : i32, message = "nqk,nkd->nqd"}> : () -> ()
    %cst_46 = arith.constant dense<0.000000e+00> : vector<4x8x32xf32>
    %132 = tpu.matmul %131, %119, %cst_46 {dimension_numbers = #tpu.dot_dimension_numbers<[2], [1], [1], [2], [0, 0, 0, 1, 1, 2], [0], [0]>} : vector<4x8x8xf32>, vector<4x8x32xf32>, vector<4x8x32xf32> -> vector<4x8x32xf32>
    "tpu.trace_stop"() : () -> ()
    %133 = tpu.concatenate %84, %100, %116, %132 in 2 : vector<4x8x32xf32>, vector<4x8x32xf32>, vector<4x8x32xf32>, vector<4x8x32xf32> -> vector<4x8x128xf32>
    %134 = vector.shape_cast %133 : vector<4x8x128xf32> to vector<32x128xf32>
    %c0_47 = arith.constant 0 : index
    %c0_48 = arith.constant 0 : index
    %c0_49 = arith.constant 0 : index
    %135 = vector.load %arg10[%c0_47, %c0_48, %c0_49] : memref<2x128x128xf32, #tpu.memory_space<vmem>>, vector<1x128x128xf32>
    %136 = vector.shape_cast %135 : vector<1x128x128xf32> to vector<128x128xf32>
    %cst_50 = arith.constant dense<0.000000e+00> : vector<32x128xf32>
    %137 = tpu.matmul %134, %136, %cst_50 {dimension_numbers = #tpu.dot_dimension_numbers<[1], [0], [0], [1], [0, 0, 1, 1], [], []>} : vector<32x128xf32>, vector<128x128xf32>, vector<32x128xf32> -> vector<32x128xf32>
    %c0_51 = arith.constant 0 : index
    %c0_52 = arith.constant 0 : index
    %138 = vector.load %arg11[%c0_51, %c0_52] : memref<2x128xf32, #tpu.memory_space<vmem>>, vector<1x128xf32>
    %139 = vector.broadcast %138 : vector<1x128xf32> to vector<32x128xf32>
    %140 = arith.addf %137, %139 : vector<32x128xf32>
    %141 = arith.addf %28, %140 : vector<32x128xf32>
    %c0_53 = arith.constant 0 : index
    %c0_54 = arith.constant 0 : index
    %142 = vector.load %arg12[%c0_53, %c0_54] : memref<2x128xf32, #tpu.memory_space<vmem>>, vector<1x128xf32>
    %c0_55 = arith.constant 0 : index
    %c0_56 = arith.constant 0 : index
    %143 = vector.load %arg13[%c0_55, %c0_56] : memref<2x128xf32, #tpu.memory_space<vmem>>, vector<1x128xf32>
    %cst_57 = arith.constant dense<0.000000e+00> : vector<32xf32>
    %144 = vector.multi_reduction <add>, %141, %cst_57 [1] : vector<32x128xf32> to vector<32xf32>
    %145 = vector.shape_cast %144 : vector<32xf32> to vector<32x1xf32>
    %cst_58 = arith.constant 1.280000e+02 : f32
    %146 = vector.broadcast %cst_58 : f32 to vector<32x1xf32>
    %147 = arith.divf %145, %146 : vector<32x1xf32>
    %148 = vector.broadcast %147 : vector<32x1xf32> to vector<32x128xf32>
    %149 = arith.subf %141, %148 : vector<32x128xf32>
    %150 = arith.mulf %149, %149 : vector<32x128xf32>
    %cst_59 = arith.constant dense<0.000000e+00> : vector<32xf32>
    %151 = vector.multi_reduction <add>, %150, %cst_59 [1] : vector<32x128xf32> to vector<32xf32>
    %152 = vector.shape_cast %151 : vector<32xf32> to vector<32x1xf32>
    %cst_60 = arith.constant 1.280000e+02 : f32
    %153 = vector.broadcast %cst_60 : f32 to vector<32x1xf32>
    %154 = arith.divf %152, %153 : vector<32x1xf32>
    %155 = vector.broadcast %147 : vector<32x1xf32> to vector<32x128xf32>
    %156 = arith.subf %141, %155 : vector<32x128xf32>
    %cst_61 = arith.constant 9.99999974E-6 : f32
    %157 = vector.broadcast %cst_61 : f32 to vector<32x1xf32>
    %158 = arith.addf %154, %157 : vector<32x1xf32>
    %159 = math.rsqrt %158 : vector<32x1xf32>
    %160 = vector.broadcast %159 : vector<32x1xf32> to vector<32x128xf32>
    %161 = arith.mulf %156, %160 : vector<32x128xf32>
    %162 = vector.broadcast %142 : vector<1x128xf32> to vector<32x128xf32>
    %163 = arith.mulf %161, %162 : vector<32x128xf32>
    %164 = vector.broadcast %143 : vector<1x128xf32> to vector<32x128xf32>
    %165 = arith.addf %163, %164 : vector<32x128xf32>
    %c0_62 = arith.constant 0 : index
    %c0_63 = arith.constant 0 : index
    %c0_64 = arith.constant 0 : index
    %166 = vector.load %arg14[%c0_62, %c0_63, %c0_64] : memref<2x128x256xf32, #tpu.memory_space<vmem>>, vector<1x128x256xf32>
    %167 = vector.shape_cast %166 : vector<1x128x256xf32> to vector<128x256xf32>
    %cst_65 = arith.constant dense<0.000000e+00> : vector<32x256xf32>
    %168 = tpu.matmul %165, %167, %cst_65 {dimension_numbers = #tpu.dot_dimension_numbers<[1], [0], [0], [1], [0, 0, 1, 1], [], []>} : vector<32x128xf32>, vector<128x256xf32>, vector<32x256xf32> -> vector<32x256xf32>
    %c0_66 = arith.constant 0 : index
    %c0_67 = arith.constant 0 : index
    %169 = vector.load %arg15[%c0_66, %c0_67] : memref<2x256xf32, #tpu.memory_space<vmem>>, vector<1x256xf32>
    %170 = vector.broadcast %169 : vector<1x256xf32> to vector<32x256xf32>
    %171 = arith.addf %168, %170 : vector<32x256xf32>
    %cst_68 = arith.constant 1.702000e+00 : f32
    %172 = vector.broadcast %cst_68 : f32 to vector<32x256xf32>
    %173 = arith.mulf %172, %171 : vector<32x256xf32>
    %174 = arith.negf %173 : vector<32x256xf32>
    %175 = math.exp %174 : vector<32x256xf32>
    %cst_69 = arith.constant 1.000000e+00 : f32
    %176 = vector.broadcast %cst_69 : f32 to vector<32x256xf32>
    %177 = arith.addf %176, %175 : vector<32x256xf32>
    %178 = arith.divf %176, %177 : vector<32x256xf32>
    %179 = arith.mulf %171, %178 : vector<32x256xf32>
    %c0_70 = arith.constant 0 : index
    %c0_71 = arith.constant 0 : index
    %c0_72 = arith.constant 0 : index
    %180 = vector.load %arg16[%c0_70, %c0_71, %c0_72] : memref<2x256x128xf32, #tpu.memory_space<vmem>>, vector<1x256x128xf32>
    %181 = vector.shape_cast %180 : vector<1x256x128xf32> to vector<256x128xf32>
    %cst_73 = arith.constant dense<0.000000e+00> : vector<32x128xf32>
    %182 = tpu.matmul %179, %181, %cst_73 {dimension_numbers = #tpu.dot_dimension_numbers<[1], [0], [0], [1], [0, 0, 1, 1], [], []>} : vector<32x256xf32>, vector<256x128xf32>, vector<32x128xf32> -> vector<32x128xf32>
    %c0_74 = arith.constant 0 : index
    %c0_75 = arith.constant 0 : index
    %183 = vector.load %arg17[%c0_74, %c0_75] : memref<2x128xf32, #tpu.memory_space<vmem>>, vector<1x128xf32>
    %184 = vector.broadcast %183 : vector<1x128xf32> to vector<32x128xf32>
    %185 = arith.addf %182, %184 : vector<32x128xf32>
    %186 = arith.addf %141, %185 : vector<32x128xf32>
    %c1 = arith.constant 1 : index
    %c0_76 = arith.constant 0 : index
    %187 = vector.load %arg6[%c1, %c0_76] : memref<2x128xf32, #tpu.memory_space<vmem>>, vector<1x128xf32>
    %c1_77 = arith.constant 1 : index
    %c0_78 = arith.constant 0 : index
    %188 = vector.load %arg7[%c1_77, %c0_78] : memref<2x128xf32, #tpu.memory_space<vmem>>, vector<1x128xf32>
    %cst_79 = arith.constant dense<0.000000e+00> : vector<32xf32>
    %189 = vector.multi_reduction <add>, %186, %cst_79 [1] : vector<32x128xf32> to vector<32xf32>
    %190 = vector.shape_cast %189 : vector<32xf32> to vector<32x1xf32>
    %cst_80 = arith.constant 1.280000e+02 : f32
    %191 = vector.broadcast %cst_80 : f32 to vector<32x1xf32>
    %192 = arith.divf %190, %191 : vector<32x1xf32>
    %193 = vector.broadcast %192 : vector<32x1xf32> to vector<32x128xf32>
    %194 = arith.subf %186, %193 : vector<32x128xf32>
    %195 = arith.mulf %194, %194 : vector<32x128xf32>
    %cst_81 = arith.constant dense<0.000000e+00> : vector<32xf32>
    %196 = vector.multi_reduction <add>, %195, %cst_81 [1] : vector<32x128xf32> to vector<32xf32>
    %197 = vector.shape_cast %196 : vector<32xf32> to vector<32x1xf32>
    %cst_82 = arith.constant 1.280000e+02 : f32
    %198 = vector.broadcast %cst_82 : f32 to vector<32x1xf32>
    %199 = arith.divf %197, %198 : vector<32x1xf32>
    %200 = vector.broadcast %192 : vector<32x1xf32> to vector<32x128xf32>
    %201 = arith.subf %186, %200 : vector<32x128xf32>
    %cst_83 = arith.constant 9.99999974E-6 : f32
    %202 = vector.broadcast %cst_83 : f32 to vector<32x1xf32>
    %203 = arith.addf %199, %202 : vector<32x1xf32>
    %204 = math.rsqrt %203 : vector<32x1xf32>
    %205 = vector.broadcast %204 : vector<32x1xf32> to vector<32x128xf32>
    %206 = arith.mulf %201, %205 : vector<32x128xf32>
    %207 = vector.broadcast %187 : vector<1x128xf32> to vector<32x128xf32>
    %208 = arith.mulf %206, %207 : vector<32x128xf32>
    %209 = vector.broadcast %188 : vector<1x128xf32> to vector<32x128xf32>
    %210 = arith.addf %208, %209 : vector<32x128xf32>
    %c1_84 = arith.constant 1 : index
    %c0_85 = arith.constant 0 : index
    %c0_86 = arith.constant 0 : index
    %211 = vector.load %arg8[%c1_84, %c0_85, %c0_86] : memref<2x128x384xf32, #tpu.memory_space<vmem>>, vector<1x128x384xf32>
    %212 = vector.shape_cast %211 : vector<1x128x384xf32> to vector<128x384xf32>
    %cst_87 = arith.constant dense<0.000000e+00> : vector<32x384xf32>
    %213 = tpu.matmul %210, %212, %cst_87 {dimension_numbers = #tpu.dot_dimension_numbers<[1], [0], [0], [1], [0, 0, 1, 1], [], []>} : vector<32x128xf32>, vector<128x384xf32>, vector<32x384xf32> -> vector<32x384xf32>
    %c1_88 = arith.constant 1 : index
    %c0_89 = arith.constant 0 : index
    %214 = vector.load %arg9[%c1_88, %c0_89] : memref<2x384xf32, #tpu.memory_space<vmem>>, vector<1x384xf32>
    %215 = vector.broadcast %214 : vector<1x384xf32> to vector<32x384xf32>
    %216 = arith.addf %213, %215 : vector<32x384xf32>
    %217 = vector.shape_cast %216 : vector<32x384xf32> to vector<4x8x384xf32>
    %218 = vector.extract_strided_slice %217 {offsets = [0, 0, 0], sizes = [4, 8, 32], strides = [1, 1, 1]} : vector<4x8x384xf32> to vector<4x8x32xf32>
    %219 = vector.extract_strided_slice %217 {offsets = [0, 0, 128], sizes = [4, 8, 32], strides = [1, 1, 1]} : vector<4x8x384xf32> to vector<4x8x32xf32>
    %220 = vector.extract_strided_slice %217 {offsets = [0, 0, 256], sizes = [4, 8, 32], strides = [1, 1, 1]} : vector<4x8x384xf32> to vector<4x8x32xf32>
    "tpu.trace_start"() <{level = 10 : i32, message = "nqd,nkd->nqk"}> : () -> ()
    %cst_90 = arith.constant dense<0.000000e+00> : vector<4x8x8xf32>
    %221 = tpu.matmul %218, %219, %cst_90 {dimension_numbers = #tpu.dot_dimension_numbers<[2], [2], [1], [1], [0, 0, 0, 1, 1, 1], [0], [0]>} : vector<4x8x32xf32>, vector<4x8x32xf32>, vector<4x8x8xf32> -> vector<4x8x8xf32>
    "tpu.trace_stop"() : () -> ()
    %222 = arith.addf %221, %37 : vector<4x8x8xf32>
    %cst_91 = arith.constant dense<0xFF800000> : vector<4x8xf32>
    %223 = vector.multi_reduction <maximumf>, %222, %cst_91 [2] : vector<4x8x8xf32> to vector<4x8xf32>
    %224 = vector.shape_cast %223 : vector<4x8xf32> to vector<4x8x1xf32>
    %225 = vector.broadcast %224 : vector<4x8x1xf32> to vector<4x8x8xf32>
    %226 = arith.subf %222, %225 : vector<4x8x8xf32>
    %227 = math.exp %226 : vector<4x8x8xf32>
    %cst_92 = arith.constant dense<0.000000e+00> : vector<4x8xf32>
    %228 = vector.multi_reduction <add>, %227, %cst_92 [2] : vector<4x8x8xf32> to vector<4x8xf32>
    %229 = vector.shape_cast %228 : vector<4x8xf32> to vector<4x8x1xf32>
    %230 = tpu.reciprocal %229 {approx = true} : vector<4x8x1xf32> -> vector<4x8x1xf32>
    %231 = vector.broadcast %230 : vector<4x8x1xf32> to vector<4x8x8xf32>
    %232 = arith.mulf %227, %231 : vector<4x8x8xf32>
    "tpu.trace_start"() <{level = 10 : i32, message = "nqk,nkd->nqd"}> : () -> ()
    %cst_93 = arith.constant dense<0.000000e+00> : vector<4x8x32xf32>
    %233 = tpu.matmul %232, %220, %cst_93 {dimension_numbers = #tpu.dot_dimension_numbers<[2], [1], [1], [2], [0, 0, 0, 1, 1, 2], [0], [0]>} : vector<4x8x8xf32>, vector<4x8x32xf32>, vector<4x8x32xf32> -> vector<4x8x32xf32>
    "tpu.trace_stop"() : () -> ()
    %234 = vector.extract_strided_slice %217 {offsets = [0, 0, 32], sizes = [4, 8, 32], strides = [1, 1, 1]} : vector<4x8x384xf32> to vector<4x8x32xf32>
    %235 = vector.extract_strided_slice %217 {offsets = [0, 0, 160], sizes = [4, 8, 32], strides = [1, 1, 1]} : vector<4x8x384xf32> to vector<4x8x32xf32>
    %236 = vector.extract_strided_slice %217 {offsets = [0, 0, 288], sizes = [4, 8, 32], strides = [1, 1, 1]} : vector<4x8x384xf32> to vector<4x8x32xf32>
    "tpu.trace_start"() <{level = 10 : i32, message = "nqd,nkd->nqk"}> : () -> ()
    %cst_94 = arith.constant dense<0.000000e+00> : vector<4x8x8xf32>
    %237 = tpu.matmul %234, %235, %cst_94 {dimension_numbers = #tpu.dot_dimension_numbers<[2], [2], [1], [1], [0, 0, 0, 1, 1, 1], [0], [0]>} : vector<4x8x32xf32>, vector<4x8x32xf32>, vector<4x8x8xf32> -> vector<4x8x8xf32>
    "tpu.trace_stop"() : () -> ()
    %238 = arith.addf %237, %37 : vector<4x8x8xf32>
    %cst_95 = arith.constant dense<0xFF800000> : vector<4x8xf32>
    %239 = vector.multi_reduction <maximumf>, %238, %cst_95 [2] : vector<4x8x8xf32> to vector<4x8xf32>
    %240 = vector.shape_cast %239 : vector<4x8xf32> to vector<4x8x1xf32>
    %241 = vector.broadcast %240 : vector<4x8x1xf32> to vector<4x8x8xf32>
    %242 = arith.subf %238, %241 : vector<4x8x8xf32>
    %243 = math.exp %242 : vector<4x8x8xf32>
    %cst_96 = arith.constant dense<0.000000e+00> : vector<4x8xf32>
    %244 = vector.multi_reduction <add>, %243, %cst_96 [2] : vector<4x8x8xf32> to vector<4x8xf32>
    %245 = vector.shape_cast %244 : vector<4x8xf32> to vector<4x8x1xf32>
    %246 = tpu.reciprocal %245 {approx = true} : vector<4x8x1xf32> -> vector<4x8x1xf32>
    %247 = vector.broadcast %246 : vector<4x8x1xf32> to vector<4x8x8xf32>
    %248 = arith.mulf %243, %247 : vector<4x8x8xf32>
    "tpu.trace_start"() <{level = 10 : i32, message = "nqk,nkd->nqd"}> : () -> ()
    %cst_97 = arith.constant dense<0.000000e+00> : vector<4x8x32xf32>
    %249 = tpu.matmul %248, %236, %cst_97 {dimension_numbers = #tpu.dot_dimension_numbers<[2], [1], [1], [2], [0, 0, 0, 1, 1, 2], [0], [0]>} : vector<4x8x8xf32>, vector<4x8x32xf32>, vector<4x8x32xf32> -> vector<4x8x32xf32>
    "tpu.trace_stop"() : () -> ()
    %250 = vector.extract_strided_slice %217 {offsets = [0, 0, 64], sizes = [4, 8, 32], strides = [1, 1, 1]} : vector<4x8x384xf32> to vector<4x8x32xf32>
    %251 = vector.extract_strided_slice %217 {offsets = [0, 0, 192], sizes = [4, 8, 32], strides = [1, 1, 1]} : vector<4x8x384xf32> to vector<4x8x32xf32>
    %252 = vector.extract_strided_slice %217 {offsets = [0, 0, 320], sizes = [4, 8, 32], strides = [1, 1, 1]} : vector<4x8x384xf32> to vector<4x8x32xf32>
    "tpu.trace_start"() <{level = 10 : i32, message = "nqd,nkd->nqk"}> : () -> ()
    %cst_98 = arith.constant dense<0.000000e+00> : vector<4x8x8xf32>
    %253 = tpu.matmul %250, %251, %cst_98 {dimension_numbers = #tpu.dot_dimension_numbers<[2], [2], [1], [1], [0, 0, 0, 1, 1, 1], [0], [0]>} : vector<4x8x32xf32>, vector<4x8x32xf32>, vector<4x8x8xf32> -> vector<4x8x8xf32>
    "tpu.trace_stop"() : () -> ()
    %254 = arith.addf %253, %37 : vector<4x8x8xf32>
    %cst_99 = arith.constant dense<0xFF800000> : vector<4x8xf32>
    %255 = vector.multi_reduction <maximumf>, %254, %cst_99 [2] : vector<4x8x8xf32> to vector<4x8xf32>
    %256 = vector.shape_cast %255 : vector<4x8xf32> to vector<4x8x1xf32>
    %257 = vector.broadcast %256 : vector<4x8x1xf32> to vector<4x8x8xf32>
    %258 = arith.subf %254, %257 : vector<4x8x8xf32>
    %259 = math.exp %258 : vector<4x8x8xf32>
    %cst_100 = arith.constant dense<0.000000e+00> : vector<4x8xf32>
    %260 = vector.multi_reduction <add>, %259, %cst_100 [2] : vector<4x8x8xf32> to vector<4x8xf32>
    %261 = vector.shape_cast %260 : vector<4x8xf32> to vector<4x8x1xf32>
    %262 = tpu.reciprocal %261 {approx = true} : vector<4x8x1xf32> -> vector<4x8x1xf32>
    %263 = vector.broadcast %262 : vector<4x8x1xf32> to vector<4x8x8xf32>
    %264 = arith.mulf %259, %263 : vector<4x8x8xf32>
    "tpu.trace_start"() <{level = 10 : i32, message = "nqk,nkd->nqd"}> : () -> ()
    %cst_101 = arith.constant dense<0.000000e+00> : vector<4x8x32xf32>
    %265 = tpu.matmul %264, %252, %cst_101 {dimension_numbers = #tpu.dot_dimension_numbers<[2], [1], [1], [2], [0, 0, 0, 1, 1, 2], [0], [0]>} : vector<4x8x8xf32>, vector<4x8x32xf32>, vector<4x8x32xf32> -> vector<4x8x32xf32>
    "tpu.trace_stop"() : () -> ()
    %266 = vector.extract_strided_slice %217 {offsets = [0, 0, 96], sizes = [4, 8, 32], strides = [1, 1, 1]} : vector<4x8x384xf32> to vector<4x8x32xf32>
    %267 = vector.extract_strided_slice %217 {offsets = [0, 0, 224], sizes = [4, 8, 32], strides = [1, 1, 1]} : vector<4x8x384xf32> to vector<4x8x32xf32>
    %268 = vector.extract_strided_slice %217 {offsets = [0, 0, 352], sizes = [4, 8, 32], strides = [1, 1, 1]} : vector<4x8x384xf32> to vector<4x8x32xf32>
    "tpu.trace_start"() <{level = 10 : i32, message = "nqd,nkd->nqk"}> : () -> ()
    %cst_102 = arith.constant dense<0.000000e+00> : vector<4x8x8xf32>
    %269 = tpu.matmul %266, %267, %cst_102 {dimension_numbers = #tpu.dot_dimension_numbers<[2], [2], [1], [1], [0, 0, 0, 1, 1, 1], [0], [0]>} : vector<4x8x32xf32>, vector<4x8x32xf32>, vector<4x8x8xf32> -> vector<4x8x8xf32>
    "tpu.trace_stop"() : () -> ()
    %270 = arith.addf %269, %37 : vector<4x8x8xf32>
    %cst_103 = arith.constant dense<0xFF800000> : vector<4x8xf32>
    %271 = vector.multi_reduction <maximumf>, %270, %cst_103 [2] : vector<4x8x8xf32> to vector<4x8xf32>
    %272 = vector.shape_cast %271 : vector<4x8xf32> to vector<4x8x1xf32>
    %273 = vector.broadcast %272 : vector<4x8x1xf32> to vector<4x8x8xf32>
    %274 = arith.subf %270, %273 : vector<4x8x8xf32>
    %275 = math.exp %274 : vector<4x8x8xf32>
    %cst_104 = arith.constant dense<0.000000e+00> : vector<4x8xf32>
    %276 = vector.multi_reduction <add>, %275, %cst_104 [2] : vector<4x8x8xf32> to vector<4x8xf32>
    %277 = vector.shape_cast %276 : vector<4x8xf32> to vector<4x8x1xf32>
    %278 = tpu.reciprocal %277 {approx = true} : vector<4x8x1xf32> -> vector<4x8x1xf32>
    %279 = vector.broadcast %278 : vector<4x8x1xf32> to vector<4x8x8xf32>
    %280 = arith.mulf %275, %279 : vector<4x8x8xf32>
    "tpu.trace_start"() <{level = 10 : i32, message = "nqk,nkd->nqd"}> : () -> ()
    %cst_105 = arith.constant dense<0.000000e+00> : vector<4x8x32xf32>
    %281 = tpu.matmul %280, %268, %cst_105 {dimension_numbers = #tpu.dot_dimension_numbers<[2], [1], [1], [2], [0, 0, 0, 1, 1, 2], [0], [0]>} : vector<4x8x8xf32>, vector<4x8x32xf32>, vector<4x8x32xf32> -> vector<4x8x32xf32>
    "tpu.trace_stop"() : () -> ()
    %282 = tpu.concatenate %233, %249, %265, %281 in 2 : vector<4x8x32xf32>, vector<4x8x32xf32>, vector<4x8x32xf32>, vector<4x8x32xf32> -> vector<4x8x128xf32>
    %283 = vector.shape_cast %282 : vector<4x8x128xf32> to vector<32x128xf32>
    %c1_106 = arith.constant 1 : index
    %c0_107 = arith.constant 0 : index
    %c0_108 = arith.constant 0 : index
    %284 = vector.load %arg10[%c1_106, %c0_107, %c0_108] : memref<2x128x128xf32, #tpu.memory_space<vmem>>, vector<1x128x128xf32>
    %285 = vector.shape_cast %284 : vector<1x128x128xf32> to vector<128x128xf32>
    %cst_109 = arith.constant dense<0.000000e+00> : vector<32x128xf32>
    %286 = tpu.matmul %283, %285, %cst_109 {dimension_numbers = #tpu.dot_dimension_numbers<[1], [0], [0], [1], [0, 0, 1, 1], [], []>} : vector<32x128xf32>, vector<128x128xf32>, vector<32x128xf32> -> vector<32x128xf32>
    %c1_110 = arith.constant 1 : index
    %c0_111 = arith.constant 0 : index
    %287 = vector.load %arg11[%c1_110, %c0_111] : memref<2x128xf32, #tpu.memory_space<vmem>>, vector<1x128xf32>
    %288 = vector.broadcast %287 : vector<1x128xf32> to vector<32x128xf32>
    %289 = arith.addf %286, %288 : vector<32x128xf32>
    %290 = arith.addf %186, %289 : vector<32x128xf32>
    %c1_112 = arith.constant 1 : index
    %c0_113 = arith.constant 0 : index
    %291 = vector.load %arg12[%c1_112, %c0_113] : memref<2x128xf32, #tpu.memory_space<vmem>>, vector<1x128xf32>
    %c1_114 = arith.constant 1 : index
    %c0_115 = arith.constant 0 : index
    %292 = vector.load %arg13[%c1_114, %c0_115] : memref<2x128xf32, #tpu.memory_space<vmem>>, vector<1x128xf32>
    %cst_116 = arith.constant dense<0.000000e+00> : vector<32xf32>
    %293 = vector.multi_reduction <add>, %290, %cst_116 [1] : vector<32x128xf32> to vector<32xf32>
    %294 = vector.shape_cast %293 : vector<32xf32> to vector<32x1xf32>
    %cst_117 = arith.constant 1.280000e+02 : f32
    %295 = vector.broadcast %cst_117 : f32 to vector<32x1xf32>
    %296 = arith.divf %294, %295 : vector<32x1xf32>
    %297 = vector.broadcast %296 : vector<32x1xf32> to vector<32x128xf32>
    %298 = arith.subf %290, %297 : vector<32x128xf32>
    %299 = arith.mulf %298, %298 : vector<32x128xf32>
    %cst_118 = arith.constant dense<0.000000e+00> : vector<32xf32>
    %300 = vector.multi_reduction <add>, %299, %cst_118 [1] : vector<32x128xf32> to vector<32xf32>
    %301 = vector.shape_cast %300 : vector<32xf32> to vector<32x1xf32>
    %cst_119 = arith.constant 1.280000e+02 : f32
    %302 = vector.broadcast %cst_119 : f32 to vector<32x1xf32>
    %303 = arith.divf %301, %302 : vector<32x1xf32>
    %304 = vector.broadcast %296 : vector<32x1xf32> to vector<32x128xf32>
    %305 = arith.subf %290, %304 : vector<32x128xf32>
    %cst_120 = arith.constant 9.99999974E-6 : f32
    %306 = vector.broadcast %cst_120 : f32 to vector<32x1xf32>
    %307 = arith.addf %303, %306 : vector<32x1xf32>
    %308 = math.rsqrt %307 : vector<32x1xf32>
    %309 = vector.broadcast %308 : vector<32x1xf32> to vector<32x128xf32>
    %310 = arith.mulf %305, %309 : vector<32x128xf32>
    %311 = vector.broadcast %291 : vector<1x128xf32> to vector<32x128xf32>
    %312 = arith.mulf %310, %311 : vector<32x128xf32>
    %313 = vector.broadcast %292 : vector<1x128xf32> to vector<32x128xf32>
    %314 = arith.addf %312, %313 : vector<32x128xf32>
    %c1_121 = arith.constant 1 : index
    %c0_122 = arith.constant 0 : index
    %c0_123 = arith.constant 0 : index
    %315 = vector.load %arg14[%c1_121, %c0_122, %c0_123] : memref<2x128x256xf32, #tpu.memory_space<vmem>>, vector<1x128x256xf32>
    %316 = vector.shape_cast %315 : vector<1x128x256xf32> to vector<128x256xf32>
    %cst_124 = arith.constant dense<0.000000e+00> : vector<32x256xf32>
    %317 = tpu.matmul %314, %316, %cst_124 {dimension_numbers = #tpu.dot_dimension_numbers<[1], [0], [0], [1], [0, 0, 1, 1], [], []>} : vector<32x128xf32>, vector<128x256xf32>, vector<32x256xf32> -> vector<32x256xf32>
    %c1_125 = arith.constant 1 : index
    %c0_126 = arith.constant 0 : index
    %318 = vector.load %arg15[%c1_125, %c0_126] : memref<2x256xf32, #tpu.memory_space<vmem>>, vector<1x256xf32>
    %319 = vector.broadcast %318 : vector<1x256xf32> to vector<32x256xf32>
    %320 = arith.addf %317, %319 : vector<32x256xf32>
    %cst_127 = arith.constant 1.702000e+00 : f32
    %321 = vector.broadcast %cst_127 : f32 to vector<32x256xf32>
    %322 = arith.mulf %321, %320 : vector<32x256xf32>
    %323 = arith.negf %322 : vector<32x256xf32>
    %324 = math.exp %323 : vector<32x256xf32>
    %cst_128 = arith.constant 1.000000e+00 : f32
    %325 = vector.broadcast %cst_128 : f32 to vector<32x256xf32>
    %326 = arith.addf %325, %324 : vector<32x256xf32>
    %327 = arith.divf %325, %326 : vector<32x256xf32>
    %328 = arith.mulf %320, %327 : vector<32x256xf32>
    %c1_129 = arith.constant 1 : index
    %c0_130 = arith.constant 0 : index
    %c0_131 = arith.constant 0 : index
    %329 = vector.load %arg16[%c1_129, %c0_130, %c0_131] : memref<2x256x128xf32, #tpu.memory_space<vmem>>, vector<1x256x128xf32>
    %330 = vector.shape_cast %329 : vector<1x256x128xf32> to vector<256x128xf32>
    %cst_132 = arith.constant dense<0.000000e+00> : vector<32x128xf32>
    %331 = tpu.matmul %328, %330, %cst_132 {dimension_numbers = #tpu.dot_dimension_numbers<[1], [0], [0], [1], [0, 0, 1, 1], [], []>} : vector<32x256xf32>, vector<256x128xf32>, vector<32x128xf32> -> vector<32x128xf32>
    %c1_133 = arith.constant 1 : index
    %c0_134 = arith.constant 0 : index
    %332 = vector.load %arg17[%c1_133, %c0_134] : memref<2x128xf32, #tpu.memory_space<vmem>>, vector<1x128xf32>
    %333 = vector.broadcast %332 : vector<1x128xf32> to vector<32x128xf32>
    %334 = arith.addf %331, %333 : vector<32x128xf32>
    %335 = arith.addf %290, %334 : vector<32x128xf32>
    %c0_135 = arith.constant 0 : index
    %c0_136 = arith.constant 0 : index
    %336 = vector.load %arg18[%c0_135, %c0_136] : memref<128x128xf32, #tpu.memory_space<vmem>>, vector<128x128xf32>
    %cst_137 = arith.constant dense<0.000000e+00> : vector<32x128xf32>
    %337 = tpu.matmul %335, %336, %cst_137 {dimension_numbers = #tpu.dot_dimension_numbers<[1], [0], [0], [1], [0, 0, 1, 1], [], []>} : vector<32x128xf32>, vector<128x128xf32>, vector<32x128xf32> -> vector<32x128xf32>
    %c0_138 = arith.constant 0 : index
    %c0_139 = arith.constant 0 : index
    %338 = vector.load %arg19[%c0_138, %c0_139] : memref<1x128xf32, #tpu.memory_space<vmem>>, vector<1x128xf32>
    %339 = vector.broadcast %338 : vector<1x128xf32> to vector<32x128xf32>
    %340 = arith.addf %337, %339 : vector<32x128xf32>
    %c0_140 = arith.constant 0 : index
    %c0_141 = arith.constant 0 : index
    %341 = vector.load %arg20[%c0_140, %c0_141] : memref<32x128xf32, #tpu.memory_space<vmem>>, vector<32x128xf32>
    tpu.vector_store %arg20[%c0_140, %c0_141], %340 {strides = array<i32>} : memref<32x128xf32, #tpu.memory_space<vmem>>, vector<32x128xf32>,
    return
  }
  func.func @transform_0(%arg0: i32) -> (i32, i32) {
    %c0_i32 = arith.constant 0 : i32
    %c0_i32_0 = arith.constant 0 : i32
    %c0_i32_1 = arith.constant 0 : i32
    return %c0_i32, %c0_i32_0 : i32, i32
  }
  func.func @transform_1(%arg0: i32) -> (i32, i32) {
    %c0_i32 = arith.constant 0 : i32
    %c0_i32_0 = arith.constant 0 : i32
    %c0_i32_1 = arith.constant 0 : i32
    return %c0_i32, %c0_i32_0 : i32, i32
  }
  func.func @transform_2(%arg0: i32) -> (i32, i32) {
    %c0_i32 = arith.constant 0 : i32
    %c0_i32_0 = arith.constant 0 : i32
    %c0_i32_1 = arith.constant 0 : i32
    return %c0_i32, %c0_i32_0 : i32, i32
  }
  func.func @transform_3(%arg0: i32) -> (i32, i32) {
    %c0_i32 = arith.constant 0 : i32
    %c0_i32_0 = arith.constant 0 : i32
    %c0_i32_1 = arith.constant 0 : i32
    return %c0_i32, %c0_i32_0 : i32, i32
  }
  func.func @transform_4(%arg0: i32) -> (i32, i32) {
    %c0_i32 = arith.constant 0 : i32
    %c0_i32_0 = arith.constant 0 : i32
    %c0_i32_1 = arith.constant 0 : i32
    return %c0_i32, %c0_i32_0 : i32, i32
  }
  func.func @transform_5(%arg0: i32) -> (i32, i32) {
    %c0_i32 = arith.constant 0 : i32
    %c0_i32_0 = arith.constant 0 : i32
    %c0_i32_1 = arith.constant 0 : i32
    return %c0_i32, %c0_i32_0 : i32, i32
  }
  func.func @transform_6(%arg0: i32) -> (i32, i32) {
    %c0_i32 = arith.constant 0 : i32
    %c0_i32_0 = arith.constant 0 : i32
    %c0_i32_1 = arith.constant 0 : i32
    return %c0_i32, %c0_i32_0 : i32, i32
  }
  func.func @transform_7(%arg0: i32) -> (i32, i32, i32) {
    %c0_i32 = arith.constant 0 : i32
    %c0_i32_0 = arith.constant 0 : i32
    %c0_i32_1 = arith.constant 0 : i32
    %c0_i32_2 = arith.constant 0 : i32
    return %c0_i32, %c0_i32_0, %c0_i32_1 : i32, i32, i32
  }
  func.func @transform_8(%arg0: i32) -> (i32, i32) {
    %c0_i32 = arith.constant 0 : i32
    %c0_i32_0 = arith.constant 0 : i32
    %c0_i32_1 = arith.constant 0 : i32
    return %c0_i32, %c0_i32_0 : i32, i32
  }
  func.func @transform_9(%arg0: i32) -> (i32, i32, i32) {
    %c0_i32 = arith.constant 0 : i32
    %c0_i32_0 = arith.constant 0 : i32
    %c0_i32_1 = arith.constant 0 : i32
    %c0_i32_2 = arith.constant 0 : i32
    return %c0_i32, %c0_i32_0, %c0_i32_1 : i32, i32, i32
  }
  func.func @transform_10(%arg0: i32) -> (i32, i32) {
    %c0_i32 = arith.constant 0 : i32
    %c0_i32_0 = arith.constant 0 : i32
    %c0_i32_1 = arith.constant 0 : i32
    return %c0_i32, %c0_i32_0 : i32, i32
  }
  func.func @transform_11(%arg0: i32) -> (i32, i32) {
    %c0_i32 = arith.constant 0 : i32
    %c0_i32_0 = arith.constant 0 : i32
    %c0_i32_1 = arith.constant 0 : i32
    return %c0_i32, %c0_i32_0 : i32, i32
  }
  func.func @transform_12(%arg0: i32) -> (i32, i32) {
    %c0_i32 = arith.constant 0 : i32
    %c0_i32_0 = arith.constant 0 : i32
    %c0_i32_1 = arith.constant 0 : i32
    return %c0_i32, %c0_i32_0 : i32, i32
  }
  func.func @transform_13(%arg0: i32) -> (i32, i32, i32) {
    %c0_i32 = arith.constant 0 : i32
    %c0_i32_0 = arith.constant 0 : i32
    %c0_i32_1 = arith.constant 0 : i32
    %c0_i32_2 = arith.constant 0 : i32
    return %c0_i32, %c0_i32_0, %c0_i32_1 : i32, i32, i32
  }
  func.func @transform_14(%arg0: i32) -> (i32, i32) {
    %c0_i32 = arith.constant 0 : i32
    %c0_i32_0 = arith.constant 0 : i32
    %c0_i32_1 = arith.constant 0 : i32
    return %c0_i32, %c0_i32_0 : i32, i32
  }
  func.func @transform_15(%arg0: i32) -> (i32, i32, i32) {
    %c0_i32 = arith.constant 0 : i32
    %c0_i32_0 = arith.constant 0 : i32
    %c0_i32_1 = arith.constant 0 : i32
    %c0_i32_2 = arith.constant 0 : i32
    return %c0_i32, %c0_i32_0, %c0_i32_1 : i32, i32, i32
  }
  func.func @transform_16(%arg0: i32) -> (i32, i32) {
    %c0_i32 = arith.constant 0 : i32
    %c0_i32_0 = arith.constant 0 : i32
    %c0_i32_1 = arith.constant 0 : i32
    return %c0_i32, %c0_i32_0 : i32, i32
  }
  func.func @transform_17(%arg0: i32) -> (i32, i32) {
    %c0_i32 = arith.constant 0 : i32
    %c0_i32_0 = arith.constant 0 : i32
    %c0_i32_1 = arith.constant 0 : i32
    return %c0_i32, %c0_i32_0 : i32, i32
  }
  func.func @transform_18(%arg0: i32) -> (i32, i32) {
    %c0_i32 = arith.constant 0 : i32
    %c0_i32_0 = arith.constant 0 : i32
    %c0_i32_1 = arith.constant 0 : i32
    return %c0_i32, %c0_i32_0 : i32, i32
  }
  func.func @transform_19(%arg0: i32) -> (i32, i32) {
    %c0_i32 = arith.constant 0 : i32
    %c0_i32_0 = arith.constant 0 : i32
    %c0_i32_1 = arith.constant 0 : i32
    return %c0_i32, %c0_i32_0 : i32, i32
  }
}

</mosaic_0001>

<bundles_post_ra>
// kernel: pairwise_vit_forward.1
= control target key start
LH: loop header
LB: loop body
LE: loop exit
PB: predicated region body
PF: predicated region fallthrough
CT: control target
= control target key end

     0   :  { %vm9158_vm0 = vmmov 0   ;;  %vm563_vm1 = vcmask 261120   ;;  %vm868_vm3 = vcmask 64512   ;;  %s9162_s22 = smov 32   ;;  %vm3241_vm4 = vcmask 523264   ;;  %s11197_s1 = inlined_call_operand.vmem [shape: f32[256,128], index: 1, kind: input, shape index: {}]   ;;  %s11198_s0 = inlined_call_operand.vmem [shape: f32[32,256], index: 0, kind: input, shape index: {}]   ;;  %s11199_s2 = inlined_call_operand.vmem [shape: f32[32,128], index: 2, kind: input, shape index: {}]   ;;  %s11200_s3 = inlined_call_operand.vmem [shape: f32[1,128], index: 3, kind: input, shape index: {}]   ;;  %s11201_s4 = inlined_call_operand.vmem [shape: f32[1,128], index: 4, kind: input, shape index: {}]   ;;  %s11202_s7 = inlined_call_operand.vmem [shape: f32[2,128,384], index: 7, kind: input, shape index: {}]   ;;  %s11203_s5 = inlined_call_operand.vmem [shape: f32[2,128], index: 5, kind: input, shape index: {}]   ;;  %s11204_s6 = inlined_call_operand.vmem [shape: f32[2,128], index: 6, kind: input, shape index: {}]   ;;  %s11205_s8 = inlined_call_operand.vmem [shape: f32[2,384], index: 8, kind: input, shape index: {}]   ;;  %s11206_s9 = inlined_call_operand.vmem [shape: f32[2,128,128], index: 9, kind: input, shape index: {}]   ;;  %s11207_s10 = inlined_call_operand.vmem [shape: f32[2,128], index: 10, kind: input, shape index: {}]   ;;  %s11208_s13 = inlined_call_operand.vmem [shape: f32[2,128,256], index: 13, kind: input, shape index: {}]   ;;  %s11209_s11 = inlined_call_operand.vmem [shape: f32[2,128], index: 11, kind: input, shape index: {}]   ;;  %s11210_s12 = inlined_call_operand.vmem [shape: f32[2,128], index: 12, kind: input, shape index: {}]   ;;  %s11211_s15 = inlined_call_operand.vmem [shape: f32[2,256,128], index: 15, kind: input, shape index: {}]   ;;  %s11212_s14 = inlined_call_operand.vmem [shape: f32[2,256], index: 14, kind: input, shape index: {}]   ;;  %s11213_s16 = inlined_call_operand.vmem [shape: f32[2,128], index: 16, kind: input, shape index: {}]   ;;  %s11214_s17 = inlined_call_operand.vmem [shape: f32[128,128], index: 17, kind: input, shape index: {}]   ;;  %s11215_s18 = inlined_call_operand.vmem [shape: f32[1,128], index: 18, kind: input, shape index: {}]   ;;  %s11216_s19 = inlined_call_operand.vmem [shape: f32[32,128], index: 19, kind: output, shape index: {}]  }
   0x1   :  { %11220 = sst [smem:[#allocation2_spill]] %s11197_s1  ;;  %vm3246_vm5 = vcmask 785408  }
   0x2   :  { %11221 = sst [smem:[#allocation3_spill]] %s11198_s0  ;;  %s11224_s20 = sld [smem:[#allocation2_spill]] }
   0x3   :  { %11222 = sst [smem:[#allocation4_spill]] %s11199_s2  ;;  %s11225_s26 = sld [smem:[#allocation3_spill]] }
   0x4   :  { %11223 = sst [smem:[#allocation5_spill]] %s11200_s3  ;;  %s11226_s30 = sld [smem:[#allocation4_spill]] }
   0x5   :  { %s11227_s25 = sld [smem:[#allocation5_spill]]  ;;  %s9160_s0 = smov 96  }
   0x8   :  { %v86_v0 = vld [vmem:[%s11224_s20 + $0x80] sm:$0xff]  ;;  %v87_v1 = vld [vmem:[%s11224_s20 + $0x88] sm:$0xff]  ;;  %v88_v5 = vld [vmem:[%s11224_s20 + $0x90] sm:$0xff] }
   0x9   :  { %v70_v2 = vld [vmem:[%s11224_s20] sm:$0xff]  ;;  %v8475_v3 = vpack.c.bf16 %v87_v1, %v86_v0  ;;  %v71_v4 = vld [vmem:[%s11224_s20 + $0x8] sm:$0xff]  ;;  %v89_v6 = vld [vmem:[%s11224_s20 + $0x98] sm:$0xff] }
   0xa   :  { %v8477_v7 = vpack.c.bf16 %v71_v4, %v70_v2  ;;  %v8479_v8 = vpack.c.bf16 %v89_v6, %v88_v5  ;;  %v72_v9 = vld [vmem:[%s11224_s20 + $0x10] sm:$0xff]  ;;  %v73_v10 = vld [vmem:[%s11224_s20 + $0x18] sm:$0xff]  ;;  %v90_v11 = vld [vmem:[%s11224_s20 + $0xa0] sm:$0xff] }
   0xb   :  { %8476 = vmatprep.subr.bf16.mxu0 %v8475_v3  ;;  %v91_v12 = vld [vmem:[%s11224_s20 + $0xa8] sm:$0xff]  ;;  %v8481_v13 = vpack.c.bf16 %v73_v10, %v72_v9  ;;  %v74_v15 = vld [vmem:[%s11224_s20 + $0x20] sm:$0xff]  ;;  %v92_v17 = vld [vmem:[%s11224_s20 + $0xb0] sm:$0xff] }
   0xc   :  { %8478 = vmatpush3.bf16.msra.mxu0 %v8477_v7  ;;  %v8483_v14 = vpack.c.bf16 %v91_v12, %v90_v11  ;;  %v75_v16 = vld [vmem:[%s11224_s20 + $0x28] sm:$0xff]  ;;  %v93_v18 = vld [vmem:[%s11224_s20 + $0xb8] sm:$0xff]  ;;  %v76_v21 = vld [vmem:[%s11224_s20 + $0x30] sm:$0xff] }
   0xd   :  { %8480 = vmatprep.subr.bf16.mxu0 %v8479_v8  ;;  %v8485_v19 = vpack.c.bf16 %v75_v16, %v74_v15  ;;  %v8487_v20 = vpack.c.bf16 %v93_v18, %v92_v17  ;;  %v77_v22 = vld [vmem:[%s11224_s20 + $0x38] sm:$0xff]  ;;  %v94_v23 = vld [vmem:[%s11224_s20 + $0xc0] sm:$0xff]  ;;  %v95_v24 = vld [vmem:[%s11224_s20 + $0xc8] sm:$0xff] }
   0xe   :  { %v63_v25 = vld [vmem:[%s11225_s26 + $0x8] sm:$0xff]  ;;  %v8489_v26 = vpack.c.bf16 %v77_v22, %v76_v21  ;;  %v8491_v27 = vpack.c.bf16 %v95_v24, %v94_v23  ;;  %v78_v28 = vld [vmem:[%s11224_s20 + $0x40] sm:$0xff]  ;;  %v96_v30 = vld [vmem:[%s11224_s20 + $0xd0] sm:$0xff] }
   0xf   :  { %170 = vmatprep.mubr.f32.mxu0 %v63_v25  ;;  %v79_v29 = vld [vmem:[%s11224_s20 + $0x48] sm:$0xff]  ;;  %v97_v31 = vld [vmem:[%s11224_s20 + $0xd8] sm:$0xff]  ;;  %v80_v34 = vld [vmem:[%s11224_s20 + $0x50] sm:$0xff] }
  0x10   :  { %8482 = vmatpush3.bf16.msra.mxu0 %v8481_v13  ;;  %v8493_v32 = vpack.c.bf16 %v79_v29, %v78_v28  ;;  %v8495_v33 = vpack.c.bf16 %v97_v31, %v96_v30  ;;  %v81_v35 = vld [vmem:[%s11224_s20 + $0x58] sm:$0xff]  ;;  %v98_v36 = vld [vmem:[%s11224_s20 + $0xe0] sm:$0xff]  ;;  %v99_v37 = vld [vmem:[%s11224_s20 + $0xe8] sm:$0xff] }
  0x11   :  { %8484 = vmatprep.subr.bf16.mxu0 %v8483_v14  ;;  %v8497_v38 = vpack.c.bf16 %v81_v35, %v80_v34  ;;  %v8499_v39 = vpack.c.bf16 %v99_v37, %v98_v36  ;;  %v82_v40 = vld [vmem:[%s11224_s20 + $0x60] sm:$0xff]  ;;  %v83_v41 = vld [vmem:[%s11224_s20 + $0x68] sm:$0xff]  ;;  %v100_v42 = vld [vmem:[%s11224_s20 + $0xf0] sm:$0xff] }
  0x12   :  { %v101_v43 = vld [vmem:[%s11224_s20 + $0xf8] sm:$0xff]  ;;  %v8501_v44 = vpack.c.bf16 %v83_v41, %v82_v40  ;;  %v84_v46 = vld [vmem:[%s11224_s20 + $0x70] sm:$0xff]  ;;  %v62_v49 = vld [vmem:[%s11225_s26] sm:$0xff] }
  0x13   :  { %v8503_v45 = vpack.c.bf16 %v101_v43, %v100_v42  ;;  %v85_v47 = vld [vmem:[%s11224_s20 + $0x78] sm:$0xff]  ;;  %v64_v51 = vld [vmem:[%s11225_s26 + $0x10] sm:$0xff]  ;;  %v67_v52 = vld [vmem:[%s11225_s26 + $0x28] sm:$0xff] }
  0x14   :  { %8486 = vmatpush3.bf16.msra.mxu0 %v8485_v19  ;;  %v8505_v48 = vpack.c.bf16 %v85_v47, %v84_v46  ;;  %v65_v50 = vld [vmem:[%s11225_s26 + $0x18] sm:$0xff]  ;;  %v66_v53 = vld [vmem:[%s11225_s26 + $0x20] sm:$0xff]  ;;  %v68_v55 = vld [vmem:[%s11225_s26 + $0x30] sm:$0xff] }
  0x15   :  { %8488 = vmatprep.subr.bf16.mxu0 %v8487_v20  ;;  %v69_v54 = vld [vmem:[%s11225_s26 + $0x38] sm:$0xff]  ;;  %v102_v58 = vld [vmem:[%s11226_s30] sm:$0xff]  ;;  %v103_v63 = vld [vmem:[%s11226_s30 + $0x8] sm:$0xff]  ;;  %s9161_s26 = smov 64  }
  0x16   :  { %v104_v4 = vld [vmem:[%s11226_s30 + $0x10] sm:$0xff]  ;;  %v105_v9 = vld [vmem:[%s11226_s30 + $0x18] sm:$0xff]  ;;  %v7348_v41 = vld [vmem:[%s11227_s25] ss:$0 sm:$0xff] }
  0x17   :  { %v7349_v43 = vld [vmem:[%s11201_s4] ss:$0 sm:$0xff] }
  0x18   :  { %8490 = vmatpush3.bf16.msra.mxu0 %v8489_v26 }
  0x19   :  { %8492 = vmatprep.subr.bf16.mxu0 %v8491_v27 }
  0x1c   :  { %8494 = vmatpush3.bf16.msra.mxu0 %v8493_v32 }
  0x1d   :  { %8496 = vmatprep.subr.bf16.mxu0 %v8495_v33 }
  0x20   :  { %8498 = vmatpush3.bf16.msra.mxu0 %v8497_v38 }
  0x21   :  { %8500 = vmatprep.subr.bf16.mxu0 %v8499_v39 }
  0x24   :  { %8502 = vmatpush3.bf16.msra.mxu0 %v8501_v44 }
  0x25   :  { %8504 = vmatprep.subr.bf16.mxu0 %v8503_v45 }
  0x28   :  { %8506 = vmatpush3.bf16.msra.mxu0 %v8505_v48 }
  0x2b   :  { %171 = vmatmul.mubr.f32.vlgmr.msra.gmra.mrb[0].mxu0 %v62_v49 }
  0x2c   :  { %175 = vmatprep.mubr.f32.mxu0 %v65_v50 }
  0x2f   :  { %176 = vmatmul.mubr.f32.gmra.mrb[2].mxu0 %v64_v51 }
  0x30   :  { %180 = vmatprep.mubr.f32.mxu0 %v67_v52 }
  0x33   :  { %181 = vmatmul.mubr.f32.gmra.mrb[4].mxu0 %v66_v53 }
  0x34   :  { %185 = vmatprep.mubr.f32.mxu0 %v69_v54 }
  0x37   :  { %186 = vmatmul.mubr.f32.gmra.mrb[6].mxu0 %v68_v55 }
  0xfe   :  { %v7637_v56 = vpop.f32.mrb[0].mxu0 }
  0xff   :  { %v7638_v57 = vpop.f32.mrb[1].mxu0 }
 0x100   :  { %v7639_v59 = vadd.f32 %v7638_v57, %v7637_v56 }
 0x102   :  { %v7640_v60 = vpop.f32.mrb[2].mxu0  ;;  %v173_v61 = vadd.f32 %v7639_v59, %v102_v58  ;;  %v325_v58 = vld [vmem:[%s11202_s7 + $0x8] sm:$0xff]  ;;  %v328_v59 = vld [vmem:[%s11202_s7 + $0x20] sm:$0xff] }
 0x103   :  { %v7641_v62 = vpop.f32.mrb[3].mxu0 }
 0x104   :  { %v7642_v0 = vadd.f32 %v7641_v62, %v7640_v60  ;;  %193 = vadd.xlane.f32.xlu0 %v173_v61  ;;  %v324_v60 = vld [vmem:[%s11202_s7] sm:$0xff]  ;;  %v327_v62 = vld [vmem:[%s11202_s7 + $0x18] sm:$0xff] }
 0x106   :  { %v7643_v1 = vpop.f32.mrb[4].mxu0  ;;  %v178_v2 = vadd.f32 %v7642_v0, %v103_v63  ;;  %v331_v63 = vld [vmem:[%s11202_s7 + $0x38] sm:$0xff]  ;;  %v334_v0 = vld [vmem:[%s11202_s7 + $0x50] sm:$0xff] }
 0x107   :  { %v7644_v3 = vpop.f32.mrb[5].mxu0 }
 0x108   :  { %v7645_v5 = vadd.f32 %v7644_v3, %v7643_v1  ;;  %195 = vadd.xlane.f32.xlu0 %v178_v2  ;;  %v8509_v1 = vpack.c.bf16 %v327_v62, %v324_v60  ;;  %v326_v3 = vld [vmem:[%s11202_s7 + $0x10] sm:$0xff]  ;;  %v353_v60 = vld [vmem:[%s11202_s7 + $0xe8] sm:$0xff] }
 0x109   :  { %v357_v62 = vld [vmem:[%s11202_s7 + $0x108] sm:$0xff] }
 0x10a   :  { %v7646_v6 = vpop.f32.mrb[6].mxu0  ;;  %v183_v7 = vadd.f32 %v7645_v5, %v104_v4  ;;  %v329_v4 = vld [vmem:[%s11202_s7 + $0x28] sm:$0xff]  ;;  %v330_v5 = vld [vmem:[%s11202_s7 + $0x30] sm:$0xff] }
 0x10b   :  { %v7647_v8 = vpop.f32.mrb[7].mxu0 }
 0x10c   :  { %v7648_v10 = vadd.f32 %v7647_v8, %v7646_v6  ;;  %197 = vadd.xlane.f32.xlu1 %v183_v7  ;;  %v8539_v6 = vpack.c.bf16 %v329_v4, %v326_v3  ;;  %v337_v8 = vld [vmem:[%s11202_s7 + $0x68] sm:$0xff]  ;;  %v356_v3 = vld [vmem:[%s11202_s7 + $0x100] sm:$0xff] }
 0x10e   :  { %v188_v11 = vadd.f32 %v7648_v10, %v105_v9  ;;  %v340_v9 = vld [vmem:[%s11202_s7 + $0x80] sm:$0xff]  ;;  %8540 = vmatprep.subr.bf16.mxu0 %v8539_v6 }
 0x10f   :  { %8542 = vmatpush3.bf16.msra.mxu0 %v8539_v6  ;;  %v360_v6 = vld [vmem:[%s11202_s7 + $0x120] sm:$0xff] }
 0x110   :  { %199 = vadd.xlane.f32.xlu1 %v188_v11 }
 0x191   :  { %v194_v12 = vpop.xlane.xlu0 %193 }
 0x192   :  { %v202_v13 = vmul.f32 0.0078125, %v194_v12  ;;  %v335_v12 = vld [vmem:[%s11202_s7 + $0x58] sm:$0xff] }
 0x194   :  { %v206_v14 = vsub.f32 %v173_v61, %v202_v13  ;;  %v8507_v61 = vpack.c.bf16 %v328_v59, %v325_v58  ;;  %v8515_v13 = vpack.c.bf16 %v340_v9, %v337_v8  ;;  %v350_v58 = vld [vmem:[%s11202_s7 + $0xd0] sm:$0xff] }
 0x195   :  { %v196_v15 = vpop.xlane.xlu0 %195 }
 0x196   :  { %v203_v16 = vmul.f32 0.0078125, %v196_v15  ;;  %v210_v17 = vmul.f32 %v206_v14, %v206_v14  ;;  %8508 = vmatprep.subr.bf16.mxu1 %v8507_v61  ;;  %v336_v15 = vld [vmem:[%s11202_s7 + $0x60] sm:$0xff]  ;;  %v354_v61 = vld [vmem:[%s11202_s7 + $0xf0] sm:$0xff] }
 0x197   :  { %8510 = vmatpush1.bf16.msra.mxu1 %v8509_v1  ;;  %v361_v1 = vld [vmem:[%s11202_s7 + $0x128] sm:$0xff] }
 0x198   :  { %214 = vadd.xlane.f32.xlu0 %v210_v17  ;;  %v207_v18 = vsub.f32 %v178_v2, %v203_v16  ;;  %v8511_v2 = vpack.c.bf16 %v334_v0, %v331_v63  ;;  %v339_v16 = vld [vmem:[%s11202_s7 + $0x78] sm:$0xff]  ;;  %v8555_v63 = vpack.c.bf16 %v353_v60, %v350_v58  ;;  %v8529_v0 = vpack.c.bf16 %v357_v62, %v354_v61  ;;  %v372_v60 = vld [vmem:[%s11205_s8] ss:$2 sm:$0x7] }
 0x199   :  { %v198_v19 = vpop.xlane.xlu1 %197  ;;  %v8517_v17 = vpack.c.bf16 %v339_v16, %v336_v15  ;;  %v366_v15 = vld [vmem:[%s11202_s7 + $0x150] sm:$0xff]  ;;  %v369_v16 = vld [vmem:[%s11202_s7 + $0x168] sm:$0xff] }
 0x19a   :  { %v204_v20 = vmul.f32 0.0078125, %v198_v19  ;;  %v211_v21 = vmul.f32 %v207_v18, %v207_v18  ;;  %8512 = vmatprep.subr.bf16.mxu1 %v8511_v2  ;;  %v364_v2 = vld [vmem:[%s11202_s7 + $0x140] sm:$0xff] }
 0x19b   :  { %v8531_v4 = vpack.c.bf16 %v364_v2, %v361_v1 }
 0x19c   :  { %216 = vadd.xlane.f32.xlu1 %v211_v21  ;;  %v208_v22 = vsub.f32 %v183_v7, %v204_v20  ;;  %v333_v7 = vld [vmem:[%s11202_s7 + $0x48] sm:$0xff] }
 0x19d   :  { %v200_v23 = vpop.xlane.xlu1 %199  ;;  %v8513_v10 = vpack.c.bf16 %v333_v7, %v330_v5  ;;  %v359_v5 = vld [vmem:[%s11202_s7 + $0x118] sm:$0xff] }
 0x19e   :  { %v205_v24 = vmul.f32 0.0078125, %v200_v23  ;;  %v212_v25 = vmul.f32 %v208_v22, %v208_v22  ;;  %v363_v7 = vld [vmem:[%s11202_s7 + $0x138] sm:$0xff]  ;;  %v8559_v8 = vpack.c.bf16 %v359_v5, %v356_v3 }
 0x19f   :  { %8514 = vmatpush1.bf16.msra.mxu1 %v8513_v10  ;;  %v8533_v9 = vpack.c.bf16 %v363_v7, %v360_v6  ;;  %v367_v10 = vld [vmem:[%s11202_s7 + $0x158] sm:$0xff] }
 0x1a0   :  { %218 = vadd.xlane.f32.xlu0 %v212_v25  ;;  %v209_v26 = vsub.f32 %v188_v11, %v205_v24  ;;  %v332_v11 = vld [vmem:[%s11202_s7 + $0x40] sm:$0xff]  ;;  %8516 = vmatprep.subr.bf16.mxu1 %v8515_v13 }
 0x1a2   :  { %v213_v27 = vmul.f32 %v209_v26, %v209_v26 }
 0x1a3   :  { %8518 = vmatpush1.bf16.msra.mxu1 %v8517_v17 }
 0x1a4   :  { %220 = vadd.xlane.f32.xlu1 %v213_v27 }
 0x225   :  { %v215_v28 = vpop.xlane.xlu0 %214 }
 0x226   :  { %v222_v29 = vmul.f32 0.0078125, %v215_v28 }
 0x228   :  { %v226_v30 = vadd.f32 1e-05, %v222_v29 }
 0x229   :  { %v217_v31 = vpop.xlane.xlu1 %216 }
 0x22a   :  { %8925 = vrsqrt.f32 %v226_v30  ;;  %v223_v32 = vmul.f32 0.0078125, %v217_v31 }
 0x22c   :  { %v227_v33 = vadd.f32 1e-05, %v223_v32 }
 0x22d   :  { %v219_v34 = vpop.xlane.xlu0 %218 }
 0x22e   :  { %8927 = vrsqrt.f32 %v227_v33  ;;  %v224_v35 = vmul.f32 0.0078125, %v219_v34  ;;  %v343_v34 = vld [vmem:[%s11202_s7 + $0x98] sm:$0xff] }
 0x230   :  { %v228_v36 = vadd.f32 1e-05, %v224_v35  ;;  %v346_v35 = vld [vmem:[%s11202_s7 + $0xb0] sm:$0xff] }
 0x231   :  { %v221_v37 = vpop.xlane.xlu1 %220 }
 0x232   :  { %8929 = vrsqrt.f32 %v228_v36  ;;  %v225_v38 = vmul.f32 0.0078125, %v221_v37  ;;  %v338_v36 = vld [vmem:[%s11202_s7 + $0x70] sm:$0xff]  ;;  %v8519_v37 = vpack.c.bf16 %v346_v35, %v343_v34 }
 0x234   :  { %v8926_v39 = vpop.eup %8925  ;;  %v229_v40 = vadd.f32 1e-05, %v225_v38  ;;  %v341_v38 = vld [vmem:[%s11202_s7 + $0x88] sm:$0xff]  ;;  %8520 = vmatprep.subr.bf16.mxu1 %v8519_v37 }
 0x235   :  { %v234_v42 = vmul.f32 %v8926_v39, %v206_v14  ;;  %v8543_v14 = vpack.c.bf16 %v335_v12, %v332_v11  ;;  %v342_v39 = vld [vmem:[%s11202_s7 + $0x90] sm:$0xff] }
 0x236   :  { %8931 = vrsqrt.f32 %v229_v40  ;;  %v345_v40 = vld [vmem:[%s11202_s7 + $0xa8] sm:$0xff]  ;;  %v370_v11 = vld [vmem:[%s11202_s7 + $0x170] sm:$0xff] }
 0x237   :  { %v244_v44 = vmul.f32 %v7348_v41, %v234_v42  ;;  %8544 = vmatprep.subr.bf16.mxu0 %v8543_v14  ;;  %v8521_v42 = vpack.c.bf16 %v345_v40, %v342_v39  ;;  %v362_v12 = vld [vmem:[%s11202_s7 + $0x130] sm:$0xff]  ;;  %v8535_v13 = vpack.c.bf16 %v370_v11, %v367_v10  ;;  %v7350_v40 = vld [vmem:[%s11203_s5] ss:$0 sm:$0xff] }
 0x238   :  { %v8928_v45 = vpop.eup %8927  ;;  %8546 = vmatpush3.bf16.msra.mxu0 %v8543_v14  ;;  %v365_v14 = vld [vmem:[%s11202_s7 + $0x148] sm:$0xff] }
 0x239   :  { %v9401_v46 = vadd.f32 %v7349_v43, %v244_v44  ;;  %v235_v47 = vmul.f32 %v8928_v45, %v207_v18  ;;  %8522 = vmatpush1.bf16.msra.mxu1 %v8521_v42  ;;  %v352_v44 = vld [vmem:[%s11202_s7 + $0xe0] sm:$0xff]  ;;  %v8563_v17 = vpack.c.bf16 %v365_v14, %v362_v12 }
 0x23a   :  { %v344_v45 = vld [vmem:[%s11202_s7 + $0xa0] sm:$0xff] }
 0x23b   :  { %264 = vadd.xlane.f32.xlu0 %v9401_v46  ;;  %v245_v48 = vmul.f32 %v7348_v41, %v235_v47  ;;  %v7351_v42 = vld [vmem:[%s11204_s6] ss:$0 sm:$0xff] }
 0x23c   :  { %v8930_v49 = vpop.eup %8929 }
 0x23d   :  { %v9404_v50 = vadd.f32 %v7349_v43, %v245_v48  ;;  %v236_v51 = vmul.f32 %v8930_v49, %v208_v22  ;;  %v347_v48 = vld [vmem:[%s11202_s7 + $0xb8] sm:$0xff]  ;;  %v348_v49 = vld [vmem:[%s11202_s7 + $0xc0] sm:$0xff] }
 0x23f   :  { %266 = vadd.xlane.f32.xlu1 %v9404_v50  ;;  %v246_v52 = vmul.f32 %v7348_v41, %v236_v51  ;;  %v351_v51 = vld [vmem:[%s11202_s7 + $0xd8] sm:$0xff] }
 0x240   :  { %v8932_v53 = vpop.eup %8931 }
 0x241   :  { %v9407_v54 = vadd.f32 %v7349_v43, %v246_v52  ;;  %v237_v55 = vmul.f32 %v8932_v53, %v209_v26  ;;  %v8551_v52 = vpack.c.bf16 %v347_v48, %v344_v45  ;;  %v8525_v53 = vpack.c.bf16 %v351_v51, %v348_v49 }
 0x243   :  { %268 = vadd.xlane.f32.xlu0 %v9407_v54  ;;  %v247_v56 = vmul.f32 %v7348_v41, %v237_v55  ;;  %v8547_v41 = vpack.c.bf16 %v341_v38, %v338_v36  ;;  %v355_v55 = vld [vmem:[%s11202_s7 + $0xf8] sm:$0xff] }
 0x245   :  { %v9410_v57 = vadd.f32 %v7349_v43, %v247_v56  ;;  %8548 = vmatprep.subr.bf16.mxu0 %v8547_v41  ;;  %v349_v43 = vld [vmem:[%s11202_s7 + $0xc8] sm:$0xff]  ;;  %v358_v56 = vld [vmem:[%s11202_s7 + $0x110] sm:$0xff] }
 0x246   :  { %8550 = vmatpush3.bf16.msra.mxu0 %v8547_v41  ;;  %v8523_v47 = vpack.c.bf16 %v352_v44, %v349_v43  ;;  %v8527_v59 = vpack.c.bf16 %v358_v56, %v355_v55 }
 0x247   :  { %270 = vadd.xlane.f32.xlu1 %v9410_v57  ;;  %8552 = vmatprep.subr.bf16.mxu0 %v8551_v52 }
 0x248   :  { %8524 = vmatprep.subr.bf16.mxu1 %v8523_v47 }
 0x249   :  { %8526 = vmatpush1.bf16.msra.mxu1 %v8525_v53 }
 0x24a   :  { %8554 = vmatpush3.bf16.msra.mxu0 %v8551_v52  ;;  %8528 = vmatprep.subr.bf16.mxu1 %v8527_v59 }
 0x24b   :  { %8556 = vmatprep.subr.bf16.mxu0 %v8555_v63 }
 0x24d   :  { %8530 = vmatpush1.bf16.msra.mxu1 %v8529_v0 }
 0x24e   :  { %8558 = vmatpush3.bf16.msra.mxu0 %v8555_v63  ;;  %8532 = vmatprep.subr.bf16.mxu1 %v8531_v4 }
 0x24f   :  { %8560 = vmatprep.subr.bf16.mxu0 %v8559_v8 }
 0x251   :  { %8534 = vmatpush1.bf16.msra.mxu1 %v8533_v9 }
 0x252   :  { %8562 = vmatpush3.bf16.msra.mxu0 %v8559_v8  ;;  %8536 = vmatprep.subr.bf16.mxu1 %v8535_v13 }
 0x253   :  { %8564 = vmatprep.subr.bf16.mxu0 %v8563_v17 }
 0x256   :  { %8566 = vmatpush3.bf16.msra.mxu0 %v8563_v17 }
 0x2c8   :  { %v265_v18 = vpop.xlane.xlu0 %264 }
 0x2c9   :  { %v272_v19 = vmul.f32 0.0078125, %v265_v18  ;;  %v8537_v18 = vpack.c.bf16 %v369_v16, %v366_v15 }
 0x2cb   :  { %v9462_v20 = vsub.f32 %v9401_v46, %v272_v19  ;;  %v9157_v19 = vmov 0.0   ;;  %8538 = vmatpush1.bf16.msra.mxu1 %v8537_v18 }
 0x2cc   :  { %v267_v21 = vpop.xlane.xlu1 %266  ;;  %453 = vmatprep.mubr.f32.mxu1 %v9157_v19  ;;  %8003 = vmatprep.subr.mxu1 %v9157_v19 }
 0x2cd   :  { %v273_v22 = vmul.f32 0.0078125, %v267_v21  ;;  %v280_v23 = vmul.f32 %v9462_v20, %v9462_v20  ;;  %v368_v21 = vld [vmem:[%s11202_s7 + $0x160] sm:$0xff] }
 0x2cf   :  { %284 = vadd.xlane.f32.xlu0 %v280_v23  ;;  %v9467_v24 = vsub.f32 %v9404_v50, %v273_v22  ;;  %v371_v22 = vld [vmem:[%s11202_s7 + $0x178] sm:$0xff] }
 0x2d0   :  { %v269_v25 = vpop.xlane.xlu0 %268  ;;  %v8567_v23 = vpack.c.bf16 %v371_v22, %v368_v21 }
 0x2d1   :  { %v274_v26 = vmul.f32 0.0078125, %v269_v25  ;;  %v281_v27 = vmul.f32 %v9467_v24, %v9467_v24 }
 0x2d2   :  { %8568 = vmatprep.subr.bf16.mxu0 %v8567_v23 }
 0x2d3   :  { %286 = vadd.xlane.f32.xlu1 %v281_v27  ;;  %v9472_v28 = vsub.f32 %v9407_v54, %v274_v26  ;;  %8570 = vmatpush3.bf16.msra.mxu0 %v8567_v23 }
 0x2d4   :  { %v271_v29 = vpop.xlane.xlu1 %270  ;;  %8043 = vmatprep.subr.mxu0 %v9157_v19 }
 0x2d5   :  { %v275_v30 = vmul.f32 0.0078125, %v271_v29  ;;  %v282_v31 = vmul.f32 %v9472_v28, %v9472_v28 }
 0x2d7   :  { %288 = vadd.xlane.f32.xlu0 %v282_v31  ;;  %v9477_v32 = vsub.f32 %v9410_v57, %v275_v30 }
 0x2d9   :  { %v283_v33 = vmul.f32 %v9477_v32, %v9477_v32 }
 0x2db   :  { %290 = vadd.xlane.f32.xlu1 %v283_v33 }
 0x35c   :  { %v285_v25 = vpop.xlane.xlu0 %284 }
 0x35d   :  { %v292_v26 = vmul.f32 0.0078125, %v285_v25 }
 0x35f   :  { %v296_v27 = vadd.f32 1e-05, %v292_v26 }
 0x360   :  { %v287_v29 = vpop.xlane.xlu1 %286 }
 0x361   :  { %8933 = vrsqrt.f32 %v296_v27  ;;  %v293_v30 = vmul.f32 0.0078125, %v287_v29 }
 0x363   :  { %v297_v31 = vadd.f32 1e-05, %v293_v30 }
 0x364   :  { %v289_v33 = vpop.xlane.xlu0 %288 }
 0x365   :  { %8935 = vrsqrt.f32 %v297_v31  ;;  %v294_v34 = vmul.f32 0.0078125, %v289_v33  ;;  %v9159_v31 = vmov -1e+09  }
 0x367   :  { %v298_v35 = vadd.f32 1e-05, %v294_v34 }
 0x368   :  { %v291_v36 = vpop.xlane.xlu1 %290 }
 0x369   :  { %8937 = vrsqrt.f32 %v298_v35  ;;  %v295_v37 = vmul.f32 0.0078125, %v291_v36 }
 0x36b   :  { %v8934_v38 = vpop.eup %8933  ;;  %v299_v39 = vadd.f32 1e-05, %v295_v37 }
 0x36c   :  { %v304_v41 = vmul.f32 %v8934_v38, %v9462_v20 }
 0x36d   :  { %8939 = vrsqrt.f32 %v299_v39 }
 0x36e   :  { %v312_v43 = vmul.f32 %v7350_v40, %v304_v41 }
 0x36f   :  { %v8936_v44 = vpop.eup %8935 }
 0x370   :  { %v320_v45 = vadd.f32 %v7351_v42, %v312_v43  ;;  %v305_v47 = vmul.f32 %v8936_v44, %v9467_v24 }
 0x372   :  { %454 = vmatmul.mubr.f32.vlgmr.msra.gmra.mrb[0].mxu1 %v320_v45  ;;  %7997 = vmatprep.mubr.f32.mxu0 %v320_v45  ;;  %v313_v48 = vmul.f32 %v7350_v40, %v305_v47 }
 0x373   :  { %v8938_v49 = vpop.eup %8937  ;;  %459 = vmatprep.mubr.f32.mxu1 %v9157_v19 }
 0x374   :  { %v321_v51 = vadd.f32 %v7351_v42, %v313_v48  ;;  %v306_v52 = vmul.f32 %v8938_v49, %v9472_v28  ;;  %v258_v28 = vlaneseq }
 0x376   :  { %460 = vmatmul.mubr.f32.gmra.mrb[2].mxu1 %v321_v51  ;;  %7998 = vmatmul.mubr.f32.vlgmr.msra.gmra.mrb[8].mxu0 %v321_v51  ;;  %v314_v20 = vmul.f32 %v7350_v40, %v306_v52  ;;  %v9597_v59 = vshrl.u32 %v258_v28, 7  ;;  %v259_v30 = vand.u32 127, %v258_v28 }
 0x377   :  { %v8940_v53 = vpop.eup %8939  ;;  %465 = vmatprep.mubr.f32.mxu1 %v9157_v19 }
 0x378   :  { %v322_v55 = vadd.f32 %v7351_v42, %v314_v20  ;;  %v307_v56 = vmul.f32 %v8940_v53, %v9477_v32  ;;  %v9600_v32 = vsub.s32 1, %v9597_v59  ;;  %v9606_v61 = vsub.s32 0, %v9597_v59 }
 0x379   :  { %v384_v62 = vsub.s32 2, %v9597_v59  ;;  %vm260_vm2 = vcmp.lt.s32.totalorder %v259_v30, 5 }
 0x37a   :  { %466 = vmatmul.mubr.f32.gmra.mrb[4].mxu1 %v322_v55  ;;  %8000 = vmatprep.mubr.f32.mxu0 %v322_v55  ;;  %v315_v24 = vmul.f32 %v7350_v40, %v307_v56  ;;  %v381_v63 = vrot.slane %v372_v60, %v9600_v32  ;;  %v377_v1 = vrot.slane %v372_v60, %v9606_v61  ;;  %v9667_v33 = vsel %vm260_vm2, 0.0, %v9159_v31 }
 0x37b   :  { %471 = vmatprep.mubr.f32.mxu1 %v9157_v19  ;;  %v385_v3 = vrot.slane %v372_v60, %v384_v62 }
 0x37c   :  { %v323_v58 = vadd.f32 %v7351_v42, %v315_v24 }
 0x37e   :  { %472 = vmatmul.mubr.f32.gmra.mrb[6].mxu1 %v323_v58  ;;  %8001 = vmatmul.mubr.f32.gmra.mrb[10].mxu0 %v323_v58 }
 0x37f   :  { %8005 = vmatprep.mubr.msk.f32.mxu1 %vm9158_vm0, %v9157_v19  ;;  %8045 = vmatprep.mubr.msk.f32.mxu0 %vm9158_vm0, %v9157_v19 }
 0x445   :  { %v455_v0 = vpop.f32.mrb[0].mxu1 }
 0x446   :  { %v457_v2 = vpop.f32.mrb[1].mxu1  ;;  %v9617_v7 = vadd.f32 %v455_v0, %v377_v1 }
 0x447   :  { %v9613_v4 = vadd.f32 %v457_v2, %v381_v63 }
 0x449   :  { %v461_v5 = vpop.f32.mrb[2].mxu1  ;;  %v7999_v6 = vpop.f32.mrb[8].mxu0  ;;  %8004 = vmatpush3.xpose.msk.msra.mxu1 %vm563_vm1, %v9613_v4 }
 0x44a   :  { %v9619_v8 = vadd.f32 %v7999_v6, %v385_v3  ;;  %v463_v9 = vpop.f32.mrb[3].mxu1  ;;  %v544_v10 = vpop.f32.mrb[9].mxu0  ;;  %8008 = vmatprep.subr.mxu1 %v9157_v19  ;;  %v9630_v13 = vadd.f32 %v461_v5, %v377_v1 }
 0x44b   :  { %v9622_v11 = vadd.f32 %v463_v9, %v381_v63  ;;  %v9659_v29 = vadd.f32 %v544_v10, %v385_v3 }
 0x44c   :  { %8006 = vmatmul.mubr.msk.f32.vlgmr.msra.gmra.mrb[8].mxu1 %vm563_vm1, %v9617_v7 }
 0x44d   :  { %v467_v12 = vpop.f32.mrb[4].mxu1  ;;  %8009 = vmatpush3.xpose.msk.msra.mxu1 %vm563_vm1, %v9622_v11  ;;  %8010 = vmatprep.mubr.msk.f32.mxu1 %vm9158_vm0, %v9157_v19 }
 0x44e   :  { %v469_v14 = vpop.f32.mrb[5].mxu1  ;;  %8013 = vmatprep.subr.mxu1 %v9157_v19  ;;  %v9641_v18 = vadd.f32 %v467_v12, %v377_v1 }
 0x44f   :  { %v9633_v15 = vadd.f32 %v469_v14, %v381_v63 }
 0x450   :  { %8011 = vmatmul.mubr.msk.f32.vlgmr.msra.gmra.mrb[10].mxu1 %vm563_vm1, %v9630_v13 }
 0x451   :  { %v473_v16 = vpop.f32.mrb[6].mxu1  ;;  %v8002_v17 = vpop.f32.mrb[10].mxu0  ;;  %8014 = vmatpush3.xpose.msk.msra.mxu1 %vm563_vm1, %v9633_v15  ;;  %8015 = vmatprep.mubr.msk.f32.mxu1 %vm9158_vm0, %v9157_v19 }
 0x452   :  { %v9643_v21 = vadd.f32 %v8002_v17, %v385_v3  ;;  %v475_v22 = vpop.f32.mrb[7].mxu1  ;;  %v554_v23 = vpop.f32.mrb[11].mxu0  ;;  %8018 = vmatprep.subr.mxu1 %v9157_v19  ;;  %v9656_v27 = vadd.f32 %v473_v16, %v377_v1 }
 0x453   :  { %v9646_v25 = vadd.f32 %v475_v22, %v381_v63  ;;  %v9648_v26 = vadd.f32 %v554_v23, %v385_v3 }
 0x454   :  { %8016 = vmatmul.mubr.msk.f32.vlgmr.msra.gmra.mrb[12].mxu1 %vm563_vm1, %v9641_v18 }
 0x455   :  { %8019 = vmatpush3.xpose.msk.msra.mxu1 %vm563_vm1, %v9646_v25  ;;  %8020 = vmatprep.mubr.msk.f32.mxu1 %vm9158_vm0, %v9157_v19 }
 0x456   :  { %8023 = vmatprep.subr.mxu1 %v9157_v19 }
 0x458   :  { %8021 = vmatmul.mubr.msk.f32.vlgmr.msra.gmra.mrb[14].mxu1 %vm563_vm1, %v9656_v27 }
 0x459   :  { %8024 = vmatpush3.msra.mxu1 %v9659_v29  ;;  %8025 = vmatprep.mubr.msk.f32.mxu1 %vm9158_vm0, %v9157_v19 }
 0x45a   :  { %8028 = vmatprep.subr.mxu1 %v9157_v19 }
 0x51f   :  { %v636_v34 = vpop.f32.mrb[8].mxu1 }
 0x520   :  { %v637_v35 = vadd.f32 %v636_v34, %v9667_v33  ;;  %v8007_v36 = vpop.f32.mrb[9].mxu1 }
 0x522   :  { %v869_v37 = vsel %vm868_vm3, %v637_v35, -inf }
 0x523   :  { %870 = vmax.xlane.f32.xlu0 %v869_v37  ;;  %v712_v38 = vpop.f32.mrb[10].mxu1 }
 0x524   :  { %v713_v39 = vadd.f32 %v712_v38, %v9667_v33  ;;  %v8012_v40 = vpop.f32.mrb[11].mxu1 }
 0x526   :  { %v872_v41 = vsel %vm868_vm3, %v713_v39, -inf }
 0x527   :  { %873 = vmax.xlane.f32.xlu1 %v872_v41  ;;  %v788_v42 = vpop.f32.mrb[12].mxu1 }
 0x528   :  { %v789_v43 = vadd.f32 %v788_v42, %v9667_v33  ;;  %v8017_v44 = vpop.f32.mrb[13].mxu1 }
 0x52a   :  { %v875_v45 = vsel %vm868_vm3, %v789_v43, -inf }
 0x52b   :  { %876 = vmax.xlane.f32.xlu0 %v875_v45  ;;  %v864_v47 = vpop.f32.mrb[14].mxu1 }
 0x52c   :  { %v865_v48 = vadd.f32 %v864_v47, %v9667_v33  ;;  %v8022_v49 = vpop.f32.mrb[15].mxu1 }
 0x52e   :  { %v878_v51 = vsel %vm868_vm3, %v865_v48, -inf }
 0x52f   :  { %879 = vmax.xlane.f32.xlu1 %v878_v51 }
 0x5b0   :  { %v871_v52 = vpop.xlane.xlu0 %870 }
 0x5b1   :  { %v881_v20 = vsub.f32 %v637_v35, %v871_v52 }
 0x5b3   :  { %v885_v53 = vmul.f32 1.442695, %v881_v20 }
 0x5b4   :  { %v874_v55 = vpop.xlane.xlu1 %873 }
 0x5b5   :  { %8941 = vpow2.f32 %v885_v53  ;;  %v882_v56 = vsub.f32 %v713_v39, %v874_v55 }
 0x5b7   :  { %v887_v24 = vmul.f32 1.442695, %v882_v56 }
 0x5b8   :  { %v877_v58 = vpop.xlane.xlu0 %876 }
 0x5b9   :  { %8943 = vpow2.f32 %v887_v24  ;;  %v883_v28 = vsub.f32 %v789_v43, %v877_v58 }
 0x5bb   :  { %v889_v60 = vmul.f32 1.442695, %v883_v28 }
 0x5bc   :  { %v880_v6 = vpop.xlane.xlu1 %879 }
 0x5bd   :  { %8945 = vpow2.f32 %v889_v60  ;;  %v884_v9 = vsub.f32 %v865_v48, %v880_v6 }
 0x5bf   :  { %v8942_v63 = vpop.eup %8941  ;;  %v891_v10 = vmul.f32 1.442695, %v884_v9 }
 0x5c0   :  { %v893_v0 = vsel %vm868_vm3, %v8942_v63, 0.0 }
 0x5c1   :  { %894 = vadd.xlane.f32.xlu0 %v893_v0  ;;  %8947 = vpow2.f32 %v891_v10 }
 0x5c3   :  { %v8944_v1 = vpop.eup %8943 }
 0x5c4   :  { %v896_v2 = vsel %vm868_vm3, %v8944_v1, 0.0 }
 0x5c5   :  { %897 = vadd.xlane.f32.xlu1 %v896_v2 }
 0x5c7   :  { %v8946_v3 = vpop.eup %8945 }
 0x5c8   :  { %v899_v5 = vsel %vm868_vm3, %v8946_v3, 0.0 }
 0x5c9   :  { %900 = vadd.xlane.f32.xlu0 %v899_v5 }
 0x5cb   :  { %v8948_v12 = vpop.eup %8947 }
 0x5cc   :  { %v902_v14 = vsel %vm868_vm3, %v8948_v12, 0.0 }
 0x5d6   :  { %1285 = vrot.lane.b32.xlu1 %v9622_v11, %s9160_s0 }
 0x5da   :  { %1205 = vrot.lane.b32.xlu1 %v9617_v7, %s9160_s0 }
 0x5de   :  { %1283 = vrot.lane.b32.xlu1 %v9630_v13, %s9160_s0 }
 0x5df   :  { %1207 = vrot.lane.b32.xlu0 %v9613_v4, %s9160_s0 }
 0x5e3   :  { %1363 = vrot.lane.b32.xlu0 %v9633_v15, %s9160_s0 }
 0x5e7   :  { %1361 = vrot.lane.b32.xlu0 %v9641_v18, %s9160_s0 }
 0x602   :  { %903 = vadd.xlane.f32.xlu1 %v902_v14 }
 0x613   :  { %1441 = vrot.lane.b32.xlu1 %v9646_v25, %s9160_s0 }
 0x617   :  { %1439 = vrot.lane.b32.xlu1 %v9656_v27, %s9160_s0 }
 0x64e   :  { %v895_v16 = vpop.xlane.xlu0 %894 }
 0x64f   :  { %8949 = vrcp.f32 %v895_v16 }
 0x652   :  { %v898_v17 = vpop.xlane.xlu1 %897 }
 0x653   :  { %8951 = vrcp.f32 %v898_v17 }
 0x656   :  { %v901_v22 = vpop.xlane.xlu0 %900  ;;  %v1286_v23 = vpop.permute.xlu1 %1285 }
 0x657   :  { %8953 = vrcp.f32 %v901_v22 }
 0x659   :  { %v8950_v30 = vpop.eup %8949 }
 0x65a   :  { %v1208_v31 = vpop.permute.xlu0 %1207  ;;  %v909_v34 = vmul.f32 %v8950_v30, %v8942_v63  ;;  %v1206_v36 = vpop.permute.xlu1 %1205 }
 0x65b   :  { %8044 = vmatpush3.xpose.msk.msra.mxu0 %vm563_vm1, %v1208_v31 }
 0x65c   :  { %8026 = vmatmul.mubr.msk.f32.vlgmr.msra.gmra.mrb[16].mxu1 %vm868_vm3, %v909_v34  ;;  %8053 = vmatprep.subr.mxu0 %v9157_v19 }
 0x65d   :  { %v8952_v35 = vpop.eup %8951  ;;  %8029 = vmatpush3.msra.mxu1 %v9619_v8  ;;  %8030 = vmatprep.mubr.msk.f32.mxu1 %vm9158_vm0, %v9157_v19 }
 0x65e   :  { %v1364_v37 = vpop.permute.xlu0 %1363  ;;  %8046 = vmatmul.mubr.msk.f32.vlgmr.msra.gmra.mrb[12].mxu0 %vm563_vm1, %v1206_v36  ;;  %8033 = vmatprep.subr.mxu1 %v9157_v19  ;;  %v910_v38 = vmul.f32 %v8952_v35, %v8944_v1  ;;  %v1284_v42 = vpop.permute.xlu1 %1283 }
 0x65f   :  { %8054 = vmatpush3.xpose.msk.msra.mxu0 %vm563_vm1, %v1364_v37  ;;  %8055 = vmatprep.mubr.msk.f32.mxu0 %vm9158_vm0, %v9157_v19 }
 0x660   :  { %8031 = vmatmul.mubr.msk.f32.vlgmr.msra.gmra.mrb[18].mxu1 %vm868_vm3, %v910_v38  ;;  %8063 = vmatprep.subr.mxu0 %v9157_v19 }
 0x661   :  { %v8954_v39 = vpop.eup %8953  ;;  %8034 = vmatpush3.msra.mxu1 %v9648_v26  ;;  %8035 = vmatprep.mubr.msk.f32.mxu1 %vm9158_vm0, %v9157_v19 }
 0x662   :  { %v1362_v40 = vpop.permute.xlu0 %1361  ;;  %8038 = vmatprep.subr.mxu1 %v9157_v19  ;;  %v911_v41 = vmul.f32 %v8954_v39, %v8946_v3 }
 0x663   :  { %8056 = vmatmul.mubr.msk.f32.vlgmr.msra.gmra.mrb[14].mxu0 %vm563_vm1, %v1362_v40 }
 0x664   :  { %8036 = vmatmul.mubr.msk.f32.vlgmr.msra.gmra.mrb[20].mxu1 %vm868_vm3, %v911_v41  ;;  %8065 = vmatprep.mubr.msk.f32.mxu0 %vm9158_vm0, %v9157_v19 }
 0x665   :  { %8039 = vmatpush3.msra.mxu1 %v9643_v21  ;;  %8040 = vmatprep.mubr.msk.f32.mxu1 %vm9158_vm0, %v9157_v19 }
 0x666   :  { %8048 = vmatprep.subr.mxu1 %v9157_v19 }
 0x68f   :  { %v904_v43 = vpop.xlane.xlu1 %903 }
 0x690   :  { %8955 = vrcp.f32 %v904_v43 }
 0x693   :  { %v1442_v47 = vpop.permute.xlu1 %1441 }
 0x697   :  { %v1440_v48 = vpop.permute.xlu1 %1439 }
 0x69a   :  { %v8956_v44 = vpop.eup %8955 }
 0x69b   :  { %v912_v45 = vmul.f32 %v8956_v44, %v8948_v12 }
 0x69d   :  { %8041 = vmatmul.mubr.msk.f32.vlgmr.msra.gmra.mrb[22].mxu1 %vm868_vm3, %v912_v45 }
 0x69e   :  { %8049 = vmatpush3.xpose.msk.msra.mxu1 %vm563_vm1, %v1286_v23  ;;  %8050 = vmatprep.mubr.msk.f32.mxu1 %vm9158_vm0, %v9157_v19 }
 0x69f   :  { %8058 = vmatprep.subr.mxu1 %v9157_v19 }
 0x6a1   :  { %8051 = vmatmul.mubr.msk.f32.vlgmr.msra.gmra.mrb[24].mxu1 %vm563_vm1, %v1284_v42 }
 0x6a2   :  { %8059 = vmatpush3.xpose.msk.msra.mxu1 %vm563_vm1, %v1442_v47  ;;  %8060 = vmatprep.mubr.msk.f32.mxu1 %vm9158_vm0, %v9157_v19 }
 0x6a3   :  { %8068 = vmatprep.subr.mxu1 %v9157_v19 }
 0x6a5   :  { %8061 = vmatmul.mubr.msk.f32.vlgmr.msra.gmra.mrb[26].mxu1 %vm563_vm1, %v1440_v48 }
 0x6a6   :  { %8070 = vmatprep.mubr.msk.f32.mxu1 %vm9158_vm0, %v9157_v19 }
 0x72f   :  { %v9735_v49 = vpop.f32.mrb[16].mxu1 }
 0x730   :  { %v8027_v51 = vpop.f32.mrb[17].mxu1 }
 0x731   :  { %v1279_v52 = vpop.f32.mrb[12].mxu0 }
 0x732   :  { %v1280_v20 = vadd.f32 %v1279_v52, %v9667_v33  ;;  %v8047_v53 = vpop.f32.mrb[13].mxu0 }
 0x733   :  { %v9738_v55 = vpop.f32.mrb[18].mxu1 }
 0x734   :  { %v8032_v56 = vpop.f32.mrb[19].mxu1  ;;  %v1517_v24 = vsel %vm868_vm3, %v1280_v20, -inf }
 0x735   :  { %1518 = vmax.xlane.f32.xlu0 %v1517_v24 }
 0x736   :  { %v1435_v58 = vpop.f32.mrb[14].mxu0 }
 0x737   :  { %v1436_v28 = vadd.f32 %v1435_v58, %v9667_v33  ;;  %v9742_v60 = vpop.f32.mrb[20].mxu1  ;;  %v8057_v63 = vpop.f32.mrb[15].mxu0 }
 0x738   :  { %v8037_v0 = vpop.f32.mrb[21].mxu1 }
 0x739   :  { %v1523_v1 = vsel %vm868_vm3, %v1436_v28, -inf }
 0x73a   :  { %1524 = vmax.xlane.f32.xlu0 %v1523_v1 }
 0x770   :  { %v9745_v2 = vpop.f32.mrb[22].mxu1 }
 0x771   :  { %v8042_v3 = vpop.f32.mrb[23].mxu1 }
 0x774   :  { %v1357_v5 = vpop.f32.mrb[24].mxu1 }
 0x775   :  { %v1358_v6 = vadd.f32 %v1357_v5, %v9667_v33  ;;  %v8052_v9 = vpop.f32.mrb[25].mxu1 }
 0x777   :  { %v1520_v10 = vsel %vm868_vm3, %v1358_v6, -inf }
 0x778   :  { %1521 = vmax.xlane.f32.xlu1 %v1520_v10  ;;  %v1513_v12 = vpop.f32.mrb[26].mxu1 }
 0x779   :  { %v1514_v14 = vadd.f32 %v1513_v12, %v9667_v33  ;;  %v8062_v16 = vpop.f32.mrb[27].mxu1 }
 0x77b   :  { %v1526_v17 = vsel %vm868_vm3, %v1514_v14, -inf }
 0x77c   :  { %1527 = vmax.xlane.f32.xlu0 %v1526_v17 }
 0x789   :  { %1639 = vrot.lane.b32.xlu1 %v9619_v8, %s9160_s0 }
 0x78d   :  { %1716 = vrot.lane.b32.xlu1 %v9648_v26, %s9160_s0 }
 0x791   :  { %1793 = vrot.lane.b32.xlu1 %v9643_v21, %s9160_s0 }
 0x795   :  { %1949 = vrot.lane.b32.xlu1 %v9622_v11, %s9161_s26 }
 0x799   :  { %1947 = vrot.lane.b32.xlu1 %v9630_v13, %s9161_s26 }
 0x7c2   :  { %v1519_v22 = vpop.xlane.xlu0 %1518 }
 0x7c3   :  { %v1529_v23 = vsub.f32 %v1280_v20, %v1519_v22 }
 0x7c5   :  { %v1533_v30 = vmul.f32 1.442695, %v1529_v23 }
 0x7c7   :  { %8957 = vpow2.f32 %v1533_v30  ;;  %v1525_v31 = vpop.xlane.xlu0 %1524 }
 0x7c8   :  { %v1531_v34 = vsub.f32 %v1436_v28, %v1525_v31 }
 0x7ca   :  { %v1537_v35 = vmul.f32 1.442695, %v1531_v34 }
 0x7cc   :  { %8959 = vpow2.f32 %v1537_v35 }
 0x7d1   :  { %v8958_v36 = vpop.eup %8957 }
 0x7d2   :  { %v1541_v37 = vsel %vm868_vm3, %v8958_v36, 0.0 }
 0x7d3   :  { %1542 = vadd.xlane.f32.xlu0 %v1541_v37 }
 0x7d6   :  { %v8960_v38 = vpop.eup %8959 }
 0x7d7   :  { %v1547_v39 = vsel %vm868_vm3, %v8960_v38, 0.0 }
 0x7d8   :  { %1548 = vadd.xlane.f32.xlu0 %v1547_v39 }
 0x7ee   :  { %1562 = vrot.lane.b32.xlu0 %v9659_v29, %s9160_s0 }
 0x7f2   :  { %1871 = vrot.lane.b32.xlu0 %v9613_v4, %s9161_s26 }
 0x7f6   :  { %1869 = vrot.lane.b32.xlu0 %v9617_v7, %s9161_s26 }
 0x7fa   :  { %2027 = vrot.lane.b32.xlu0 %v9633_v15, %s9161_s26 }
 0x7fe   :  { %2025 = vrot.lane.b32.xlu0 %v9641_v18, %s9161_s26 }
 0x805   :  { %v1522_v40 = vpop.xlane.xlu1 %1521 }
 0x806   :  { %v1530_v41 = vsub.f32 %v1358_v6, %v1522_v40 }
 0x808   :  { %v1535_v42 = vmul.f32 1.442695, %v1530_v41 }
 0x809   :  { %v1640_v43 = vpop.permute.xlu1 %1639  ;;  %v1528_v44 = vpop.xlane.xlu0 %1527 }
 0x80a   :  { %8961 = vpow2.f32 %v1535_v42  ;;  %v1532_v45 = vsub.f32 %v1514_v14, %v1528_v44  ;;  %8069 = vmatpush3.msra.mxu1 %v1640_v43 }
 0x80b   :  { %8078 = vmatprep.subr.mxu1 %v9157_v19 }
 0x80c   :  { %v1539_v47 = vmul.f32 1.442695, %v1532_v45 }
 0x80d   :  { %v1717_v0 = vpop.permute.xlu1 %1716 }
 0x80e   :  { %8963 = vpow2.f32 %v1539_v47 }
 0x811   :  { %v1794_v10 = vpop.permute.xlu1 %1793 }
 0x814   :  { %v8962_v48 = vpop.eup %8961 }
 0x815   :  { %v1544_v51 = vsel %vm868_vm3, %v8962_v48, 0.0  ;;  %v1950_v12 = vpop.permute.xlu1 %1949 }
 0x816   :  { %1545 = vadd.xlane.f32.xlu1 %v1544_v51 }
 0x818   :  { %v8964_v52 = vpop.eup %8963 }
 0x819   :  { %v1550_v20 = vsel %vm868_vm3, %v8964_v52, 0.0  ;;  %v1948_v14 = vpop.permute.xlu1 %1947 }
 0x81a   :  { %1551 = vadd.xlane.f32.xlu1 %v1550_v20 }
 0x82b   :  { %2105 = vrot.lane.b32.xlu1 %v9646_v25, %s9161_s26 }
 0x82f   :  { %2103 = vrot.lane.b32.xlu1 %v9656_v27, %s9161_s26 }
 0x860   :  { %v1543_v53 = vpop.xlane.xlu0 %1542 }
 0x861   :  { %8965 = vrcp.f32 %v1543_v53 }
 0x865   :  { %v1549_v56 = vpop.xlane.xlu0 %1548 }
 0x866   :  { %8967 = vrcp.f32 %v1549_v56 }
 0x869   :  { %v1563_v24 = vpop.permute.xlu0 %1562 }
 0x86a   :  { %8064 = vmatpush3.msra.mxu0 %v1563_v24 }
 0x86b   :  { %v8966_v58 = vpop.eup %8965  ;;  %8073 = vmatprep.subr.mxu0 %v9157_v19 }
 0x86c   :  { %v1557_v28 = vmul.f32 %v8966_v58, %v8958_v36 }
 0x86d   :  { %v1872_v63 = vpop.permute.xlu0 %1871 }
 0x86e   :  { %8066 = vmatmul.mubr.msk.f32.vlgmr.msra.gmra.mrb[16].mxu0 %vm868_vm3, %v1557_v28 }
 0x86f   :  { %8074 = vmatpush3.msra.mxu0 %v1717_v0  ;;  %8075 = vmatprep.mubr.msk.f32.mxu0 %vm9158_vm0, %v9157_v19 }
 0x870   :  { %v8968_v1 = vpop.eup %8967  ;;  %8083 = vmatprep.subr.mxu0 %v9157_v19 }
 0x871   :  { %v1870_v3 = vpop.permute.xlu0 %1869  ;;  %v1559_v5 = vmul.f32 %v8968_v1, %v8960_v38 }
 0x873   :  { %8076 = vmatmul.mubr.msk.f32.vlgmr.msra.gmra.mrb[18].mxu0 %vm868_vm3, %v1559_v5 }
 0x874   :  { %8085 = vmatprep.mubr.msk.f32.mxu0 %vm9158_vm0, %v9157_v19 }
 0x875   :  { %v2028_v6 = vpop.permute.xlu0 %2027 }
 0x876   :  { %8084 = vmatpush3.xpose.msk.msra.mxu0 %vm563_vm1, %v1872_v63 }
 0x877   :  { %8093 = vmatprep.subr.mxu0 %v9157_v19 }
 0x879   :  { %8086 = vmatmul.mubr.msk.f32.vlgmr.msra.gmra.mrb[20].mxu0 %vm563_vm1, %v1870_v3  ;;  %v2026_v9 = vpop.permute.xlu0 %2025 }
 0x87a   :  { %8094 = vmatpush3.xpose.msk.msra.mxu0 %vm563_vm1, %v2028_v6  ;;  %8095 = vmatprep.mubr.msk.f32.mxu0 %vm9158_vm0, %v9157_v19 }
 0x87b   :  { %8103 = vmatprep.subr.mxu0 %v9157_v19 }
 0x87d   :  { %8096 = vmatmul.mubr.msk.f32.vlgmr.msra.gmra.mrb[22].mxu0 %vm563_vm1, %v2026_v9 }
 0x87e   :  { %8105 = vmatprep.mubr.msk.f32.mxu0 %vm9158_vm0, %v9157_v19 }
 0x8a3   :  { %v1546_v16 = vpop.xlane.xlu1 %1545 }
 0x8a4   :  { %8969 = vrcp.f32 %v1546_v16 }
 0x8a7   :  { %v1552_v17 = vpop.xlane.xlu1 %1551 }
 0x8a8   :  { %8971 = vrcp.f32 %v1552_v17 }
 0x8ab   :  { %v2106_v34 = vpop.permute.xlu1 %2105 }
 0x8ae   :  { %v8970_v22 = vpop.eup %8969 }
 0x8af   :  { %v1558_v23 = vmul.f32 %v8970_v22, %v8962_v48  ;;  %v2104_v35 = vpop.permute.xlu1 %2103 }
 0x8b1   :  { %8071 = vmatmul.mubr.msk.f32.vlgmr.msra.gmra.mrb[28].mxu1 %vm868_vm3, %v1558_v23 }
 0x8b2   :  { %v8972_v30 = vpop.eup %8971  ;;  %8079 = vmatpush3.msra.mxu1 %v1794_v10  ;;  %8080 = vmatprep.mubr.msk.f32.mxu1 %vm9158_vm0, %v9157_v19 }
 0x8b3   :  { %v1560_v31 = vmul.f32 %v8972_v30, %v8964_v52  ;;  %8088 = vmatprep.subr.mxu1 %v9157_v19 }
 0x8b5   :  { %8081 = vmatmul.mubr.msk.f32.vlgmr.msra.gmra.mrb[30].mxu1 %vm868_vm3, %v1560_v31 }
 0x8b6   :  { %8090 = vmatprep.mubr.msk.f32.mxu1 %vm9158_vm0, %v9157_v19 }
 0x8b9   :  { %8089 = vmatpush3.xpose.msk.msra.mxu1 %vm563_vm1, %v1950_v12 }
 0x8ba   :  { %8098 = vmatprep.subr.mxu1 %v9157_v19 }
 0x8bc   :  { %8091 = vmatmul.mubr.msk.f32.vlgmr.msra.gmra.mrb[32].mxu1 %vm563_vm1, %v1948_v14 }
 0x8bd   :  { %8099 = vmatpush3.xpose.msk.msra.mxu1 %vm563_vm1, %v2106_v34  ;;  %8100 = vmatprep.mubr.msk.f32.mxu1 %vm9158_vm0, %v9157_v19 }
 0x8be   :  { %8108 = vmatprep.subr.mxu1 %v9157_v19 }
 0x8c0   :  { %8101 = vmatmul.mubr.msk.f32.vlgmr.msra.gmra.mrb[34].mxu1 %vm563_vm1, %v2104_v35 }
 0x8c1   :  { %8110 = vmatprep.mubr.msk.f32.mxu1 %vm9158_vm0, %v9157_v19 }
 0x941   :  { %v9815_v36 = vpop.f32.mrb[16].mxu0 }
 0x942   :  { %v8067_v37 = vpop.f32.mrb[17].mxu0 }
 0x946   :  { %v9817_v38 = vpop.f32.mrb[18].mxu0 }
 0x947   :  { %v8077_v39 = vpop.f32.mrb[19].mxu0 }
 0x94c   :  { %v1943_v40 = vpop.f32.mrb[20].mxu0 }
 0x94d   :  { %v1944_v41 = vadd.f32 %v1943_v40, %v9667_v33  ;;  %v8087_v42 = vpop.f32.mrb[21].mxu0 }
 0x94f   :  { %v2181_v43 = vsel %vm868_vm3, %v1944_v41, -inf }
 0x950   :  { %2182 = vmax.xlane.f32.xlu0 %v2181_v43  ;;  %v2099_v44 = vpop.f32.mrb[22].mxu0 }
 0x951   :  { %v2100_v45 = vadd.f32 %v2099_v44, %v9667_v33  ;;  %v8097_v47 = vpop.f32.mrb[23].mxu0 }
 0x953   :  { %v2187_v48 = vsel %vm868_vm3, %v2100_v45, -inf }
 0x954   :  { %2188 = vmax.xlane.f32.xlu0 %v2187_v48 }
 0x984   :  { %v9823_v51 = vpop.f32.mrb[28].mxu1 }
 0x985   :  { %v8865_v52 = vpack.i.bf16 %v9823_v51, %v9815_v36  ;;  %v8072_v20 = vpop.f32.mrb[29].mxu1 }
 0x988   :  { %v9827_v53 = vpop.f32.mrb[30].mxu1 }
 0x989   :  { %v8880_v56 = vpack.i.bf16 %v9827_v53, %v9817_v38  ;;  %v8082_v24 = vpop.f32.mrb[31].mxu1 }
 0x98f   :  { %v2021_v58 = vpop.f32.mrb[32].mxu1 }
 0x990   :  { %v2022_v28 = vadd.f32 %v2021_v58, %v9667_v33  ;;  %v8092_v63 = vpop.f32.mrb[33].mxu1 }
 0x992   :  { %v2184_v0 = vsel %vm868_vm3, %v2022_v28, -inf }
 0x993   :  { %2185 = vmax.xlane.f32.xlu1 %v2184_v0  ;;  %v2177_v1 = vpop.f32.mrb[34].mxu1 }
 0x994   :  { %v2178_v3 = vadd.f32 %v2177_v1, %v9667_v33  ;;  %v8102_v5 = vpop.f32.mrb[35].mxu1 }
 0x996   :  { %v2190_v6 = vsel %vm868_vm3, %v2178_v3, -inf }
 0x997   :  { %2191 = vmax.xlane.f32.xlu0 %v2190_v6 }
 0x9a4   :  { %2301 = vrot.lane.b32.xlu1 %v9619_v8, %s9161_s26 }
 0x9a8   :  { %2377 = vrot.lane.b32.xlu1 %v9648_v26, %s9161_s26 }
 0x9ac   :  { %2453 = vrot.lane.b32.xlu1 %v9643_v21, %s9161_s26 }
 0x9b0   :  { %2609 = vrot.lane.b32.xlu1 %v9622_v11, %s9162_s22 }
 0x9dd   :  { %v2183_v9 = vpop.xlane.xlu0 %2182 }
 0x9de   :  { %v2193_v10 = vsub.f32 %v1944_v41, %v2183_v9 }
 0x9e0   :  { %v2197_v12 = vmul.f32 1.442695, %v2193_v10 }
 0x9e1   :  { %v2189_v14 = vpop.xlane.xlu0 %2188 }
 0x9e2   :  { %8973 = vpow2.f32 %v2197_v12  ;;  %v2195_v16 = vsub.f32 %v2100_v45, %v2189_v14 }
 0x9e4   :  { %v2201_v17 = vmul.f32 1.442695, %v2195_v16 }
 0x9e6   :  { %8975 = vpow2.f32 %v2201_v17 }
 0x9ec   :  { %v8974_v22 = vpop.eup %8973 }
 0x9ed   :  { %v2205_v23 = vsel %vm868_vm3, %v8974_v22, 0.0 }
 0x9ee   :  { %2206 = vadd.xlane.f32.xlu0 %v2205_v23 }
 0x9f0   :  { %v8976_v30 = vpop.eup %8975 }
 0x9f1   :  { %v2211_v31 = vsel %vm868_vm3, %v8976_v30, 0.0 }
 0x9f2   :  { %2212 = vadd.xlane.f32.xlu0 %v2211_v31 }
 0xa08   :  { %2225 = vrot.lane.b32.xlu0 %v9659_v29, %s9161_s26 }
 0xa0c   :  { %2531 = vrot.lane.b32.xlu0 %v9613_v4, %s9162_s22 }
 0xa10   :  { %2529 = vrot.lane.b32.xlu0 %v9617_v7, %s9162_s22 }
 0xa14   :  { %2687 = vrot.lane.b32.xlu0 %v9633_v15, %s9162_s22 }
 0xa18   :  { %2685 = vrot.lane.b32.xlu0 %v9641_v18, %s9162_s22 }
 0xa20   :  { %v2186_v11 = vpop.xlane.xlu1 %2185 }
 0xa21   :  { %v2194_v34 = vsub.f32 %v2022_v28, %v2186_v11 }
 0xa23   :  { %v2199_v35 = vmul.f32 1.442695, %v2194_v34 }
 0xa24   :  { %v2302_v37 = vpop.permute.xlu1 %2301  ;;  %v2192_v7 = vpop.xlane.xlu0 %2191 }
 0xa25   :  { %8977 = vpow2.f32 %v2199_v35  ;;  %8109 = vmatpush3.msra.mxu1 %v2302_v37  ;;  %v2196_v15 = vsub.f32 %v2178_v3, %v2192_v7 }
 0xa26   :  { %8118 = vmatprep.subr.mxu1 %v9157_v19 }
 0xa27   :  { %v2203_v40 = vmul.f32 1.442695, %v2196_v15 }
 0xa28   :  { %v2378_v48 = vpop.permute.xlu1 %2377 }
 0xa29   :  { %8979 = vpow2.f32 %v2203_v40 }
 0xa2c   :  { %v2454_v28 = vpop.permute.xlu1 %2453 }
 0xa2f   :  { %v8978_v39 = vpop.eup %8977 }
 0xa30   :  { %v2208_v4 = vsel %vm868_vm3, %v8978_v39, 0.0  ;;  %v2610_v63 = vpop.permute.xlu1 %2609 }
 0xa31   :  { %2209 = vadd.xlane.f32.xlu1 %v2208_v4 }
 0xa33   :  { %v8980_v18 = vpop.eup %8979 }
 0xa34   :  { %v2214_v41 = vsel %vm868_vm3, %v8980_v18, 0.0 }
 0xa42   :  { %2607 = vrot.lane.b32.xlu1 %v9630_v13, %s9162_s22 }
 0xa66   :  { %2215 = vadd.xlane.f32.xlu1 %v2214_v41 }
 0xa77   :  { %2765 = vrot.lane.b32.xlu1 %v9646_v25, %s9162_s22 }
 0xa7b   :  { %2763 = vrot.lane.b32.xlu1 %v9656_v27, %s9162_s22  ;;  %v2207_v42 = vpop.xlane.xlu0 %2206 }
 0xa7c   :  { %8981 = vrcp.f32 %v2207_v42 }
 0xa7f   :  { %v2213_v43 = vpop.xlane.xlu0 %2212 }
 0xa80   :  { %8983 = vrcp.f32 %v2213_v43 }
 0xa83   :  { %v2226_v44 = vpop.permute.xlu0 %2225 }
 0xa84   :  { %8104 = vmatpush3.msra.mxu0 %v2226_v44 }
 0xa85   :  { %8113 = vmatprep.subr.mxu0 %v9157_v19 }
 0xa86   :  { %v8982_v13 = vpop.eup %8981 }
 0xa87   :  { %v2532_v45 = vpop.permute.xlu0 %2531  ;;  %v2221_v47 = vmul.f32 %v8982_v13, %v8974_v22 }
 0xa89   :  { %8106 = vmatmul.mubr.msk.f32.vlgmr.msra.gmra.mrb[24].mxu0 %vm868_vm3, %v2221_v47 }
 0xa8a   :  { %v8984_v20 = vpop.eup %8983  ;;  %8114 = vmatpush3.msra.mxu0 %v2378_v48  ;;  %8115 = vmatprep.mubr.msk.f32.mxu0 %vm9158_vm0, %v9157_v19 }
 0xa8b   :  { %v2530_v25 = vpop.permute.xlu0 %2529  ;;  %v2223_v27 = vmul.f32 %v8984_v20, %v8976_v30  ;;  %8123 = vmatprep.subr.mxu0 %v9157_v19 }
 0xa8d   :  { %8116 = vmatmul.mubr.msk.f32.vlgmr.msra.gmra.mrb[26].mxu0 %vm868_vm3, %v2223_v27 }
 0xa8e   :  { %8125 = vmatprep.mubr.msk.f32.mxu0 %vm9158_vm0, %v9157_v19 }
 0xa8f   :  { %v2688_v24 = vpop.permute.xlu0 %2687 }
 0xa91   :  { %8124 = vmatpush3.xpose.msk.msra.mxu0 %vm563_vm1, %v2532_v45 }
 0xa92   :  { %8133 = vmatprep.subr.mxu0 %v9157_v19 }
 0xa93   :  { %v2686_v58 = vpop.permute.xlu0 %2685 }
 0xa94   :  { %8126 = vmatmul.mubr.msk.f32.vlgmr.msra.gmra.mrb[28].mxu0 %vm563_vm1, %v2530_v25 }
 0xa95   :  { %8134 = vmatpush3.xpose.msk.msra.mxu0 %vm563_vm1, %v2688_v24  ;;  %8135 = vmatprep.mubr.msk.f32.mxu0 %vm9158_vm0, %v9157_v19 }
 0xa96   :  { %8143 = vmatprep.subr.mxu0 %v9157_v19 }
 0xa98   :  { %8136 = vmatmul.mubr.msk.f32.vlgmr.msra.gmra.mrb[30].mxu0 %vm563_vm1, %v2686_v58 }
 0xa99   :  { %8145 = vmatprep.mubr.msk.f32.mxu0 %vm9158_vm0, %v9157_v19 }
 0xabe   :  { %v2210_v0 = vpop.xlane.xlu1 %2209 }
 0xabf   :  { %8985 = vrcp.f32 %v2210_v0 }
 0xac2   :  { %v2608_v5 = vpop.permute.xlu1 %2607 }
 0xac9   :  { %v8986_v1 = vpop.eup %8985 }
 0xaca   :  { %v2222_v3 = vmul.f32 %v8986_v1, %v8978_v39 }
 0xacc   :  { %8111 = vmatmul.mubr.msk.f32.vlgmr.msra.gmra.mrb[36].mxu1 %vm868_vm3, %v2222_v3 }
 0xacd   :  { %8119 = vmatpush3.msra.mxu1 %v2454_v28  ;;  %8120 = vmatprep.mubr.msk.f32.mxu1 %vm9158_vm0, %v9157_v19 }
 0xace   :  { %8128 = vmatprep.subr.mxu1 %v9157_v19 }
 0xaf3   :  { %v2216_v6 = vpop.xlane.xlu1 %2215 }
 0xaf4   :  { %8987 = vrcp.f32 %v2216_v6 }
 0xaf7   :  { %v2766_v12 = vpop.permute.xlu1 %2765 }
 0xafb   :  { %v2764_v14 = vpop.permute.xlu1 %2763 }
 0xafe   :  { %v8988_v9 = vpop.eup %8987 }
 0xaff   :  { %v2224_v10 = vmul.f32 %v8988_v9, %v8980_v18 }
 0xb01   :  { %8121 = vmatmul.mubr.msk.f32.vlgmr.msra.gmra.mrb[38].mxu1 %vm868_vm3, %v2224_v10 }
 0xb02   :  { %8129 = vmatpush3.xpose.msk.msra.mxu1 %vm563_vm1, %v2610_v63  ;;  %8130 = vmatprep.mubr.msk.f32.mxu1 %vm9158_vm0, %v9157_v19 }
 0xb03   :  { %8138 = vmatprep.subr.mxu1 %v9157_v19 }
 0xb05   :  { %8131 = vmatmul.mubr.msk.f32.vlgmr.msra.gmra.mrb[40].mxu1 %vm563_vm1, %v2608_v5 }
 0xb06   :  { %8139 = vmatpush3.xpose.msk.msra.mxu1 %vm563_vm1, %v2766_v12  ;;  %8140 = vmatprep.mubr.msk.f32.mxu1 %vm9158_vm0, %v9157_v19 }
 0xb07   :  { %8148 = vmatprep.subr.mxu1 %v9157_v19 }
 0xb09   :  { %8141 = vmatmul.mubr.msk.f32.vlgmr.msra.gmra.mrb[42].mxu1 %vm563_vm1, %v2764_v14 }
 0xb0a   :  { %8150 = vmatprep.mubr.msk.f32.mxu1 %vm9158_vm0, %v9157_v19 }
 0xb5c   :  { %v9899_v16 = vpop.f32.mrb[24].mxu0 }
 0xb5d   :  { %v8107_v17 = vpop.f32.mrb[25].mxu0 }
 0xb60   :  { %v9901_v22 = vpop.f32.mrb[26].mxu0 }
 0xb61   :  { %v8117_v23 = vpop.f32.mrb[27].mxu0 }
 0xb67   :  { %v2603_v30 = vpop.f32.mrb[28].mxu0 }
 0xb68   :  { %v2604_v31 = vadd.f32 %v2603_v30, %v9667_v33  ;;  %v8127_v11 = vpop.f32.mrb[29].mxu0 }
 0xb6a   :  { %v2841_v34 = vsel %vm868_vm3, %v2604_v31, -inf }
 0xb6b   :  { %2842 = vmax.xlane.f32.xlu0 %v2841_v34  ;;  %v2759_v35 = vpop.f32.mrb[30].mxu0 }
 0xb6c   :  { %v2760_v37 = vadd.f32 %v2759_v35, %v9667_v33  ;;  %v8137_v39 = vpop.f32.mrb[31].mxu0 }
 0xb6e   :  { %v2847_v4 = vsel %vm868_vm3, %v2760_v37, -inf }
 0xb6f   :  { %2848 = vmax.xlane.f32.xlu0 %v2847_v4 }
 0xb9f   :  { %v2373_v7 = vpop.f32.mrb[36].mxu1 }
 0xba0   :  { %v8870_v15 = vpack.i.bf16 %v2373_v7, %v9899_v16  ;;  %v8112_v40 = vpop.f32.mrb[37].mxu1 }
 0xba1   :  { %v3252_v40 = vld [vmem:[%s11206_s9 + $0x8] sm:$0xff] }
 0xbd4   :  { %v9908_v18 = vpop.f32.mrb[38].mxu1 }
 0xbd5   :  { %v8885_v41 = vpack.i.bf16 %v9908_v18, %v9901_v22  ;;  %v8122_v42 = vpop.f32.mrb[39].mxu1 }
 0xbd6   :  { %v3253_v42 = vld [vmem:[%s11206_s9 + $0x10] sm:$0xff] }
 0xbd8   :  { %v2681_v43 = vpop.f32.mrb[40].mxu1 }
 0xbd9   :  { %v2682_v44 = vadd.f32 %v2681_v43, %v9667_v33  ;;  %v8132_v13 = vpop.f32.mrb[41].mxu1 }
 0xbdb   :  { %v2844_v45 = vsel %vm868_vm3, %v2682_v44, -inf }
 0xbdc   :  { %2845 = vmax.xlane.f32.xlu1 %v2844_v45  ;;  %v2837_v47 = vpop.f32.mrb[42].mxu1  ;;  %v3255_v45 = vld [vmem:[%s11206_s9 + $0x20] sm:$0xff] }
 0xbdd   :  { %v2838_v48 = vadd.f32 %v2837_v47, %v9667_v33  ;;  %v8142_v20 = vpop.f32.mrb[43].mxu1  ;;  %v3256_v47 = vld [vmem:[%s11206_s9 + $0x28] sm:$0xff] }
 0xbde   :  { %v3257_v20 = vld [vmem:[%s11206_s9 + $0x30] sm:$0xff] }
 0xbdf   :  { %v2850_v25 = vsel %vm868_vm3, %v2838_v48, -inf }
 0xbe0   :  { %2851 = vmax.xlane.f32.xlu0 %v2850_v25  ;;  %v3258_v25 = vld [vmem:[%s11206_s9 + $0x38] sm:$0xff] }
 0xbed   :  { %2961 = vrot.lane.b32.xlu1 %v9619_v8, %s9162_s22 }
 0xbf1   :  { %3037 = vrot.lane.b32.xlu1 %v9648_v26, %s9162_s22 }
 0xbf8   :  { %v2843_v27 = vpop.xlane.xlu0 %2842 }
 0xbf9   :  { %v2853_v24 = vsub.f32 %v2604_v31, %v2843_v27 }
 0xbfb   :  { %v2857_v58 = vmul.f32 1.442695, %v2853_v24 }
 0xbfc   :  { %v2849_v28 = vpop.xlane.xlu0 %2848 }
 0xbfd   :  { %8989 = vpow2.f32 %v2857_v58  ;;  %v2855_v63 = vsub.f32 %v2760_v37, %v2849_v28  ;;  %v8583_v58 = vpack.c.bf16 %v3258_v25, %v3257_v20  ;;  %v3259_v28 = vld [vmem:[%s11206_s9 + $0x40] sm:$0xff] }
 0xbff   :  { %v2861_v0 = vmul.f32 1.442695, %v2855_v63  ;;  %v3260_v63 = vld [vmem:[%s11206_s9 + $0x48] sm:$0xff] }
 0xc01   :  { %8991 = vpow2.f32 %v2861_v0 }
 0xc07   :  { %v8990_v1 = vpop.eup %8989 }
 0xc08   :  { %v2865_v3 = vsel %vm868_vm3, %v8990_v1, 0.0 }
 0xc09   :  { %2866 = vadd.xlane.f32.xlu0 %v2865_v3  ;;  %v8587_v3 = vpack.c.bf16 %v3260_v63, %v3259_v28 }
 0xc0b   :  { %v8992_v5 = vpop.eup %8991 }
 0xc0c   :  { %v2871_v6 = vsel %vm868_vm3, %v8992_v5, 0.0 }
 0xc0d   :  { %2872 = vadd.xlane.f32.xlu0 %v2871_v6  ;;  %v3262_v6 = vld [vmem:[%s11206_s9 + $0x58] sm:$0xff] }
 0xc23   :  { %2885 = vrot.lane.b32.xlu0 %v9659_v29, %s9162_s22 }
 0xc27   :  { %8866 = vrot.lane.b32.xlu0 %v8865_v52, %s9162_s22 }
 0xc69   :  { %v2846_v8 = vpop.xlane.xlu1 %2845 }
 0xc6a   :  { %v2854_v26 = vsub.f32 %v2682_v44, %v2846_v8  ;;  %v3254_v44 = vld [vmem:[%s11206_s9 + $0x18] sm:$0xff] }
 0xc6b   :  { %v8575_v13 = vpack.c.bf16 %v3254_v44, %v3253_v42 }
 0xc6c   :  { %v2859_v9 = vmul.f32 1.442695, %v2854_v26  ;;  %v3263_v26 = vld [vmem:[%s11206_s9 + $0x60] sm:$0xff] }
 0xc6d   :  { %v2962_v10 = vpop.permute.xlu1 %2961  ;;  %v2852_v12 = vpop.xlane.xlu0 %2851 }
 0xc6e   :  { %8993 = vpow2.f32 %v2859_v9  ;;  %v2856_v14 = vsub.f32 %v2838_v48, %v2852_v12  ;;  %8149 = vmatpush3.msra.mxu1 %v2962_v10  ;;  %v8579_v48 = vpack.c.bf16 %v3256_v47, %v3255_v45  ;;  %v3264_v9 = vld [vmem:[%s11206_s9 + $0x68] sm:$0xff]  ;;  %v3265_v12 = vld [vmem:[%s11206_s9 + $0x70] sm:$0xff] }
 0xc6f   :  { %8158 = vmatprep.subr.mxu1 %v9157_v19  ;;  %v8595_v10 = vpack.c.bf16 %v3264_v9, %v3263_v26 }
 0xc70   :  { %v2863_v16 = vmul.f32 1.442695, %v2856_v14  ;;  %v3266_v14 = vld [vmem:[%s11206_s9 + $0x78] sm:$0xff] }
 0xc71   :  { %v3038_v34 = vpop.permute.xlu1 %3037 }
 0xc72   :  { %8995 = vpow2.f32 %v2863_v16  ;;  %v8599_v16 = vpack.c.bf16 %v3266_v14, %v3265_v12  ;;  %v3430_v12 = vld [vmem:[%s11208_s13 + $0x38] sm:$0xff] }
 0xc78   :  { %v8994_v17 = vpop.eup %8993 }
 0xc79   :  { %v2868_v29 = vsel %vm868_vm3, %v8994_v17, 0.0 }
 0xc7a   :  { %2869 = vadd.xlane.f32.xlu1 %v2868_v29 }
 0xc7c   :  { %v8996_v23 = vpop.eup %8995 }
 0xc7d   :  { %v2874_v36 = vsel %vm868_vm3, %v8996_v23, 0.0 }
 0xc7e   :  { %2875 = vadd.xlane.f32.xlu1 %v2874_v36 }
 0xc8f   :  { %3113 = vrot.lane.b32.xlu1 %v9643_v21, %s9162_s22 }
 0xc93   :  { %8871 = vrot.lane.b32.xlu1 %v8870_v15, %s9161_s26  ;;  %v3251_v15 = vld [vmem:[%s11206_s9] sm:$0xff] }
 0xc94   :  { %v8571_v43 = vpack.c.bf16 %v3252_v40, %v3251_v15 }
 0xc96   :  { %v2867_v51 = vpop.xlane.xlu0 %2866 }
 0xc97   :  { %8997 = vrcp.f32 %v2867_v51  ;;  %8881 = vrot.lane.b32.xlu1 %v8880_v56, %s9162_s22 }
 0xc9a   :  { %v2873_v52 = vpop.xlane.xlu0 %2872 }
 0xc9b   :  { %8999 = vrcp.f32 %v2873_v52 }
 0xc9e   :  { %v2886_v30 = vpop.permute.xlu0 %2885 }
 0xc9f   :  { %8144 = vmatpush3.msra.mxu0 %v2886_v30 }
 0xca0   :  { %8153 = vmatprep.subr.mxu0 %v9157_v19 }
 0xca1   :  { %v8998_v31 = vpop.eup %8997 }
 0xca2   :  { %v2881_v11 = vmul.f32 %v8998_v31, %v8990_v1  ;;  %v8867_v31 = vpop.permute.xlu0 %8866 }
 0xca4   :  { %8146 = vmatmul.mubr.msk.f32.vlgmr.msra.gmra.mrb[32].mxu0 %vm868_vm3, %v2881_v11  ;;  %v8869_v11 = vunpack.i.h.bf16 %v8867_v31 }
 0xca5   :  { %v9000_v21 = vpop.eup %8999  ;;  %8154 = vmatpush3.msra.mxu0 %v3038_v34  ;;  %8155 = vmatprep.mubr.msk.f32.mxu0 %vm9158_vm0, %v9157_v19  ;;  %v8868_v34 = vunpack.i.l.bf16 %v8867_v31  ;;  %v3433_v31 = vld [vmem:[%s11208_s13 + $0x50] sm:$0xff] }
 0xca6   :  { %v2883_v35 = vmul.f32 %v9000_v21, %v8992_v5  ;;  %8572 = vmatprep.subr.bf16.mxu0 %v8571_v43  ;;  %v3261_v5 = vld [vmem:[%s11206_s9 + $0x50] sm:$0xff]  ;;  %v3238_v22 = vsel %vm563_vm1, %v9738_v55, %v8869_v11 }
 0xca7   :  { %v8591_v8 = vpack.c.bf16 %v3262_v6, %v3261_v5 }
 0xca8   :  { %8156 = vmatmul.mubr.msk.f32.vlgmr.msra.gmra.mrb[34].mxu0 %vm868_vm3, %v2883_v35 }
 0xca9   :  { %8574 = vmatpush3.bf16.msra.mxu0 %v8571_v43 }
 0xcaa   :  { %8576 = vmatprep.subr.bf16.mxu0 %v8575_v13 }
 0xcad   :  { %8578 = vmatpush3.bf16.msra.mxu0 %v8575_v13 }
 0xcae   :  { %8580 = vmatprep.subr.bf16.mxu0 %v8579_v48 }
 0xcb1   :  { %8582 = vmatpush3.bf16.msra.mxu0 %v8579_v48 }
 0xcb2   :  { %8584 = vmatprep.subr.bf16.mxu0 %v8583_v58 }
 0xcb5   :  { %8586 = vmatpush3.bf16.msra.mxu0 %v8583_v58 }
 0xcb6   :  { %8588 = vmatprep.subr.bf16.mxu0 %v8587_v3 }
 0xcb9   :  { %8590 = vmatpush3.bf16.msra.mxu0 %v8587_v3 }
 0xcba   :  { %8592 = vmatprep.subr.bf16.mxu0 %v8591_v8 }
 0xcbd   :  { %8594 = vmatpush3.bf16.msra.mxu0 %v8591_v8 }
 0xcbe   :  { %8596 = vmatprep.subr.bf16.mxu0 %v8595_v10 }
 0xcc1   :  { %8598 = vmatpush3.bf16.msra.mxu0 %v8595_v10  ;;  %v3428_v10 = vld [vmem:[%s11208_s13 + $0x28] sm:$0xff] }
 0xcc2   :  { %8600 = vmatprep.subr.bf16.mxu0 %v8599_v16 }
 0xcc5   :  { %8602 = vmatpush3.bf16.msra.mxu0 %v8599_v16  ;;  %v8607_v16 = vpack.c.bf16 %v3430_v12, %v3428_v10  ;;  %v3454_v10 = vld [vmem:[%s11208_s13 + $0xf8] sm:$0xff]  ;;  %v3451_v12 = vld [vmem:[%s11208_s13 + $0xe0] sm:$0xff] }
 0xd07   :  { %v2870_v38 = vpop.xlane.xlu1 %2869 }
 0xd08   :  { %9001 = vrcp.f32 %v2870_v38 }
 0xd0b   :  { %v2876_v53 = vpop.xlane.xlu1 %2875 }
 0xd0c   :  { %9003 = vrcp.f32 %v2876_v53 }
 0xd0f   :  { %v3114_v39 = vpop.permute.xlu1 %3113 }
 0xd12   :  { %v9002_v56 = vpop.eup %9001 }
 0xd13   :  { %v2882_v37 = vmul.f32 %v9002_v56, %v8994_v17  ;;  %v8872_v30 = vpop.permute.xlu1 %8871 }
 0xd14   :  { %v8874_v21 = vunpack.i.h.bf16 %v8872_v30  ;;  %v8873_v35 = vunpack.i.l.bf16 %v8872_v30  ;;  %v3431_v30 = vld [vmem:[%s11208_s13 + $0x40] sm:$0xff] }
 0xd15   :  { %8151 = vmatmul.mubr.msk.f32.vlgmr.msra.gmra.mrb[44].mxu1 %vm868_vm3, %v2882_v37  ;;  %v8613_v11 = vpack.c.bf16 %v3433_v31, %v3431_v30 }
 0xd16   :  { %v9004_v4 = vpop.eup %9003  ;;  %8159 = vmatpush3.msra.mxu1 %v3114_v39  ;;  %8160 = vmatprep.mubr.msk.f32.mxu1 %vm9158_vm0, %v9157_v19  ;;  %v3237_v39 = vsel %vm563_vm1, %v9735_v49, %v8868_v34 }
 0xd17   :  { %v2884_v7 = vmul.f32 %v9004_v4, %v8996_v23  ;;  %v8882_v38 = vpop.permute.xlu1 %8881  ;;  %v3242_v4 = vsel %vm3241_vm4, %v3237_v39, %v8873_v35 }
 0xd18   :  { %v8884_v18 = vunpack.i.h.bf16 %v8882_v38 }
 0xd19   :  { %8161 = vmatmul.mubr.msk.f32.vlgmr.msra.gmra.mrb[46].mxu1 %vm868_vm3, %v2884_v7  ;;  %v3243_v7 = vsel %vm3241_vm4, %v3238_v22, %v8874_v21 }
 0xd1a   :  { %3531 = vmatprep.mubr.f32.mxu1 %v9157_v19  ;;  %v3240_v47 = vsel %vm563_vm1, %v9745_v2, %v8884_v18 }
 0xd77   :  { %v2957_v27 = vpop.f32.mrb[32].mxu0 }
 0xd78   :  { %v8147_v24 = vpop.f32.mrb[33].mxu0 }
 0xd79   :  { %v7400_v24 = vld [vmem:[%s11207_s10] ss:$0 sm:$0xff] }
 0xd7b   :  { %v3109_v0 = vpop.f32.mrb[34].mxu0 }
 0xd7c   :  { %v8157_v1 = vpop.f32.mrb[35].mxu0 }
 0xde8   :  { %v3033_v17 = vpop.f32.mrb[44].mxu1 }
 0xde9   :  { %v8875_v29 = vpack.i.bf16 %v3033_v17, %v2957_v27  ;;  %v8152_v23 = vpop.f32.mrb[45].mxu1  ;;  %v3427_v17 = vld [vmem:[%s11208_s13 + $0x20] sm:$0xff] }
 0xdea   :  { %v3432_v23 = vld [vmem:[%s11208_s13 + $0x48] sm:$0xff] }
 0xdeb   :  { %8876 = vrot.lane.b32.xlu0 %v8875_v29, %s9160_s0  ;;  %v3429_v29 = vld [vmem:[%s11208_s13 + $0x30] sm:$0xff] }
 0xdec   :  { %v3185_v36 = vpop.f32.mrb[46].mxu1 }
 0xded   :  { %v8890_v51 = vpack.i.bf16 %v3185_v36, %v3109_v0  ;;  %v8162_v52 = vpop.f32.mrb[47].mxu1  ;;  %v3434_v36 = vld [vmem:[%s11208_s13 + $0x58] sm:$0xff] }
 0xdee   :  { %v8611_v52 = vpack.c.bf16 %v3434_v36, %v3432_v23 }
 0xdef   :  { %8886 = vrot.lane.b32.xlu0 %v8885_v41, %s9161_s26  ;;  %8891 = vrot.lane.b32.xlu1 %v8890_v51, %s9160_s0  ;;  %v8883_v41 = vunpack.i.l.bf16 %v8882_v38  ;;  %v8609_v51 = vpack.c.bf16 %v3429_v29, %v3427_v17 }
 0xdf1   :  { %v3239_v55 = vsel %vm563_vm1, %v9742_v60, %v8883_v41 }
 0xe5d   :  { %v8877_v53 = vpop.permute.xlu0 %8876 }
 0xe5e   :  { %v8879_v56 = vunpack.i.h.bf16 %v8877_v53  ;;  %v8878_v37 = vunpack.i.l.bf16 %v8877_v53 }
 0xe60   :  { %v3247_v15 = vsel %vm3246_vm5, %v3242_v4, %v8878_v37  ;;  %v3248_v40 = vsel %vm3246_vm5, %v3243_v7, %v8879_v56 }
 0xe61   :  { %v8887_v42 = vpop.permute.xlu0 %8886  ;;  %8195 = vmatprep.mubr.f32.mxu0 %v3247_v15  ;;  %v8892_v43 = vpop.permute.xlu1 %8891 }
 0xe62   :  { %v8889_v44 = vunpack.i.h.bf16 %v8887_v42  ;;  %v8888_v13 = vunpack.i.l.bf16 %v8887_v42  ;;  %v8894_v45 = vunpack.i.h.bf16 %v8892_v43  ;;  %v8893_v49 = vunpack.i.l.bf16 %v8892_v43  ;;  %8196 = vmatmul.mubr.f32.vlgmr.msra.gmra.mrb[36].mxu0 %v3248_v40  ;;  %v3436_v43 = vld [vmem:[%s11208_s13 + $0x68] sm:$0xff] }
 0xe64   :  { %v3244_v48 = vsel %vm3241_vm4, %v3239_v55, %v8888_v13  ;;  %v3245_v20 = vsel %vm3241_vm4, %v3240_v47, %v8889_v44  ;;  %v3438_v44 = vld [vmem:[%s11208_s13 + $0x78] sm:$0xff]  ;;  %v3440_v47 = vld [vmem:[%s11208_s13 + $0x88] sm:$0xff] }
 0xe65   :  { %v3249_v25 = vsel %vm3246_vm5, %v3244_v48, %v8893_v49  ;;  %v3250_v27 = vsel %vm3246_vm5, %v3245_v20, %v8894_v45  ;;  %v8615_v13 = vpack.c.bf16 %v3438_v44, %v3436_v43  ;;  %v3435_v45 = vld [vmem:[%s11208_s13 + $0x60] sm:$0xff]  ;;  %v3437_v49 = vld [vmem:[%s11208_s13 + $0x70] sm:$0xff]  ;;  %v3442_v48 = vld [vmem:[%s11208_s13 + $0x98] sm:$0xff] }
 0xe66   :  { %8198 = vmatprep.mubr.f32.mxu0 %v3249_v25  ;;  %v8617_v55 = vpack.c.bf16 %v3437_v49, %v3435_v45  ;;  %v8619_v20 = vpack.c.bf16 %v3442_v48, %v3440_v47  ;;  %v3439_v25 = vld [vmem:[%s11208_s13 + $0x80] sm:$0xff] }
 0xe67   :  { %8199 = vmatmul.mubr.f32.gmra.mrb[38].mxu0 %v3250_v27  ;;  %v3441_v27 = vld [vmem:[%s11208_s13 + $0x90] sm:$0xff] }
 0xf35   :  { %v8197_v58 = vpop.f32.mrb[36].mxu0 }
 0xf36   :  { %v3344_v28 = vadd.f32 %v8197_v58, %v7400_v24  ;;  %v3338_v60 = vpop.f32.mrb[37].mxu0  ;;  %v3444_v58 = vld [vmem:[%s11208_s13 + $0xa8] sm:$0xff] }
 0xf37   :  { %v3339_v63 = vadd.f32 %v7400_v24, %v3338_v60 }
 0xf38   :  { %v10022_v2 = vadd.f32 %v3344_v28, %v9404_v50  ;;  %v3426_v50 = vld [vmem:[%s11208_s13 + $0x18] sm:$0xff] }
 0xf39   :  { %v10025_v0 = vadd.f32 %v3339_v63, %v9401_v46  ;;  %v3424_v46 = vld [vmem:[%s11208_s13 + $0x8] sm:$0xff]  ;;  %v3446_v28 = vld [vmem:[%s11208_s13 + $0xb8] sm:$0xff]  ;;  %v3443_v63 = vld [vmem:[%s11208_s13 + $0xa0] sm:$0xff] }
 0xf3a   :  { %3365 = vadd.xlane.f32.xlu1 %v10022_v2  ;;  %v8200_v1 = vpop.f32.mrb[38].mxu0  ;;  %v8603_v9 = vpack.c.bf16 %v3426_v50, %v3424_v46  ;;  %v8623_v60 = vpack.c.bf16 %v3446_v28, %v3444_v58  ;;  %v3447_v50 = vld [vmem:[%s11208_s13 + $0xc0] sm:$0xff]  ;;  %v3638_v58 = vld [vmem:[%s11211_s15 + $0x90] sm:$0xff]  ;;  %v3639_v28 = vld [vmem:[%s11211_s15 + $0x98] sm:$0xff] }
 0xf3b   :  { %3363 = vadd.xlane.f32.xlu0 %v10025_v0  ;;  %v3348_v3 = vpop.f32.mrb[39].mxu0  ;;  %v3354_v6 = vadd.f32 %v8200_v1, %v7400_v24  ;;  %v3445_v1 = vld [vmem:[%s11208_s13 + $0xb0] sm:$0xff] }
 0xf3c   :  { %v3349_v5 = vadd.f32 %v7400_v24, %v3348_v3  ;;  %8604 = vmatprep.subr.bf16.mxu1 %v8603_v9  ;;  %v8621_v24 = vpack.c.bf16 %v3441_v27, %v3439_v25  ;;  %v8625_v3 = vpack.c.bf16 %v3445_v1, %v3443_v63  ;;  %v3452_v9 = vld [vmem:[%s11208_s13 + $0xe8] sm:$0xff]  ;;  %v3620_v25 = vld [vmem:[%s11211_s15] sm:$0xff]  ;;  %v3622_v63 = vld [vmem:[%s11211_s15 + $0x10] sm:$0xff] }
 0xf3d   :  { %v10034_v26 = vadd.f32 %v3354_v6, %v9410_v57  ;;  %v3425_v57 = vld [vmem:[%s11208_s13 + $0x10] sm:$0xff]  ;;  %v3450_v6 = vld [vmem:[%s11208_s13 + $0xd8] sm:$0xff]  ;;  %v3621_v27 = vld [vmem:[%s11211_s15 + $0x8] sm:$0xff] }
 0xf3e   :  { %v10030_v8 = vadd.f32 %v3349_v5, %v9407_v54  ;;  %v3423_v54 = vld [vmem:[%s11208_s13] sm:$0xff]  ;;  %v3448_v5 = vld [vmem:[%s11208_s13 + $0xc8] sm:$0xff]  ;;  %v3623_v1 = vld [vmem:[%s11211_s15 + $0x18] sm:$0xff] }
 0xf3f   :  { %v8605_v14 = vpack.c.bf16 %v3425_v57, %v3423_v54  ;;  %v8627_v46 = vpack.c.bf16 %v3450_v6, %v3448_v5  ;;  %v3449_v54 = vld [vmem:[%s11208_s13 + $0xd0] sm:$0xff]  ;;  %v3640_v5 = vld [vmem:[%s11211_s15 + $0xa0] sm:$0xff]  ;;  %v3641_v6 = vld [vmem:[%s11211_s15 + $0xa8] sm:$0xff] }
 0xf40   :  { %3367 = vadd.xlane.f32.xlu0 %v10030_v8  ;;  %v8629_v57 = vpack.c.bf16 %v3449_v54, %v3447_v50  ;;  %v3624_v50 = vld [vmem:[%s11211_s15 + $0x20] sm:$0xff]  ;;  %v3625_v54 = vld [vmem:[%s11211_s15 + $0x28] sm:$0xff] }
 0xf41   :  { %8606 = vmatpush1.bf16.msra.mxu1 %v8605_v14  ;;  %v3453_v14 = vld [vmem:[%s11208_s13 + $0xf0] sm:$0xff] }
 0xf42   :  { %8608 = vmatprep.subr.bf16.mxu1 %v8607_v16  ;;  %v8631_v16 = vpack.c.bf16 %v3454_v10, %v3452_v9  ;;  %v8633_v17 = vpack.c.bf16 %v3453_v14, %v3451_v12  ;;  %v8645_v9 = vpack.c.bf16 %v3625_v54, %v3624_v50  ;;  %v3643_v10 = vld [vmem:[%s11211_s15 + $0xb8] sm:$0xff]  ;;  %v3626_v14 = vld [vmem:[%s11211_s15 + $0x30] sm:$0xff] }
 0xf44   :  { %3369 = vadd.xlane.f32.xlu0 %v10034_v26 }
 0xf45   :  { %8610 = vmatpush1.bf16.msra.mxu1 %v8609_v51 }
 0xf46   :  { %8612 = vmatprep.subr.bf16.mxu1 %v8611_v52 }
 0xf49   :  { %8614 = vmatpush1.bf16.msra.mxu1 %v8613_v11 }
 0xf4a   :  { %8616 = vmatprep.subr.bf16.mxu1 %v8615_v13 }
 0xf4d   :  { %8618 = vmatpush1.bf16.msra.mxu1 %v8617_v55 }
 0xf4e   :  { %8620 = vmatprep.subr.bf16.mxu1 %v8619_v20 }
 0xf51   :  { %8622 = vmatpush1.bf16.msra.mxu1 %v8621_v24  ;;  %v8637_v24 = vpack.c.bf16 %v3621_v27, %v3620_v25 }
 0xf52   :  { %8624 = vmatprep.subr.bf16.mxu1 %v8623_v60  ;;  %v8639_v60 = vpack.c.bf16 %v3639_v28, %v3638_v58 }
 0xf55   :  { %8626 = vmatpush1.bf16.msra.mxu1 %v8625_v3  ;;  %v8641_v3 = vpack.c.bf16 %v3623_v1, %v3622_v63 }
 0xf56   :  { %8628 = vmatprep.subr.bf16.mxu1 %v8627_v46  ;;  %v8643_v46 = vpack.c.bf16 %v3641_v6, %v3640_v5 }
 0xf59   :  { %8630 = vmatpush1.bf16.msra.mxu1 %v8629_v57  ;;  %v3642_v57 = vld [vmem:[%s11211_s15 + $0xb0] sm:$0xff] }
 0xf5a   :  { %8632 = vmatprep.subr.bf16.mxu1 %v8631_v16  ;;  %v8647_v12 = vpack.c.bf16 %v3643_v10, %v3642_v57  ;;  %v3627_v16 = vld [vmem:[%s11211_s15 + $0x38] sm:$0xff] }
 0xf5d   :  { %8634 = vmatpush1.bf16.msra.mxu1 %v8633_v17  ;;  %v8649_v17 = vpack.c.bf16 %v3627_v16, %v3626_v14 }
 0xfc7   :  { %v3366_v34 = vpop.xlane.xlu1 %3365 }
 0xfc8   :  { %v3372_v21 = vmul.f32 0.0078125, %v3366_v34  ;;  %v3364_v35 = vpop.xlane.xlu0 %3363 }
 0xfc9   :  { %v3371_v38 = vmul.f32 0.0078125, %v3364_v35 }
 0xfca   :  { %v10074_v53 = vsub.f32 %v10022_v2, %v3372_v21 }
 0xfcb   :  { %v10077_v56 = vsub.f32 %v10025_v0, %v3371_v38 }
 0xfcc   :  { %v3380_v37 = vmul.f32 %v10074_v53, %v10074_v53 }
 0xfcd   :  { %v3368_v39 = vpop.xlane.xlu0 %3367  ;;  %v3379_v22 = vmul.f32 %v10077_v56, %v10077_v56 }
 0xfce   :  { %v3373_v18 = vmul.f32 0.0078125, %v3368_v39  ;;  %3385 = vadd.xlane.f32.xlu1 %v3380_v37 }
 0xfcf   :  { %3383 = vadd.xlane.f32.xlu0 %v3379_v22  ;;  %v7401_v22 = vld [vmem:[%s11209_s11] ss:$0 sm:$0xff] }
 0xfd0   :  { %v10084_v41 = vsub.f32 %v10030_v8, %v3373_v18 }
 0xfd1   :  { %v3370_v4 = vpop.xlane.xlu0 %3369 }
 0xfd2   :  { %v3374_v7 = vmul.f32 0.0078125, %v3370_v4  ;;  %v3381_v15 = vmul.f32 %v10084_v41, %v10084_v41 }
 0xfd4   :  { %v10089_v40 = vsub.f32 %v10034_v26, %v3374_v7  ;;  %3387 = vadd.xlane.f32.xlu0 %v3381_v15  ;;  %v7402_v7 = vld [vmem:[%s11210_s12] ss:$0 sm:$0xff] }
 0xfd6   :  { %v3382_v42 = vmul.f32 %v10089_v40, %v10089_v40 }
 0xfd8   :  { %3389 = vadd.xlane.f32.xlu1 %v3382_v42 }
0x105b   :  { %v3386_v29 = vpop.xlane.xlu1 %3385 }
0x105c   :  { %v3392_v23 = vmul.f32 0.0078125, %v3386_v29  ;;  %v3384_v36 = vpop.xlane.xlu0 %3383  ;;  %v3644_v29 = vld [vmem:[%s11211_s15 + $0xc0] sm:$0xff] }
0x105d   :  { %v3391_v51 = vmul.f32 0.0078125, %v3384_v36 }
0x105e   :  { %v3396_v52 = vadd.f32 1e-05, %v3392_v23  ;;  %v3645_v23 = vld [vmem:[%s11211_s15 + $0xc8] sm:$0xff] }
0x105f   :  { %v3395_v30 = vadd.f32 1e-05, %v3391_v51  ;;  %v8651_v36 = vpack.c.bf16 %v3645_v23, %v3644_v29  ;;  %v3628_v51 = vld [vmem:[%s11211_s15 + $0x40] sm:$0xff] }
0x1060   :  { %9005 = vrsqrt.f32 %v3396_v52  ;;  %v3629_v52 = vld [vmem:[%s11211_s15 + $0x48] sm:$0xff] }
0x1061   :  { %9007 = vrsqrt.f32 %v3395_v30  ;;  %v3388_v31 = vpop.xlane.xlu0 %3387  ;;  %v8653_v30 = vpack.c.bf16 %v3629_v52, %v3628_v51 }
0x1062   :  { %v3393_v11 = vmul.f32 0.0078125, %v3388_v31  ;;  %v3646_v31 = vld [vmem:[%s11211_s15 + $0xd0] sm:$0xff] }
0x1064   :  { %v3397_v34 = vadd.f32 1e-05, %v3393_v11  ;;  %v3647_v11 = vld [vmem:[%s11211_s15 + $0xd8] sm:$0xff] }
0x1065   :  { %v3390_v21 = vpop.xlane.xlu1 %3389 }
0x1066   :  { %9009 = vrsqrt.f32 %v3397_v34  ;;  %v3394_v35 = vmul.f32 0.0078125, %v3390_v21  ;;  %v8655_v34 = vpack.c.bf16 %v3647_v11, %v3646_v31  ;;  %v3630_v21 = vld [vmem:[%s11211_s15 + $0x50] sm:$0xff] }
0x1068   :  { %v3398_v38 = vadd.f32 1e-05, %v3394_v35  ;;  %v3631_v35 = vld [vmem:[%s11211_s15 + $0x58] sm:$0xff] }
0x106a   :  { %v9006_v37 = vpop.eup %9005  ;;  %9011 = vrsqrt.f32 %v3398_v38  ;;  %v8657_v38 = vpack.c.bf16 %v3631_v35, %v3630_v21 }
0x106b   :  { %v9008_v39 = vpop.eup %9007  ;;  %v3404_v4 = vmul.f32 %v9006_v37, %v10074_v53  ;;  %v3648_v37 = vld [vmem:[%s11211_s15 + $0xe0] sm:$0xff] }
0x106c   :  { %v3403_v18 = vmul.f32 %v9008_v39, %v10077_v56  ;;  %v3649_v39 = vld [vmem:[%s11211_s15 + $0xe8] sm:$0xff] }
0x106d   :  { %v3412_v44 = vmul.f32 %v7401_v22, %v3404_v4  ;;  %v3633_v4 = vld [vmem:[%s11211_s15 + $0x68] sm:$0xff] }
0x106e   :  { %v3411_v15 = vmul.f32 %v7401_v22, %v3403_v18  ;;  %v3632_v18 = vld [vmem:[%s11211_s15 + $0x60] sm:$0xff] }
0x106f   :  { %v3420_v49 = vadd.f32 %v7402_v7, %v3412_v44  ;;  %v3634_v44 = vld [vmem:[%s11211_s15 + $0x70] sm:$0xff] }
0x1070   :  { %v9010_v42 = vpop.eup %9009  ;;  %v3419_v43 = vadd.f32 %v7402_v7, %v3411_v15  ;;  %v3650_v15 = vld [vmem:[%s11211_s15 + $0xf0] sm:$0xff] }
0x1071   :  { %v3405_v13 = vmul.f32 %v9010_v42, %v10084_v41  ;;  %v3636_v41 = vld [vmem:[%s11211_s15 + $0x80] sm:$0xff]  ;;  %v3651_v42 = vld [vmem:[%s11211_s15 + $0xf8] sm:$0xff] }
0x1072   :  { %3532 = vmatmul.mubr.f32.vlgmr.msra.gmra.mrb[48].mxu1 %v3419_v43  ;;  %v8663_v43 = vpack.c.bf16 %v3651_v42, %v3650_v15 }
0x1073   :  { %3537 = vmatprep.mubr.f32.mxu1 %v9157_v19  ;;  %v3413_v55 = vmul.f32 %v7401_v22, %v3405_v13  ;;  %v3635_v13 = vld [vmem:[%s11211_s15 + $0x78] sm:$0xff] }
0x1074   :  { %v9012_v45 = vpop.eup %9011 }
0x1075   :  { %v3406_v56 = vmul.f32 %v9012_v45, %v10089_v40  ;;  %v3421_v53 = vadd.f32 %v7402_v7, %v3413_v55  ;;  %v3637_v40 = vld [vmem:[%s11211_s15 + $0x88] sm:$0xff]  ;;  %v8665_v45 = vpack.c.bf16 %v3635_v13, %v3634_v44 }
0x1076   :  { %3538 = vmatmul.mubr.f32.gmra.mrb[50].mxu1 %v3420_v49  ;;  %v8635_v20 = vpack.c.bf16 %v3637_v40, %v3636_v41  ;;  %v3455_v49 = vld [vmem:[%s11212_s14] ss:$2 sm:$0x3] }
0x1077   :  { %3543 = vmatprep.mubr.f32.mxu1 %v9157_v19  ;;  %v3414_v47 = vmul.f32 %v7401_v22, %v3406_v56  ;;  %v8659_v22 = vpack.c.bf16 %v3649_v39, %v3648_v37  ;;  %v3460_v55 = vrot.slane %v3455_v49, %v9606_v61  ;;  %v3464_v56 = vrot.slane %v3455_v49, %v9600_v32 }
0x1078   :  { %8636 = vmatprep.subr.bf16.mxu0 %v8635_v20 }
0x1079   :  { %v3422_v48 = vadd.f32 %v7402_v7, %v3414_v47  ;;  %8638 = vmatpush3.bf16.msra.mxu0 %v8637_v24  ;;  %v8661_v7 = vpack.c.bf16 %v3633_v4, %v3632_v18 }
0x107a   :  { %3544 = vmatmul.mubr.f32.gmra.mrb[52].mxu1 %v3421_v53  ;;  %8640 = vmatprep.subr.bf16.mxu0 %v8639_v60 }
0x107b   :  { %3549 = vmatprep.mubr.f32.mxu1 %v9157_v19 }
0x107d   :  { %8642 = vmatpush3.bf16.msra.mxu0 %v8641_v3 }
0x107e   :  { %3550 = vmatmul.mubr.f32.gmra.mrb[54].mxu1 %v3422_v48  ;;  %8644 = vmatprep.subr.bf16.mxu0 %v8643_v46 }
0x107f   :  { %3939 = vmatprep.mubr.f32.mxu1 %v9157_v19 }
0x1081   :  { %8646 = vmatpush3.bf16.msra.mxu0 %v8645_v9 }
0x1082   :  { %8648 = vmatprep.subr.bf16.mxu0 %v8647_v12 }
0x1085   :  { %8650 = vmatpush3.bf16.msra.mxu0 %v8649_v17 }
0x1086   :  { %8652 = vmatprep.subr.bf16.mxu0 %v8651_v36 }
0x1089   :  { %8654 = vmatpush3.bf16.msra.mxu0 %v8653_v30 }
0x108a   :  { %8656 = vmatprep.subr.bf16.mxu0 %v8655_v34 }
0x108d   :  { %8658 = vmatpush3.bf16.msra.mxu0 %v8657_v38 }
0x108e   :  { %8660 = vmatprep.subr.bf16.mxu0 %v8659_v22 }
0x1091   :  { %8662 = vmatpush3.bf16.msra.mxu0 %v8661_v7 }
0x1092   :  { %8664 = vmatprep.subr.bf16.mxu0 %v8663_v43 }
0x1095   :  { %8666 = vmatpush3.bf16.msra.mxu0 %v8665_v45 }
0x1145   :  { %v3533_v53 = vpop.f32.mrb[48].mxu1 }
0x1146   :  { %v10268_v47 = vadd.f32 %v3533_v53, %v3460_v55  ;;  %v3535_v48 = vpop.f32.mrb[49].mxu1 }
0x1147   :  { %v3536_v41 = vadd.f32 %v3535_v48, %v3464_v56 }
0x1148   :  { %v7403_v40 = vmul.f32 -1.702, %v10268_v47 }
0x1149   :  { %v7404_v20 = vmul.f32 -1.702, %v3536_v41  ;;  %v3539_v25 = vpop.f32.mrb[50].mxu1 }
0x114a   :  { %v3572_v27 = vmul.f32 1.442695, %v7403_v40  ;;  %v10271_v24 = vadd.f32 %v3539_v25, %v3460_v55  ;;  %v3541_v58 = vpop.f32.mrb[51].mxu1 }
0x114b   :  { %v3574_v28 = vmul.f32 1.442695, %v7404_v20  ;;  %v3542_v60 = vadd.f32 %v3541_v58, %v3464_v56 }
0x114c   :  { %9013 = vpow2.f32 %v3572_v27  ;;  %v7405_v63 = vmul.f32 -1.702, %v10271_v24 }
0x114d   :  { %9015 = vpow2.f32 %v3574_v28  ;;  %v7406_v1 = vmul.f32 -1.702, %v3542_v60  ;;  %v3545_v3 = vpop.f32.mrb[52].mxu1 }
0x114e   :  { %v3576_v5 = vmul.f32 1.442695, %v7405_v63  ;;  %v3546_v6 = vadd.f32 %v3545_v3, %v3460_v55  ;;  %v3547_v46 = vpop.f32.mrb[53].mxu1 }
0x114f   :  { %v3578_v50 = vmul.f32 1.442695, %v7406_v1  ;;  %v3548_v54 = vadd.f32 %v3547_v46, %v3464_v56 }
0x1150   :  { %9017 = vpow2.f32 %v3576_v5  ;;  %v7407_v9 = vmul.f32 -1.702, %v3546_v6 }
0x1151   :  { %9019 = vpow2.f32 %v3578_v50  ;;  %v7408_v57 = vmul.f32 -1.702, %v3548_v54  ;;  %v3551_v10 = vpop.f32.mrb[54].mxu1 }
0x1152   :  { %v3580_v12 = vmul.f32 1.442695, %v7407_v9  ;;  %v3552_v14 = vadd.f32 %v3551_v10, %v3460_v55  ;;  %v3553_v16 = vpop.f32.mrb[55].mxu1 }
0x1153   :  { %v3582_v17 = vmul.f32 1.442695, %v7408_v57  ;;  %v3554_v29 = vadd.f32 %v3553_v16, %v3464_v56 }
0x1154   :  { %9021 = vpow2.f32 %v3580_v12  ;;  %v7409_v23 = vmul.f32 -1.702, %v3552_v14 }
0x1155   :  { %9023 = vpow2.f32 %v3582_v17  ;;  %v7410_v36 = vmul.f32 -1.702, %v3554_v29 }
0x1156   :  { %v9014_v51 = vpop.eup %9013  ;;  %v3584_v52 = vmul.f32 1.442695, %v7409_v23 }
0x1157   :  { %v9016_v30 = vpop.eup %9015  ;;  %v3588_v31 = vadd.f32 1.0, %v9014_v51  ;;  %v3586_v11 = vmul.f32 1.442695, %v7410_v36  ;;  %v7418_v51 = vld [vmem:[%s11202_s7 + $0x1a0] sm:$0xff] }
0x1158   :  { %v3589_v34 = vadd.f32 1.0, %v9016_v30  ;;  %9025 = vpow2.f32 %v3584_v52  ;;  %v7421_v30 = vld [vmem:[%s11202_s7 + $0x1b8] sm:$0xff] }
0x1159   :  { %9027 = vrcp.f32 %v3588_v31  ;;  %v7424_v31 = vld [vmem:[%s11202_s7 + $0x1d0] sm:$0xff] }
0x115a   :  { %v9018_v21 = vpop.eup %9017  ;;  %9029 = vrcp.f32 %v3589_v34  ;;  %v8671_v34 = vpack.c.bf16 %v7424_v31, %v7421_v30  ;;  %v7448_v30 = vld [vmem:[%s11202_s7 + $0x290] sm:$0xff] }
0x115b   :  { %v9020_v35 = vpop.eup %9019  ;;  %v3590_v38 = vadd.f32 1.0, %v9018_v21  ;;  %9031 = vpow2.f32 %v3586_v11  ;;  %v7416_v21 = vld [vmem:[%s11202_s7 + $0x190] sm:$0xff] }
0x115c   :  { %v3591_v37 = vadd.f32 1.0, %v9020_v35  ;;  %v7419_v35 = vld [vmem:[%s11202_s7 + $0x1a8] sm:$0xff]  ;;  %v7440_v31 = vld [vmem:[%s11202_s7 + $0x250] sm:$0xff] }
0x115d   :  { %9033 = vrcp.f32 %v3590_v38  ;;  %v7420_v38 = vld [vmem:[%s11202_s7 + $0x1b0] sm:$0xff] }
0x115e   :  { %v9022_v39 = vpop.eup %9021  ;;  %9035 = vrcp.f32 %v3591_v37  ;;  %v8699_v37 = vpack.c.bf16 %v7419_v35, %v7416_v21  ;;  %v7444_v21 = vld [vmem:[%s11202_s7 + $0x270] sm:$0xff]  ;;  %v7447_v35 = vld [vmem:[%s11202_s7 + $0x288] sm:$0xff] }
0x115f   :  { %v9024_v22 = vpop.eup %9023  ;;  %v3592_v18 = vadd.f32 1.0, %v9022_v39  ;;  %v7423_v39 = vld [vmem:[%s11202_s7 + $0x1c8] sm:$0xff] }
0x1160   :  { %v3593_v4 = vadd.f32 1.0, %v9024_v22  ;;  %v7427_v22 = vld [vmem:[%s11202_s7 + $0x1e8] sm:$0xff]  ;;  %8700 = vmatprep.subr.bf16.mxu0 %v8699_v37 }
0x1161   :  { %9037 = vrcp.f32 %v3592_v18  ;;  %v7430_v18 = vld [vmem:[%s11202_s7 + $0x200] sm:$0xff] }
0x1162   :  { %v9026_v7 = vpop.eup %9025  ;;  %9039 = vrcp.f32 %v3593_v4  ;;  %v8673_v4 = vpack.c.bf16 %v7423_v39, %v7420_v38  ;;  %v7451_v39 = vld [vmem:[%s11202_s7 + $0x2a8] sm:$0xff] }
0x1163   :  { %v9028_v15 = vpop.eup %9027  ;;  %v3594_v42 = vadd.f32 1.0, %v9026_v7  ;;  %v7422_v7 = vld [vmem:[%s11202_s7 + $0x1c0] sm:$0xff] }
0x1164   :  { %v9030_v43 = vpop.eup %9029  ;;  %v3612_v45 = vmul.f32 %v9028_v15, %v10268_v47  ;;  %v7425_v15 = vld [vmem:[%s11202_s7 + $0x1d8] sm:$0xff] }
0x1165   :  { %v9032_v44 = vpop.eup %9031  ;;  %v3613_v13 = vmul.f32 %v9030_v43, %v3536_v41  ;;  %9041 = vrcp.f32 %v3594_v42  ;;  %v8675_v42 = vpack.c.bf16 %v7430_v18, %v7427_v22  ;;  %v8703_v43 = vpack.c.bf16 %v7425_v15, %v7422_v7  ;;  %v7454_v22 = vld [vmem:[%s11202_s7 + $0x2c0] sm:$0xff]  ;;  %v7449_v7 = vld [vmem:[%s11202_s7 + $0x298] sm:$0xff] }
0x1166   :  { %v3595_v49 = vadd.f32 1.0, %v9032_v44  ;;  %v7426_v44 = vld [vmem:[%s11202_s7 + $0x1e0] sm:$0xff] }
0x1167   :  { %v9034_v55 = vpop.eup %9033  ;;  %3721 = vmatprep.mubr.f32.mxu0 %v3613_v13  ;;  %v7429_v13 = vld [vmem:[%s11202_s7 + $0x1f8] sm:$0xff]  ;;  %v7446_v18 = vld [vmem:[%s11202_s7 + $0x280] sm:$0xff] }
0x1168   :  { %v9036_v56 = vpop.eup %9035  ;;  %9043 = vrcp.f32 %v3595_v49  ;;  %3722 = vmatmul.mubr.f32.vlgmr.msra.gmra.mrb[40].mxu0 %v3612_v45  ;;  %v3614_v48 = vmul.f32 %v9034_v55, %v10271_v24  ;;  %v8677_v45 = vpack.c.bf16 %v7429_v13, %v7426_v44  ;;  %v7450_v15 = vld [vmem:[%s11202_s7 + $0x2a0] sm:$0xff]  ;;  %v7457_v13 = vld [vmem:[%s11202_s7 + $0x2d8] sm:$0xff] }
0x1169   :  { %v3615_v53 = vmul.f32 %v9036_v56, %v3542_v60  ;;  %v7411_v60 = vld [vmem:[%s11213_s16] ss:$0 sm:$0xff]  ;;  %8702 = vmatpush3.bf16.msra.mxu0 %v8699_v37  ;;  %v8689_v37 = vpack.c.bf16 %v7447_v35, %v7444_v21 }
0x116a   :  { %8704 = vmatprep.subr.bf16.mxu0 %v8703_v43 }
0x116b   :  { %v9038_v40 = vpop.eup %9037  ;;  %3726 = vmatprep.mubr.f32.mxu0 %v3615_v53 }
0x116c   :  { %v9040_v20 = vpop.eup %9039  ;;  %3727 = vmatmul.mubr.f32.gmra.mrb[42].mxu0 %v3614_v48  ;;  %v3616_v27 = vmul.f32 %v9038_v40, %v3546_v6 }
0x116d   :  { %v3617_v25 = vmul.f32 %v9040_v20, %v3548_v54  ;;  %8706 = vmatpush3.bf16.msra.mxu0 %v8703_v43  ;;  %v8719_v43 = vpack.c.bf16 %v7449_v7, %v7446_v18 }
0x116f   :  { %3731 = vmatprep.mubr.f32.mxu0 %v3617_v25  ;;  %v9042_v41 = vpop.eup %9041 }
0x1170   :  { %3732 = vmatmul.mubr.f32.gmra.mrb[44].mxu0 %v3616_v27  ;;  %v3618_v28 = vmul.f32 %v9042_v41, %v3552_v14 }
0x1172   :  { %v9044_v47 = vpop.eup %9043 }
0x1173   :  { %v3619_v58 = vmul.f32 %v9044_v47, %v3554_v29 }
0x1175   :  { %3736 = vmatprep.mubr.f32.mxu0 %v3619_v58 }
0x1176   :  { %3737 = vmatmul.mubr.f32.gmra.mrb[46].mxu0 %v3618_v28 }
0x123b   :  { %v7785_v63 = vpop.f32.mrb[40].mxu0 }
0x123c   :  { %v7786_v24 = vpop.f32.mrb[41].mxu0 }
0x123d   :  { %v7787_v1 = vadd.f32 %v7786_v24, %v7785_v63 }
0x123f   :  { %v3724_v3 = vadd.f32 %v7787_v1, %v7411_v60  ;;  %v7788_v5 = vpop.f32.mrb[42].mxu0  ;;  %v7433_v1 = vld [vmem:[%s11202_s7 + $0x218] sm:$0xff] }
0x1240   :  { %v7789_v46 = vpop.f32.mrb[43].mxu0 }
0x1241   :  { %v7790_v50 = vadd.f32 %v7789_v46, %v7788_v5  ;;  %v10280_v6 = vadd.f32 %v3724_v3, %v10025_v0  ;;  %v7436_v3 = vld [vmem:[%s11202_s7 + $0x230] sm:$0xff] }
0x1242   :  { %v7428_v5 = vld [vmem:[%s11202_s7 + $0x1f0] sm:$0xff]  ;;  %v8679_v46 = vpack.c.bf16 %v7436_v3, %v7433_v1 }
0x1243   :  { %v3729_v54 = vadd.f32 %v7790_v50, %v7411_v60  ;;  %v7791_v9 = vpop.f32.mrb[44].mxu0  ;;  %3748 = vadd.xlane.f32.xlu0 %v10280_v6  ;;  %v7431_v50 = vld [vmem:[%s11202_s7 + $0x208] sm:$0xff] }
0x1244   :  { %v7792_v57 = vpop.f32.mrb[45].mxu0 }
0x1245   :  { %v7793_v10 = vadd.f32 %v7792_v57, %v7791_v9  ;;  %v10284_v12 = vadd.f32 %v3729_v54, %v10022_v2  ;;  %v7415_v2 = vld [vmem:[%s11202_s7 + $0x188] sm:$0xff]  ;;  %v7432_v54 = vld [vmem:[%s11202_s7 + $0x210] sm:$0xff]  ;;  %v8707_v57 = vpack.c.bf16 %v7431_v50, %v7428_v5 }
0x1246   :  { %v8667_v52 = vpack.c.bf16 %v7418_v51, %v7415_v2  ;;  %v7435_v9 = vld [vmem:[%s11202_s7 + $0x228] sm:$0xff]  ;;  %v7438_v2 = vld [vmem:[%s11202_s7 + $0x240] sm:$0xff]  ;;  %v7441_v51 = vld [vmem:[%s11202_s7 + $0x258] sm:$0xff] }
0x1247   :  { %v3734_v14 = vadd.f32 %v7793_v10, %v7411_v60  ;;  %3750 = vadd.xlane.f32.xlu1 %v10284_v12  ;;  %v8681_v10 = vpack.c.bf16 %v7435_v9, %v7432_v54  ;;  %8708 = vmatprep.subr.bf16.mxu0 %v8707_v57 }
0x1248   :  { %8668 = vmatprep.subr.bf16.mxu1 %v8667_v52  ;;  %8710 = vmatpush3.bf16.msra.mxu0 %v8707_v57  ;;  %v8685_v52 = vpack.c.bf16 %v7441_v51, %v7438_v2 }
0x1249   :  { %v7794_v16 = vpop.f32.mrb[46].mxu0  ;;  %v10288_v17 = vadd.f32 %v3734_v14, %v10030_v8  ;;  %v7414_v8 = vld [vmem:[%s11202_s7 + $0x180] sm:$0xff]  ;;  %v7439_v14 = vld [vmem:[%s11202_s7 + $0x248] sm:$0xff] }
0x124a   :  { %v7795_v29 = vpop.f32.mrb[47].mxu0 }
0x124b   :  { %v7796_v23 = vadd.f32 %v7795_v29, %v7794_v16  ;;  %3752 = vadd.xlane.f32.xlu0 %v10288_v17  ;;  %v7442_v16 = vld [vmem:[%s11202_s7 + $0x260] sm:$0xff] }
0x124c   :  { %v7434_v29 = vld [vmem:[%s11202_s7 + $0x220] sm:$0xff] }
0x124d   :  { %v3739_v0 = vadd.f32 %v7796_v23, %v7411_v60  ;;  %v8683_v23 = vpack.c.bf16 %v7442_v16, %v7439_v14  ;;  %v7412_v14 = vld [vmem:[%s11203_s5 + $0x1] ss:$0 sm:$0xff] }
0x124f   :  { %v10292_v36 = vadd.f32 %v3739_v0, %v10034_v26  ;;  %v7417_v26 = vld [vmem:[%s11202_s7 + $0x198] sm:$0xff] }
0x1250   :  { %v8669_v11 = vpack.c.bf16 %v7417_v26, %v7414_v8  ;;  %v7437_v0 = vld [vmem:[%s11202_s7 + $0x238] sm:$0xff] }
0x1251   :  { %3754 = vadd.xlane.f32.xlu1 %v10292_v36  ;;  %v8711_v8 = vpack.c.bf16 %v7437_v0, %v7434_v29  ;;  %v7445_v26 = vld [vmem:[%s11202_s7 + $0x278] sm:$0xff] }
0x1252   :  { %8670 = vmatpush1.bf16.msra.mxu1 %v8669_v11  ;;  %v8687_v11 = vpack.c.bf16 %v7448_v30, %v7445_v26 }
0x1253   :  { %8672 = vmatprep.subr.bf16.mxu1 %v8671_v34  ;;  %8712 = vmatprep.subr.bf16.mxu0 %v8711_v8  ;;  %v7443_v34 = vld [vmem:[%s11202_s7 + $0x268] sm:$0xff] }
0x1254   :  { %8714 = vmatpush3.bf16.msra.mxu0 %v8711_v8  ;;  %v8715_v38 = vpack.c.bf16 %v7443_v34, %v7440_v31 }
0x1256   :  { %8674 = vmatpush1.bf16.msra.mxu1 %v8673_v4  ;;  %8716 = vmatprep.subr.bf16.mxu0 %v8715_v38  ;;  %v8691_v4 = vpack.c.bf16 %v7454_v22, %v7451_v39 }
0x1257   :  { %8676 = vmatprep.subr.bf16.mxu1 %v8675_v42  ;;  %v7453_v42 = vld [vmem:[%s11202_s7 + $0x2b8] sm:$0xff] }
0x1258   :  { %8718 = vmatpush3.bf16.msra.mxu0 %v8715_v38  ;;  %v8693_v44 = vpack.c.bf16 %v7453_v42, %v7450_v15 }
0x1259   :  { %8720 = vmatprep.subr.bf16.mxu0 %v8719_v43 }
0x125a   :  { %8678 = vmatpush1.bf16.msra.mxu1 %v8677_v45  ;;  %v7460_v45 = vld [vmem:[%s11202_s7 + $0x2f0] sm:$0xff] }
0x125b   :  { %8680 = vmatprep.subr.bf16.mxu1 %v8679_v46 }
0x125c   :  { %8722 = vmatpush3.bf16.msra.mxu0 %v8719_v43 }
0x125e   :  { %8682 = vmatpush1.bf16.msra.mxu1 %v8681_v10 }
0x125f   :  { %8684 = vmatprep.subr.bf16.mxu1 %v8683_v23  ;;  %v7413_v23 = vld [vmem:[%s11204_s6 + $0x1] ss:$0 sm:$0xff] }
0x1262   :  { %8686 = vmatpush1.bf16.msra.mxu1 %v8685_v52 }
0x1263   :  { %8688 = vmatprep.subr.bf16.mxu1 %v8687_v11 }
0x1266   :  { %8690 = vmatpush1.bf16.msra.mxu1 %v8689_v37 }
0x1267   :  { %8692 = vmatprep.subr.bf16.mxu1 %v8691_v4 }
0x126a   :  { %8694 = vmatpush1.bf16.msra.mxu1 %v8693_v44 }
0x12d0   :  { %v3749_v49 = vpop.xlane.xlu0 %3748 }
0x12d1   :  { %v3756_v55 = vmul.f32 0.0078125, %v3749_v49  ;;  %v7452_v49 = vld [vmem:[%s11202_s7 + $0x2b0] sm:$0xff] }
0x12d3   :  { %v10344_v56 = vsub.f32 %v10280_v6, %v3756_v55  ;;  %v8695_v55 = vpack.c.bf16 %v7460_v45, %v7457_v13 }
0x12d4   :  { %v3751_v53 = vpop.xlane.xlu1 %3750 }
0x12d5   :  { %v3757_v48 = vmul.f32 0.0078125, %v3751_v53  ;;  %v3764_v40 = vmul.f32 %v10344_v56, %v10344_v56  ;;  %v7455_v53 = vld [vmem:[%s11202_s7 + $0x2c8] sm:$0xff]  ;;  %8696 = vmatprep.subr.bf16.mxu1 %v8695_v55 }
0x12d7   :  { %v10349_v20 = vsub.f32 %v10284_v12, %v3757_v48  ;;  %3768 = vadd.xlane.f32.xlu0 %v3764_v40  ;;  %v7456_v48 = vld [vmem:[%s11202_s7 + $0x2d0] sm:$0xff]  ;;  %v7459_v40 = vld [vmem:[%s11202_s7 + $0x2e8] sm:$0xff] }
0x12d8   :  { %v3753_v25 = vpop.xlane.xlu0 %3752 }
0x12d9   :  { %v3758_v27 = vmul.f32 0.0078125, %v3753_v25  ;;  %v3765_v41 = vmul.f32 %v10349_v20, %v10349_v20  ;;  %v8723_v25 = vpack.c.bf16 %v7455_v53, %v7452_v49 }
0x12db   :  { %v10354_v47 = vsub.f32 %v10288_v17, %v3758_v27  ;;  %3770 = vadd.xlane.f32.xlu1 %v3765_v41  ;;  %v8697_v27 = vpack.c.bf16 %v7459_v40, %v7456_v48  ;;  %8724 = vmatprep.subr.bf16.mxu0 %v8723_v25  ;;  %v7458_v41 = vld [vmem:[%s11202_s7 + $0x2e0] sm:$0xff] }
0x12dc   :  { %8726 = vmatpush3.bf16.msra.mxu0 %v8723_v25 }
0x12dd   :  { %v3766_v58 = vmul.f32 %v10354_v47, %v10354_v47  ;;  %8698 = vmatpush1.bf16.msra.mxu1 %v8697_v27 }
0x12de   :  { %v3755_v28 = vpop.xlane.xlu1 %3754  ;;  %8239 = vmatprep.subr.mxu1 %v9157_v19 }
0x12df   :  { %v3759_v63 = vmul.f32 0.0078125, %v3755_v28  ;;  %3772 = vadd.xlane.f32.xlu0 %v3766_v58  ;;  %v7461_v58 = vld [vmem:[%s11202_s7 + $0x2f8] sm:$0xff] }
0x12e0   :  { %v8727_v28 = vpack.c.bf16 %v7461_v58, %v7458_v41 }
0x12e1   :  { %v10359_v60 = vsub.f32 %v10292_v36, %v3759_v63 }
0x12e2   :  { %8728 = vmatprep.subr.bf16.mxu0 %v8727_v28 }
0x12e3   :  { %v3767_v24 = vmul.f32 %v10359_v60, %v10359_v60  ;;  %8730 = vmatpush3.bf16.msra.mxu0 %v8727_v28 }
0x12e4   :  { %8269 = vmatprep.subr.mxu0 %v9157_v19 }
0x12e5   :  { %3774 = vadd.xlane.f32.xlu1 %v3767_v24 }
0x1364   :  { %v3769_v63 = vpop.xlane.xlu0 %3768 }
0x1365   :  { %v3776_v24 = vmul.f32 0.0078125, %v3769_v63 }
0x1367   :  { %v3780_v1 = vadd.f32 1e-05, %v3776_v24 }
0x1368   :  { %v3771_v3 = vpop.xlane.xlu1 %3770 }
0x1369   :  { %9045 = vrsqrt.f32 %v3780_v1  ;;  %v3777_v5 = vmul.f32 0.0078125, %v3771_v3 }
0x136b   :  { %v3781_v46 = vadd.f32 1e-05, %v3777_v5 }
0x136c   :  { %v3773_v50 = vpop.xlane.xlu0 %3772 }
0x136d   :  { %9047 = vrsqrt.f32 %v3781_v46  ;;  %v3778_v54 = vmul.f32 0.0078125, %v3773_v50 }
0x136f   :  { %v3782_v9 = vadd.f32 1e-05, %v3778_v54 }
0x1371   :  { %9049 = vrsqrt.f32 %v3782_v9 }
0x1372   :  { %v3775_v57 = vpop.xlane.xlu1 %3774 }
0x1373   :  { %v9046_v10 = vpop.eup %9045  ;;  %v3779_v16 = vmul.f32 0.0078125, %v3775_v57 }
0x1374   :  { %v3788_v29 = vmul.f32 %v9046_v10, %v10344_v56 }
0x1375   :  { %v3783_v0 = vadd.f32 1e-05, %v3779_v16 }
0x1376   :  { %v3796_v2 = vmul.f32 %v7412_v14, %v3788_v29 }
0x1377   :  { %v9048_v51 = vpop.eup %9047  ;;  %9051 = vrsqrt.f32 %v3783_v0 }
0x1378   :  { %v3804_v8 = vadd.f32 %v7413_v23, %v3796_v2  ;;  %v3789_v52 = vmul.f32 %v9048_v51, %v10349_v20 }
0x137a   :  { %3940 = vmatmul.mubr.f32.vlgmr.msra.gmra.mrb[56].mxu1 %v3804_v8  ;;  %8233 = vmatprep.mubr.f32.mxu0 %v3804_v8  ;;  %v3797_v26 = vmul.f32 %v7412_v14, %v3789_v52 }
0x137b   :  { %v9050_v30 = vpop.eup %9049  ;;  %3945 = vmatprep.mubr.f32.mxu1 %v9157_v19 }
0x137c   :  { %v3805_v31 = vadd.f32 %v7413_v23, %v3797_v26  ;;  %v3790_v56 = vmul.f32 %v9050_v30, %v10354_v47  ;;  %v7462_v47 = vld [vmem:[%s11205_s8 + $0x1] ss:$2 sm:$0x7] }
0x137d   :  { %v3867_v37 = vrot.slane %v7462_v47, %v9600_v32  ;;  %v3871_v18 = vrot.slane %v7462_v47, %v384_v62 }
0x137e   :  { %3946 = vmatmul.mubr.f32.gmra.mrb[58].mxu1 %v3805_v31  ;;  %8234 = vmatmul.mubr.f32.vlgmr.msra.gmra.mrb[48].mxu0 %v3805_v31  ;;  %v3798_v11 = vmul.f32 %v7412_v14, %v3790_v56 }
0x137f   :  { %3951 = vmatprep.mubr.f32.mxu1 %v9157_v19 }
0x1380   :  { %v3806_v34 = vadd.f32 %v7413_v23, %v3798_v11 }
0x1381   :  { %v9052_v21 = vpop.eup %9051 }
0x1382   :  { %3952 = vmatmul.mubr.f32.gmra.mrb[60].mxu1 %v3806_v34  ;;  %8236 = vmatprep.mubr.f32.mxu0 %v3806_v34  ;;  %v3791_v20 = vmul.f32 %v9052_v21, %v10359_v60  ;;  %v3863_v60 = vrot.slane %v7462_v47, %v9606_v61 }
0x1383   :  { %3957 = vmatprep.mubr.f32.mxu1 %v9157_v19 }
0x1384   :  { %v3799_v35 = vmul.f32 %v7412_v14, %v3791_v20 }
0x1386   :  { %v3807_v38 = vadd.f32 %v7413_v23, %v3799_v35 }
0x1388   :  { %3958 = vmatmul.mubr.f32.gmra.mrb[62].mxu1 %v3807_v38  ;;  %8237 = vmatmul.mubr.f32.gmra.mrb[50].mxu0 %v3807_v38 }
0x1389   :  { %8241 = vmatprep.mubr.msk.f32.mxu1 %vm9158_vm0, %v9157_v19  ;;  %8271 = vmatprep.mubr.msk.f32.mxu0 %vm9158_vm0, %v9157_v19 }
0x144d   :  { %v3941_v39 = vpop.f32.mrb[56].mxu1 }
0x144e   :  { %v3943_v22 = vpop.f32.mrb[57].mxu1  ;;  %v10489_v42 = vadd.f32 %v3941_v39, %v3863_v60 }
0x144f   :  { %v10485_v4 = vadd.f32 %v3943_v22, %v3867_v37 }
0x1451   :  { %v3947_v7 = vpop.f32.mrb[58].mxu1  ;;  %v8235_v15 = vpop.f32.mrb[48].mxu0  ;;  %8240 = vmatpush3.xpose.msk.msra.mxu1 %vm563_vm1, %v10485_v4 }
0x1452   :  { %v10491_v43 = vadd.f32 %v8235_v15, %v3871_v18  ;;  %v3949_v44 = vpop.f32.mrb[59].mxu1  ;;  %v4030_v13 = vpop.f32.mrb[49].mxu0  ;;  %8244 = vmatprep.subr.mxu1 %v9157_v19  ;;  %v10502_v62 = vadd.f32 %v3947_v7, %v3863_v60 }
0x1453   :  { %v10494_v45 = vadd.f32 %v3949_v44, %v3867_v37  ;;  %v10533_v24 = vadd.f32 %v4030_v13, %v3871_v18 }
0x1454   :  { %8242 = vmatmul.mubr.msk.f32.vlgmr.msra.gmra.mrb[64].mxu1 %vm563_vm1, %v10489_v42 }
0x1455   :  { %v3953_v59 = vpop.f32.mrb[60].mxu1  ;;  %8245 = vmatpush3.xpose.msk.msra.mxu1 %vm563_vm1, %v10494_v45  ;;  %8246 = vmatprep.mubr.msk.f32.mxu1 %vm9158_vm0, %v9157_v19 }
0x1456   :  { %v3955_v49 = vpop.f32.mrb[61].mxu1  ;;  %8249 = vmatprep.subr.mxu1 %v9157_v19  ;;  %v10513_v53 = vadd.f32 %v3953_v59, %v3863_v60 }
0x1457   :  { %v10505_v55 = vadd.f32 %v3955_v49, %v3867_v37 }
0x1458   :  { %8247 = vmatmul.mubr.msk.f32.vlgmr.msra.gmra.mrb[66].mxu1 %vm563_vm1, %v10502_v62 }
0x1459   :  { %8250 = vmatpush3.xpose.msk.msra.mxu1 %vm563_vm1, %v10505_v55  ;;  %8251 = vmatprep.mubr.msk.f32.mxu1 %vm9158_vm0, %v9157_v19 }
0x145a   :  { %8254 = vmatprep.subr.mxu1 %v9157_v19 }
0x145b   :  { %v3959_v48 = vpop.f32.mrb[62].mxu1  ;;  %v8238_v40 = vpop.f32.mrb[50].mxu0 }
0x145c   :  { %v10516_v25 = vadd.f32 %v8238_v40, %v3871_v18  ;;  %v3961_v27 = vpop.f32.mrb[63].mxu1  ;;  %v4040_v41 = vpop.f32.mrb[51].mxu0  ;;  %8252 = vmatmul.mubr.msk.f32.vlgmr.msra.gmra.mrb[68].mxu1 %vm563_vm1, %v10513_v53  ;;  %v10529_v63 = vadd.f32 %v3959_v48, %v3863_v60 }
0x145d   :  { %v10520_v58 = vadd.f32 %v3961_v27, %v3867_v37  ;;  %v10522_v28 = vadd.f32 %v4040_v41, %v3871_v18  ;;  %8256 = vmatprep.mubr.msk.f32.mxu1 %vm9158_vm0, %v9157_v19 }
0x145f   :  { %8255 = vmatpush3.xpose.msk.msra.mxu1 %vm563_vm1, %v10520_v58  ;;  %8270 = vmatpush3.msra.mxu0 %v10522_v28 }
0x1460   :  { %8259 = vmatprep.subr.mxu1 %v9157_v19  ;;  %8279 = vmatprep.subr.mxu0 %v9157_v19 }
0x1462   :  { %8257 = vmatmul.mubr.msk.f32.vlgmr.msra.gmra.mrb[70].mxu1 %vm563_vm1, %v10529_v63 }
0x1463   :  { %8260 = vmatpush3.msra.mxu1 %v10533_v24  ;;  %8261 = vmatprep.mubr.msk.f32.mxu1 %vm9158_vm0, %v9157_v19 }
0x1464   :  { %8264 = vmatprep.subr.mxu1 %v9157_v19 }
0x1527   :  { %v4121_v1 = vpop.f32.mrb[64].mxu1 }
0x1528   :  { %v4122_v3 = vadd.f32 %v4121_v1, %v9667_v33  ;;  %v8243_v5 = vpop.f32.mrb[65].mxu1 }
0x152a   :  { %v4353_v46 = vsel %vm868_vm3, %v4122_v3, -inf }
0x152b   :  { %4354 = vmax.xlane.f32.xlu0 %v4353_v46  ;;  %v4197_v50 = vpop.f32.mrb[66].mxu1 }
0x152c   :  { %v4198_v54 = vadd.f32 %v4197_v50, %v9667_v33  ;;  %v8248_v9 = vpop.f32.mrb[67].mxu1 }
0x152e   :  { %v4356_v57 = vsel %vm868_vm3, %v4198_v54, -inf }
0x152f   :  { %4357 = vmax.xlane.f32.xlu1 %v4356_v57  ;;  %v4273_v10 = vpop.f32.mrb[68].mxu1 }
0x1530   :  { %v4274_v14 = vadd.f32 %v4273_v10, %v9667_v33  ;;  %v8253_v16 = vpop.f32.mrb[69].mxu1 }
0x1532   :  { %v4359_v29 = vsel %vm868_vm3, %v4274_v14, -inf }
0x1533   :  { %4360 = vmax.xlane.f32.xlu0 %v4359_v29 }
0x1535   :  { %v4349_v23 = vpop.f32.mrb[70].mxu1 }
0x1536   :  { %v4350_v0 = vadd.f32 %v4349_v23, %v9667_v33  ;;  %v8258_v2 = vpop.f32.mrb[71].mxu1 }
0x1538   :  { %v4362_v51 = vsel %vm868_vm3, %v4350_v0, -inf }
0x1539   :  { %4363 = vmax.xlane.f32.xlu1 %v4362_v51 }
0x15b8   :  { %v4355_v8 = vpop.xlane.xlu0 %4354 }
0x15b9   :  { %v4365_v52 = vsub.f32 %v4122_v3, %v4355_v8 }
0x15bb   :  { %v4369_v26 = vmul.f32 1.442695, %v4365_v52 }
0x15bc   :  { %v4358_v30 = vpop.xlane.xlu1 %4357 }
0x15bd   :  { %9053 = vpow2.f32 %v4369_v26  ;;  %v4366_v31 = vsub.f32 %v4198_v54, %v4358_v30 }
0x15bf   :  { %v4371_v56 = vmul.f32 1.442695, %v4366_v31 }
0x15c0   :  { %v4361_v11 = vpop.xlane.xlu0 %4360 }
0x15c1   :  { %9055 = vpow2.f32 %v4371_v56  ;;  %v4367_v34 = vsub.f32 %v4274_v14, %v4361_v11 }
0x15c3   :  { %v4373_v21 = vmul.f32 1.442695, %v4367_v34 }
0x15c5   :  { %9057 = vpow2.f32 %v4373_v21 }
0x15c6   :  { %v4364_v60 = vpop.xlane.xlu1 %4363 }
0x15c7   :  { %v9054_v20 = vpop.eup %9053  ;;  %v4368_v22 = vsub.f32 %v4350_v0, %v4364_v60 }
0x15c8   :  { %v4377_v35 = vsel %vm868_vm3, %v9054_v20, 0.0 }
0x15c9   :  { %4378 = vadd.xlane.f32.xlu0 %v4377_v35  ;;  %v4375_v18 = vmul.f32 1.442695, %v4368_v22 }
0x15cb   :  { %v9056_v38 = vpop.eup %9055  ;;  %9059 = vpow2.f32 %v4375_v18 }
0x15cc   :  { %v4380_v47 = vsel %vm868_vm3, %v9056_v38, 0.0 }
0x15cd   :  { %4381 = vadd.xlane.f32.xlu1 %v4380_v47 }
0x15cf   :  { %v9058_v37 = vpop.eup %9057 }
0x15d0   :  { %v4383_v39 = vsel %vm868_vm3, %v9058_v37, 0.0 }
0x15d1   :  { %4384 = vadd.xlane.f32.xlu0 %v4383_v39 }
0x15d5   :  { %v9060_v7 = vpop.eup %9059 }
0x15d6   :  { %v4386_v15 = vsel %vm868_vm3, %v9060_v7, 0.0 }
0x15de   :  { %4769 = vrot.lane.b32.xlu1 %v10494_v45, %s9160_s0 }
0x15e2   :  { %4689 = vrot.lane.b32.xlu1 %v10489_v42, %s9160_s0 }
0x15e6   :  { %4767 = vrot.lane.b32.xlu1 %v10502_v62, %s9160_s0 }
0x15e7   :  { %4691 = vrot.lane.b32.xlu0 %v10485_v4, %s9160_s0 }
0x15eb   :  { %4847 = vrot.lane.b32.xlu0 %v10505_v55, %s9160_s0 }
0x15ef   :  { %4845 = vrot.lane.b32.xlu0 %v10513_v53, %s9160_s0 }
0x160a   :  { %4387 = vadd.xlane.f32.xlu1 %v4386_v15 }
0x161b   :  { %4925 = vrot.lane.b32.xlu1 %v10520_v58, %s9160_s0 }
0x161f   :  { %4923 = vrot.lane.b32.xlu1 %v10529_v63, %s9160_s0 }
0x1656   :  { %v4379_v44 = vpop.xlane.xlu0 %4378 }
0x1657   :  { %9061 = vrcp.f32 %v4379_v44 }
0x165a   :  { %v4382_v13 = vpop.xlane.xlu1 %4381 }
0x165b   :  { %9063 = vrcp.f32 %v4382_v13 }
0x165e   :  { %v4385_v59 = vpop.xlane.xlu0 %4384  ;;  %v4770_v3 = vpop.permute.xlu1 %4769 }
0x165f   :  { %9065 = vrcp.f32 %v4385_v59 }
0x1661   :  { %v9062_v49 = vpop.eup %9061 }
0x1662   :  { %v4393_v48 = vmul.f32 %v9062_v49, %v9054_v20  ;;  %v4692_v41 = vpop.permute.xlu0 %4691  ;;  %v4690_v50 = vpop.permute.xlu1 %4689 }
0x1664   :  { %8262 = vmatmul.mubr.msk.f32.vlgmr.msra.gmra.mrb[72].mxu1 %vm868_vm3, %v4393_v48 }
0x1665   :  { %v9064_v40 = vpop.eup %9063  ;;  %8265 = vmatpush3.msra.mxu1 %v10491_v43  ;;  %8266 = vmatprep.mubr.msk.f32.mxu1 %vm9158_vm0, %v9157_v19 }
0x1666   :  { %v4394_v27 = vmul.f32 %v9064_v40, %v9056_v38  ;;  %8274 = vmatprep.subr.mxu1 %v9157_v19  ;;  %v4848_v46 = vpop.permute.xlu0 %4847  ;;  %v4768_v9 = vpop.permute.xlu1 %4767 }
0x1668   :  { %8267 = vmatmul.mubr.msk.f32.vlgmr.msra.gmra.mrb[74].mxu1 %vm868_vm3, %v4394_v27 }
0x1669   :  { %v9066_v1 = vpop.eup %9065  ;;  %8275 = vmatpush3.msra.mxu1 %v10516_v25  ;;  %8276 = vmatprep.mubr.msk.f32.mxu1 %vm9158_vm0, %v9157_v19 }
0x166a   :  { %v4395_v5 = vmul.f32 %v9066_v1, %v9058_v37  ;;  %8284 = vmatprep.subr.mxu1 %v9157_v19  ;;  %v4846_v54 = vpop.permute.xlu0 %4845 }
0x166c   :  { %8272 = vmatmul.mubr.msk.f32.vlgmr.msra.gmra.mrb[52].mxu0 %vm868_vm3, %v4395_v5 }
0x166d   :  { %8280 = vmatpush3.xpose.msk.msra.mxu0 %vm563_vm1, %v4692_v41  ;;  %8281 = vmatprep.mubr.msk.f32.mxu0 %vm9158_vm0, %v9157_v19 }
0x166e   :  { %8289 = vmatprep.subr.mxu0 %v9157_v19 }
0x1670   :  { %8282 = vmatmul.mubr.msk.f32.vlgmr.msra.gmra.mrb[54].mxu0 %vm563_vm1, %v4690_v50 }
0x1671   :  { %8290 = vmatpush3.xpose.msk.msra.mxu0 %vm563_vm1, %v4848_v46  ;;  %8291 = vmatprep.mubr.msk.f32.mxu0 %vm9158_vm0, %v9157_v19 }
0x1672   :  { %8299 = vmatprep.subr.mxu0 %v9157_v19 }
0x1674   :  { %8292 = vmatmul.mubr.msk.f32.vlgmr.msra.gmra.mrb[56].mxu0 %vm563_vm1, %v4846_v54 }
0x1675   :  { %8301 = vmatprep.mubr.msk.f32.mxu0 %vm9158_vm0, %v9157_v19 }
0x1697   :  { %v4388_v57 = vpop.xlane.xlu1 %4387 }
0x1698   :  { %9067 = vrcp.f32 %v4388_v57 }
0x169b   :  { %v4926_v16 = vpop.permute.xlu1 %4925 }
0x169f   :  { %v4924_v29 = vpop.permute.xlu1 %4923 }
0x16a2   :  { %v9068_v10 = vpop.eup %9067 }
0x16a3   :  { %v4396_v14 = vmul.f32 %v9068_v10, %v9060_v7 }
0x16a5   :  { %8277 = vmatmul.mubr.msk.f32.vlgmr.msra.gmra.mrb[76].mxu1 %vm868_vm3, %v4396_v14 }
0x16a6   :  { %8285 = vmatpush3.xpose.msk.msra.mxu1 %vm563_vm1, %v4770_v3  ;;  %8286 = vmatprep.mubr.msk.f32.mxu1 %vm9158_vm0, %v9157_v19 }
0x16a7   :  { %8294 = vmatprep.subr.mxu1 %v9157_v19 }
0x16a9   :  { %8287 = vmatmul.mubr.msk.f32.vlgmr.msra.gmra.mrb[78].mxu1 %vm563_vm1, %v4768_v9 }
0x16aa   :  { %8295 = vmatpush3.xpose.msk.msra.mxu1 %vm563_vm1, %v4926_v16  ;;  %8296 = vmatprep.mubr.msk.f32.mxu1 %vm9158_vm0, %v9157_v19 }
0x16ab   :  { %8304 = vmatprep.subr.mxu1 %v9157_v19 }
0x16ad   :  { %8297 = vmatmul.mubr.msk.f32.vlgmr.msra.gmra.mrb[80].mxu1 %vm563_vm1, %v4924_v29 }
0x16ae   :  { %8306 = vmatprep.mubr.msk.f32.mxu1 %vm9158_vm0, %v9157_v19 }
0x1737   :  { %v10605_v23 = vpop.f32.mrb[72].mxu1 }
0x1738   :  { %v8263_v0 = vpop.f32.mrb[73].mxu1 }
0x173b   :  { %v10607_v2 = vpop.f32.mrb[74].mxu1 }
0x173c   :  { %v8268_v51 = vpop.f32.mrb[75].mxu1 }
0x173f   :  { %v10609_v8 = vpop.f32.mrb[52].mxu0 }
0x1740   :  { %v8273_v52 = vpop.f32.mrb[53].mxu0 }
0x1743   :  { %v4763_v26 = vpop.f32.mrb[54].mxu0 }
0x1744   :  { %v4764_v30 = vadd.f32 %v4763_v26, %v9667_v33  ;;  %v8283_v31 = vpop.f32.mrb[55].mxu0 }
0x1746   :  { %v5001_v56 = vsel %vm868_vm3, %v4764_v30, -inf }
0x1747   :  { %5002 = vmax.xlane.f32.xlu0 %v5001_v56  ;;  %v4919_v11 = vpop.f32.mrb[56].mxu0 }
0x1748   :  { %v4920_v34 = vadd.f32 %v4919_v11, %v9667_v33  ;;  %v8293_v21 = vpop.f32.mrb[57].mxu0 }
0x174a   :  { %v5007_v20 = vsel %vm868_vm3, %v4920_v34, -inf }
0x174b   :  { %5008 = vmax.xlane.f32.xlu0 %v5007_v20 }
0x1778   :  { %v10615_v35 = vpop.f32.mrb[76].mxu1 }
0x1779   :  { %v8278_v38 = vpop.f32.mrb[77].mxu1 }
0x177c   :  { %v4841_v47 = vpop.f32.mrb[78].mxu1 }
0x177d   :  { %v4842_v37 = vadd.f32 %v4841_v47, %v9667_v33  ;;  %v8288_v39 = vpop.f32.mrb[79].mxu1 }
0x177f   :  { %v5004_v60 = vsel %vm868_vm3, %v4842_v37, -inf }
0x1780   :  { %5005 = vmax.xlane.f32.xlu1 %v5004_v60  ;;  %v4997_v22 = vpop.f32.mrb[80].mxu1 }
0x1781   :  { %v4998_v18 = vadd.f32 %v4997_v22, %v9667_v33  ;;  %v8298_v7 = vpop.f32.mrb[81].mxu1 }
0x1783   :  { %v5010_v15 = vsel %vm868_vm3, %v4998_v18, -inf }
0x1784   :  { %5011 = vmax.xlane.f32.xlu0 %v5010_v15 }
0x1791   :  { %5123 = vrot.lane.b32.xlu1 %v10491_v43, %s9160_s0 }
0x1795   :  { %5200 = vrot.lane.b32.xlu1 %v10522_v28, %s9160_s0 }
0x1799   :  { %5277 = vrot.lane.b32.xlu1 %v10516_v25, %s9160_s0 }
0x179a   :  { %5046 = vrot.lane.b32.xlu0 %v10533_v24, %s9160_s0 }
0x179d   :  { %5433 = vrot.lane.b32.xlu1 %v10494_v45, %s9161_s26 }
0x179e   :  { %5355 = vrot.lane.b32.xlu0 %v10485_v4, %s9161_s26 }
0x17d4   :  { %v5003_v44 = vpop.xlane.xlu0 %5002 }
0x17d5   :  { %v5013_v13 = vsub.f32 %v4764_v30, %v5003_v44 }
0x17d7   :  { %v5017_v59 = vmul.f32 1.442695, %v5013_v13 }
0x17d8   :  { %v5009_v49 = vpop.xlane.xlu0 %5008 }
0x17d9   :  { %9069 = vpow2.f32 %v5017_v59  ;;  %v5015_v48 = vsub.f32 %v4920_v34, %v5009_v49 }
0x17db   :  { %v5021_v40 = vmul.f32 1.442695, %v5015_v48 }
0x17dd   :  { %9071 = vpow2.f32 %v5021_v40 }
0x17e3   :  { %v9070_v27 = vpop.eup %9069 }
0x17e4   :  { %v5025_v41 = vsel %vm868_vm3, %v9070_v27, 0.0 }
0x17e5   :  { %5026 = vadd.xlane.f32.xlu0 %v5025_v41 }
0x17e7   :  { %v9072_v1 = vpop.eup %9071 }
0x17e8   :  { %v5031_v3 = vsel %vm868_vm3, %v9072_v1, 0.0 }
0x17e9   :  { %5032 = vadd.xlane.f32.xlu0 %v5031_v3 }
0x17ff   :  { %5353 = vrot.lane.b32.xlu0 %v10489_v42, %s9161_s26 }
0x1803   :  { %5511 = vrot.lane.b32.xlu0 %v10505_v55, %s9161_s26 }
0x1807   :  { %5509 = vrot.lane.b32.xlu0 %v10513_v53, %s9161_s26 }
0x180d   :  { %v5006_v5 = vpop.xlane.xlu1 %5005 }
0x180e   :  { %v5014_v46 = vsub.f32 %v4842_v37, %v5006_v5 }
0x1810   :  { %v5019_v50 = vmul.f32 1.442695, %v5014_v46 }
0x1811   :  { %v5124_v54 = vpop.permute.xlu1 %5123  ;;  %v5012_v9 = vpop.xlane.xlu0 %5011 }
0x1812   :  { %9073 = vpow2.f32 %v5019_v50  ;;  %8305 = vmatpush3.msra.mxu1 %v5124_v54  ;;  %v5016_v16 = vsub.f32 %v4998_v18, %v5012_v9 }
0x1813   :  { %8314 = vmatprep.subr.mxu1 %v9157_v19 }
0x1814   :  { %v5023_v29 = vmul.f32 1.442695, %v5016_v16 }
0x1815   :  { %v5047_v57 = vpop.permute.xlu0 %5046  ;;  %v5201_v11 = vpop.permute.xlu1 %5200 }
0x1816   :  { %8300 = vmatpush3.msra.mxu0 %v5047_v57  ;;  %9075 = vpow2.f32 %v5023_v29 }
0x1817   :  { %8309 = vmatprep.subr.mxu0 %v9157_v19 }
0x1819   :  { %v5356_v52 = vpop.permute.xlu0 %5355  ;;  %v5278_v37 = vpop.permute.xlu1 %5277 }
0x181c   :  { %v9074_v10 = vpop.eup %9073 }
0x181d   :  { %v5028_v14 = vsel %vm868_vm3, %v9074_v10, 0.0  ;;  %v5434_v39 = vpop.permute.xlu1 %5433 }
0x181e   :  { %5029 = vadd.xlane.f32.xlu1 %v5028_v14 }
0x1820   :  { %v9076_v0 = vpop.eup %9075 }
0x1821   :  { %v5034_v51 = vsel %vm868_vm3, %v9076_v0, 0.0 }
0x182f   :  { %5431 = vrot.lane.b32.xlu1 %v10502_v62, %s9161_s26 }
0x1853   :  { %5035 = vadd.xlane.f32.xlu1 %v5034_v51 }
0x1864   :  { %5589 = vrot.lane.b32.xlu1 %v10520_v58, %s9161_s26 }
0x1868   :  { %5587 = vrot.lane.b32.xlu1 %v10529_v63, %s9161_s26 }
0x1872   :  { %v5027_v26 = vpop.xlane.xlu0 %5026 }
0x1873   :  { %9077 = vrcp.f32 %v5027_v26 }
0x1876   :  { %v5033_v30 = vpop.xlane.xlu0 %5032 }
0x1877   :  { %9079 = vrcp.f32 %v5033_v30 }
0x187a   :  { %v5354_v20 = vpop.permute.xlu0 %5353 }
0x187d   :  { %v9078_v31 = vpop.eup %9077 }
0x187e   :  { %v5041_v56 = vmul.f32 %v9078_v31, %v9070_v27  ;;  %v5512_v38 = vpop.permute.xlu0 %5511 }
0x1880   :  { %8302 = vmatmul.mubr.msk.f32.vlgmr.msra.gmra.mrb[58].mxu0 %vm868_vm3, %v5041_v56 }
0x1881   :  { %v9080_v34 = vpop.eup %9079  ;;  %8310 = vmatpush3.msra.mxu0 %v5201_v11  ;;  %8311 = vmatprep.mubr.msk.f32.mxu0 %vm9158_vm0, %v9157_v19 }
0x1882   :  { %v5043_v21 = vmul.f32 %v9080_v34, %v9072_v1  ;;  %8319 = vmatprep.subr.mxu0 %v9157_v19  ;;  %v5510_v47 = vpop.permute.xlu0 %5509 }
0x1884   :  { %8312 = vmatmul.mubr.msk.f32.vlgmr.msra.gmra.mrb[60].mxu0 %vm868_vm3, %v5043_v21 }
0x1885   :  { %8321 = vmatprep.mubr.msk.f32.mxu0 %vm9158_vm0, %v9157_v19 }
0x1888   :  { %8320 = vmatpush3.xpose.msk.msra.mxu0 %vm563_vm1, %v5356_v52 }
0x1889   :  { %8329 = vmatprep.subr.mxu0 %v9157_v19 }
0x188b   :  { %8322 = vmatmul.mubr.msk.f32.vlgmr.msra.gmra.mrb[62].mxu0 %vm563_vm1, %v5354_v20 }
0x188c   :  { %8330 = vmatpush3.xpose.msk.msra.mxu0 %vm563_vm1, %v5512_v38  ;;  %8331 = vmatprep.mubr.msk.f32.mxu0 %vm9158_vm0, %v9157_v19 }
0x188d   :  { %8339 = vmatprep.subr.mxu0 %v9157_v19 }
0x188f   :  { %8332 = vmatmul.mubr.msk.f32.vlgmr.msra.gmra.mrb[64].mxu0 %vm563_vm1, %v5510_v47 }
0x1890   :  { %8341 = vmatprep.mubr.msk.f32.mxu0 %vm9158_vm0, %v9157_v19 }
0x18ab   :  { %v5030_v60 = vpop.xlane.xlu1 %5029 }
0x18ac   :  { %9081 = vrcp.f32 %v5030_v60 }
0x18af   :  { %v5432_v7 = vpop.permute.xlu1 %5431 }
0x18b6   :  { %v9082_v22 = vpop.eup %9081 }
0x18b7   :  { %v5042_v18 = vmul.f32 %v9082_v22, %v9074_v10 }
0x18b9   :  { %8307 = vmatmul.mubr.msk.f32.vlgmr.msra.gmra.mrb[82].mxu1 %vm868_vm3, %v5042_v18 }
0x18ba   :  { %8315 = vmatpush3.msra.mxu1 %v5278_v37  ;;  %8316 = vmatprep.mubr.msk.f32.mxu1 %vm9158_vm0, %v9157_v19 }
0x18bb   :  { %8324 = vmatprep.subr.mxu1 %v9157_v19 }
0x18e0   :  { %v5036_v15 = vpop.xlane.xlu1 %5035 }
0x18e1   :  { %9083 = vrcp.f32 %v5036_v15 }
0x18e4   :  { %v5590_v59 = vpop.permute.xlu1 %5589 }
0x18e8   :  { %v5588_v49 = vpop.permute.xlu1 %5587 }
0x18eb   :  { %v9084_v44 = vpop.eup %9083 }
0x18ec   :  { %v5044_v13 = vmul.f32 %v9084_v44, %v9076_v0 }
0x18ee   :  { %8317 = vmatmul.mubr.msk.f32.vlgmr.msra.gmra.mrb[84].mxu1 %vm868_vm3, %v5044_v13 }
0x18ef   :  { %8325 = vmatpush3.xpose.msk.msra.mxu1 %vm563_vm1, %v5434_v39  ;;  %8326 = vmatprep.mubr.msk.f32.mxu1 %vm9158_vm0, %v9157_v19 }
0x18f0   :  { %8334 = vmatprep.subr.mxu1 %v9157_v19 }
0x18f2   :  { %8327 = vmatmul.mubr.msk.f32.vlgmr.msra.gmra.mrb[86].mxu1 %vm563_vm1, %v5432_v7 }
0x18f3   :  { %8335 = vmatpush3.xpose.msk.msra.mxu1 %vm563_vm1, %v5590_v59  ;;  %8336 = vmatprep.mubr.msk.f32.mxu1 %vm9158_vm0, %v9157_v19 }
0x18f4   :  { %8344 = vmatprep.subr.mxu1 %v9157_v19 }
0x18f6   :  { %8337 = vmatmul.mubr.msk.f32.vlgmr.msra.gmra.mrb[88].mxu1 %vm563_vm1, %v5588_v49 }
0x18f7   :  { %8346 = vmatprep.mubr.msk.f32.mxu1 %vm9158_vm0, %v9157_v19 }
0x1953   :  { %v10685_v48 = vpop.f32.mrb[58].mxu0 }
0x1954   :  { %v8303_v40 = vpop.f32.mrb[59].mxu0 }
0x1957   :  { %v10687_v27 = vpop.f32.mrb[60].mxu0 }
0x1958   :  { %v8313_v41 = vpop.f32.mrb[61].mxu0 }
0x195e   :  { %v5427_v1 = vpop.f32.mrb[62].mxu0 }
0x195f   :  { %v5428_v3 = vadd.f32 %v5427_v1, %v9667_v33  ;;  %v8323_v5 = vpop.f32.mrb[63].mxu0 }
0x1961   :  { %v5665_v46 = vsel %vm868_vm3, %v5428_v3, -inf }
0x1962   :  { %5666 = vmax.xlane.f32.xlu0 %v5665_v46  ;;  %v5583_v50 = vpop.f32.mrb[64].mxu0 }
0x1963   :  { %v5584_v54 = vadd.f32 %v5583_v50, %v9667_v33  ;;  %v8333_v9 = vpop.f32.mrb[65].mxu0 }
0x1965   :  { %v5671_v57 = vsel %vm868_vm3, %v5584_v54, -inf }
0x1966   :  { %5672 = vmax.xlane.f32.xlu0 %v5671_v57 }
0x198c   :  { %v10693_v10 = vpop.f32.mrb[82].mxu1 }
0x198d   :  { %v8895_v14 = vpack.i.bf16 %v10693_v10, %v10685_v48  ;;  %v8308_v16 = vpop.f32.mrb[83].mxu1 }
0x19c1   :  { %v10697_v29 = vpop.f32.mrb[84].mxu1 }
0x19c2   :  { %v8910_v0 = vpack.i.bf16 %v10697_v29, %v10687_v27  ;;  %v8318_v51 = vpop.f32.mrb[85].mxu1 }
0x19c5   :  { %v5505_v52 = vpop.f32.mrb[86].mxu1 }
0x19c6   :  { %v5506_v26 = vadd.f32 %v5505_v52, %v9667_v33  ;;  %v8328_v30 = vpop.f32.mrb[87].mxu1 }
0x19c8   :  { %v5668_v31 = vsel %vm868_vm3, %v5506_v26, -inf }
0x19c9   :  { %5669 = vmax.xlane.f32.xlu1 %v5668_v31  ;;  %v5661_v56 = vpop.f32.mrb[88].mxu1 }
0x19ca   :  { %v5662_v11 = vadd.f32 %v5661_v56, %v9667_v33  ;;  %v8338_v34 = vpop.f32.mrb[89].mxu1 }
0x19cc   :  { %v5674_v21 = vsel %vm868_vm3, %v5662_v11, -inf }
0x19cd   :  { %5675 = vmax.xlane.f32.xlu0 %v5674_v21 }
0x19da   :  { %5785 = vrot.lane.b32.xlu1 %v10491_v43, %s9161_s26 }
0x19de   :  { %5861 = vrot.lane.b32.xlu1 %v10522_v28, %s9161_s26 }
0x19e2   :  { %5937 = vrot.lane.b32.xlu1 %v10516_v25, %s9161_s26 }
0x19e3   :  { %5709 = vrot.lane.b32.xlu0 %v10533_v24, %s9161_s26 }
0x19e6   :  { %6093 = vrot.lane.b32.xlu1 %v10494_v45, %s9162_s22 }
0x19ef   :  { %v5667_v20 = vpop.xlane.xlu0 %5666 }
0x19f0   :  { %v5677_v38 = vsub.f32 %v5428_v3, %v5667_v20 }
0x19f2   :  { %v5681_v47 = vmul.f32 1.442695, %v5677_v38 }
0x19f3   :  { %v5673_v60 = vpop.xlane.xlu0 %5672 }
0x19f4   :  { %9085 = vpow2.f32 %v5681_v47  ;;  %v5679_v22 = vsub.f32 %v5584_v54, %v5673_v60 }
0x19f6   :  { %v5685_v18 = vmul.f32 1.442695, %v5679_v22 }
0x19f8   :  { %9087 = vpow2.f32 %v5685_v18 }
0x19fe   :  { %v9086_v37 = vpop.eup %9085 }
0x19ff   :  { %v5689_v39 = vsel %vm868_vm3, %v9086_v37, 0.0 }
0x1a02   :  { %5690 = vadd.xlane.f32.xlu0 %v5689_v39  ;;  %v9088_v7 = vpop.eup %9087 }
0x1a03   :  { %v5695_v15 = vsel %vm868_vm3, %v9088_v7, 0.0 }
0x1a18   :  { %6015 = vrot.lane.b32.xlu0 %v10485_v4, %s9162_s22 }
0x1a37   :  { %5696 = vadd.xlane.f32.xlu0 %v5695_v15 }
0x1a4d   :  { %6013 = vrot.lane.b32.xlu0 %v10489_v42, %s9162_s22 }
0x1a51   :  { %6171 = vrot.lane.b32.xlu0 %v10505_v55, %s9162_s22 }
0x1a55   :  { %6169 = vrot.lane.b32.xlu0 %v10513_v53, %s9162_s22 }
0x1a56   :  { %v5670_v45 = vpop.xlane.xlu1 %5669 }
0x1a57   :  { %v5678_v44 = vsub.f32 %v5506_v26, %v5670_v45 }
0x1a59   :  { %v5683_v4 = vmul.f32 1.442695, %v5678_v44 }
0x1a5a   :  { %v5786_v13 = vpop.permute.xlu1 %5785  ;;  %v5676_v59 = vpop.xlane.xlu0 %5675 }
0x1a5b   :  { %9089 = vpow2.f32 %v5683_v4  ;;  %8345 = vmatpush3.msra.mxu1 %v5786_v13  ;;  %v5680_v55 = vsub.f32 %v5662_v11, %v5676_v59 }
0x1a5c   :  { %8354 = vmatprep.subr.mxu1 %v9157_v19 }
0x1a5d   :  { %v5687_v53 = vmul.f32 1.442695, %v5680_v55 }
0x1a5e   :  { %v5710_v49 = vpop.permute.xlu0 %5709  ;;  %v5862_v50 = vpop.permute.xlu1 %5861 }
0x1a5f   :  { %8340 = vmatpush3.msra.mxu0 %v5710_v49  ;;  %9091 = vpow2.f32 %v5687_v53 }
0x1a60   :  { %8349 = vmatprep.subr.mxu0 %v9157_v19 }
0x1a65   :  { %v9090_v42 = vpop.eup %9089 }
0x1a66   :  { %v5692_v40 = vsel %vm868_vm3, %v9090_v42, 0.0 }
0x1a67   :  { %5693 = vadd.xlane.f32.xlu1 %v5692_v40 }
0x1a69   :  { %v9092_v1 = vpop.eup %9091 }
0x1a6a   :  { %v5698_v46 = vsel %vm868_vm3, %v9092_v1, 0.0 }
0x1a78   :  { %6091 = vrot.lane.b32.xlu1 %v10502_v62, %s9162_s22 }
0x1a8f   :  { %v5691_v41 = vpop.xlane.xlu0 %5690 }
0x1a90   :  { %9093 = vrcp.f32 %v5691_v41 }
0x1a93   :  { %v6016_v62 = vpop.permute.xlu0 %6015 }
0x1a9a   :  { %v9094_v3 = vpop.eup %9093 }
0x1a9b   :  { %v5705_v5 = vmul.f32 %v9094_v3, %v9086_v37 }
0x1a9c   :  { %5699 = vadd.xlane.f32.xlu1 %v5698_v46 }
0x1a9d   :  { %8342 = vmatmul.mubr.msk.f32.vlgmr.msra.gmra.mrb[66].mxu0 %vm868_vm3, %v5705_v5 }
0x1a9e   :  { %8350 = vmatpush3.msra.mxu0 %v5862_v50  ;;  %8351 = vmatprep.mubr.msk.f32.mxu0 %vm9158_vm0, %v9157_v19 }
0x1a9f   :  { %8359 = vmatprep.subr.mxu0 %v9157_v19 }
0x1aad   :  { %6249 = vrot.lane.b32.xlu1 %v10520_v58, %s9162_s22 }
0x1ab1   :  { %6247 = vrot.lane.b32.xlu1 %v10529_v63, %s9162_s22  ;;  %v5938_v63 = vpop.permute.xlu1 %5937 }
0x1ab5   :  { %v6094_v52 = vpop.permute.xlu1 %6093 }
0x1ac4   :  { %v5697_v54 = vpop.xlane.xlu0 %5696 }
0x1ac5   :  { %9095 = vrcp.f32 %v5697_v54 }
0x1ac8   :  { %v6014_v9 = vpop.permute.xlu0 %6013 }
0x1acc   :  { %v6172_v51 = vpop.permute.xlu0 %6171 }
0x1acf   :  { %v9096_v57 = vpop.eup %9095 }
0x1ad0   :  { %v5707_v16 = vmul.f32 %v9096_v57, %v9088_v7  ;;  %v6170_v58 = vpop.permute.xlu0 %6169 }
0x1ad2   :  { %8352 = vmatmul.mubr.msk.f32.vlgmr.msra.gmra.mrb[68].mxu0 %vm868_vm3, %v5707_v16 }
0x1ad3   :  { %8360 = vmatpush3.xpose.msk.msra.mxu0 %vm563_vm1, %v6016_v62  ;;  %8361 = vmatprep.mubr.msk.f32.mxu0 %vm9158_vm0, %v9157_v19 }
0x1ad4   :  { %8369 = vmatprep.subr.mxu0 %v9157_v19 }
0x1ad6   :  { %8362 = vmatmul.mubr.msk.f32.vlgmr.msra.gmra.mrb[70].mxu0 %vm563_vm1, %v6014_v9 }
0x1ad7   :  { %8370 = vmatpush3.xpose.msk.msra.mxu0 %vm563_vm1, %v6172_v51  ;;  %8371 = vmatprep.mubr.msk.f32.mxu0 %vm9158_vm0, %v9157_v19 }
0x1ad8   :  { %8379 = vmatprep.subr.mxu0 %v9157_v19 }
0x1ada   :  { %8372 = vmatmul.mubr.msk.f32.vlgmr.msra.gmra.mrb[72].mxu0 %vm563_vm1, %v6170_v58 }
0x1adb   :  { %8381 = vmatprep.mubr.msk.f32.mxu0 %vm9158_vm0, %v9157_v19 }
0x1af4   :  { %v5694_v26 = vpop.xlane.xlu1 %5693 }
0x1af5   :  { %9097 = vrcp.f32 %v5694_v26 }
0x1af8   :  { %v6092_v56 = vpop.permute.xlu1 %6091 }
0x1aff   :  { %v9098_v30 = vpop.eup %9097 }
0x1b00   :  { %v5706_v31 = vmul.f32 %v9098_v30, %v9090_v42 }
0x1b02   :  { %8347 = vmatmul.mubr.msk.f32.vlgmr.msra.gmra.mrb[90].mxu1 %vm868_vm3, %v5706_v31 }
0x1b03   :  { %8355 = vmatpush3.msra.mxu1 %v5938_v63  ;;  %8356 = vmatprep.mubr.msk.f32.mxu1 %vm9158_vm0, %v9157_v19 }
0x1b04   :  { %8364 = vmatprep.subr.mxu1 %v9157_v19 }
0x1b29   :  { %v5700_v11 = vpop.xlane.xlu1 %5699 }
0x1b2a   :  { %9099 = vrcp.f32 %v5700_v11 }
0x1b2d   :  { %v6250_v20 = vpop.permute.xlu1 %6249 }
0x1b31   :  { %v6248_v38 = vpop.permute.xlu1 %6247 }
0x1b34   :  { %v9100_v34 = vpop.eup %9099 }
0x1b35   :  { %v5708_v21 = vmul.f32 %v9100_v34, %v9092_v1 }
0x1b37   :  { %8357 = vmatmul.mubr.msk.f32.vlgmr.msra.gmra.mrb[92].mxu1 %vm868_vm3, %v5708_v21 }
0x1b38   :  { %8365 = vmatpush3.xpose.msk.msra.mxu1 %vm563_vm1, %v6094_v52  ;;  %8366 = vmatprep.mubr.msk.f32.mxu1 %vm9158_vm0, %v9157_v19 }
0x1b39   :  { %8374 = vmatprep.subr.mxu1 %v9157_v19 }
0x1b3b   :  { %8367 = vmatmul.mubr.msk.f32.vlgmr.msra.gmra.mrb[94].mxu1 %vm563_vm1, %v6092_v56 }
0x1b3c   :  { %8375 = vmatpush3.xpose.msk.msra.mxu1 %vm563_vm1, %v6250_v20  ;;  %8376 = vmatprep.mubr.msk.f32.mxu1 %vm9158_vm0, %v9157_v19 }
0x1b3d   :  { %8384 = vmatprep.subr.mxu1 %v9157_v19 }
0x1b3f   :  { %8377 = vmatmul.mubr.msk.f32.vlgmr.msra.gmra.mrb[96].mxu1 %vm563_vm1, %v6248_v38 }
0x1b40   :  { %8386 = vmatprep.mubr.msk.f32.mxu1 %vm9158_vm0, %v9157_v19 }
0x1b70   :  { %v10769_v47 = vpop.f32.mrb[66].mxu0 }
0x1b71   :  { %v8343_v37 = vpop.f32.mrb[67].mxu0 }
0x1ba5   :  { %v10771_v39 = vpop.f32.mrb[68].mxu0 }
0x1ba6   :  { %v8353_v60 = vpop.f32.mrb[69].mxu0 }
0x1ba9   :  { %v6087_v22 = vpop.f32.mrb[70].mxu0 }
0x1baa   :  { %v6088_v18 = vadd.f32 %v6087_v22, %v9667_v33  ;;  %v8363_v7 = vpop.f32.mrb[71].mxu0 }
0x1bac   :  { %v6325_v15 = vsel %vm868_vm3, %v6088_v18, -inf }
0x1bad   :  { %6326 = vmax.xlane.f32.xlu0 %v6325_v15  ;;  %v6243_v45 = vpop.f32.mrb[72].mxu0 }
0x1bae   :  { %v6244_v44 = vadd.f32 %v6243_v45, %v9667_v33  ;;  %v8373_v4 = vpop.f32.mrb[73].mxu0 }
0x1bb0   :  { %v6331_v13 = vsel %vm868_vm3, %v6244_v44, -inf }
0x1bb1   :  { %6332 = vmax.xlane.f32.xlu0 %v6331_v13 }
0x1bd5   :  { %v5857_v59 = vpop.f32.mrb[90].mxu1 }
0x1bd6   :  { %v8900_v49 = vpack.i.bf16 %v5857_v59, %v10769_v47  ;;  %v8348_v42 = vpop.f32.mrb[91].mxu1  ;;  %v7511_v59 = vld [vmem:[%s11206_s9 + $0x80] sm:$0xff] }
0x1bd7   :  { %v7513_v42 = vld [vmem:[%s11206_s9 + $0x90] sm:$0xff] }
0x1c0a   :  { %v10778_v40 = vpop.f32.mrb[92].mxu1 }
0x1c0b   :  { %v8915_v55 = vpack.i.bf16 %v10778_v40, %v10771_v39  ;;  %v8358_v53 = vpop.f32.mrb[93].mxu1 }
0x1c0e   :  { %v6165_v41 = vpop.f32.mrb[94].mxu1 }
0x1c0f   :  { %v6166_v1 = vadd.f32 %v6165_v41, %v9667_v33  ;;  %v8368_v3 = vpop.f32.mrb[95].mxu1  ;;  %v7514_v41 = vld [vmem:[%s11206_s9 + $0x98] sm:$0xff] }
0x1c10   :  { %v7515_v3 = vld [vmem:[%s11206_s9 + $0xa0] sm:$0xff] }
0x1c11   :  { %v6328_v5 = vsel %vm868_vm3, %v6166_v1, -inf }
0x1c12   :  { %6329 = vmax.xlane.f32.xlu1 %v6328_v5  ;;  %v6321_v46 = vpop.f32.mrb[96].mxu1  ;;  %v7516_v5 = vld [vmem:[%s11206_s9 + $0xa8] sm:$0xff] }
0x1c13   :  { %v6322_v50 = vadd.f32 %v6321_v46, %v9667_v33  ;;  %v8378_v62 = vpop.f32.mrb[97].mxu1  ;;  %v8739_v46 = vpack.c.bf16 %v7516_v5, %v7515_v3  ;;  %v7527_v5 = vld [vmem:[%s11207_s10 + $0x1] ss:$0 sm:$0xff] }
0x1c14   :  { %v7518_v62 = vld [vmem:[%s11206_s9 + $0xb8] sm:$0xff] }
0x1c15   :  { %v6334_v54 = vsel %vm868_vm3, %v6322_v50, -inf }
0x1c16   :  { %6335 = vmax.xlane.f32.xlu0 %v6334_v54 }
0x1c3a   :  { %v6327_v9 = vpop.xlane.xlu0 %6326 }
0x1c3b   :  { %v6337_v57 = vsub.f32 %v6088_v18, %v6327_v9  ;;  %v7519_v9 = vld [vmem:[%s11206_s9 + $0xc0] sm:$0xff] }
0x1c3d   :  { %v6341_v16 = vmul.f32 1.442695, %v6337_v57  ;;  %v7520_v57 = vld [vmem:[%s11206_s9 + $0xc8] sm:$0xff] }
0x1c3e   :  { %v6333_v51 = vpop.xlane.xlu0 %6332 }
0x1c3f   :  { %9101 = vpow2.f32 %v6341_v16  ;;  %v6339_v58 = vsub.f32 %v6244_v44, %v6333_v51  ;;  %v8747_v16 = vpack.c.bf16 %v7520_v57, %v7519_v9  ;;  %v7521_v51 = vld [vmem:[%s11206_s9 + $0xd0] sm:$0xff] }
0x1c41   :  { %v6345_v63 = vmul.f32 1.442695, %v6339_v58  ;;  %v7522_v58 = vld [vmem:[%s11206_s9 + $0xd8] sm:$0xff] }
0x1c43   :  { %9103 = vpow2.f32 %v6345_v63  ;;  %v8751_v63 = vpack.c.bf16 %v7522_v58, %v7521_v51 }
0x1c49   :  { %v9102_v52 = vpop.eup %9101 }
0x1c4a   :  { %v6349_v26 = vsel %vm868_vm3, %v9102_v52, 0.0 }
0x1c4b   :  { %6350 = vadd.xlane.f32.xlu0 %v6349_v26  ;;  %v7524_v26 = vld [vmem:[%s11206_s9 + $0xe8] sm:$0xff] }
0x1c4d   :  { %v9104_v30 = vpop.eup %9103 }
0x1c4e   :  { %v6355_v31 = vsel %vm868_vm3, %v9104_v30, 0.0 }
0x1c4f   :  { %6356 = vadd.xlane.f32.xlu0 %v6355_v31  ;;  %v7525_v31 = vld [vmem:[%s11206_s9 + $0xf0] sm:$0xff] }
0x1c65   :  { %6369 = vrot.lane.b32.xlu0 %v10533_v24, %s9162_s22 }
0x1c69   :  { %8896 = vrot.lane.b32.xlu0 %v8895_v14, %s9162_s22 }
0x1c9f   :  { %v6330_v33 = vpop.xlane.xlu1 %6329 }
0x1ca0   :  { %v6338_v56 = vsub.f32 %v6166_v1, %v6330_v33  ;;  %v8735_v1 = vpack.c.bf16 %v7514_v41, %v7513_v42  ;;  %v7526_v33 = vld [vmem:[%s11206_s9 + $0xf8] sm:$0xff] }
0x1ca2   :  { %v6343_v11 = vmul.f32 1.442695, %v6338_v56  ;;  %v8759_v56 = vpack.c.bf16 %v7526_v33, %v7525_v31 }
0x1ca3   :  { %v6336_v24 = vpop.xlane.xlu0 %6335 }
0x1ca4   :  { %9105 = vpow2.f32 %v6343_v11  ;;  %v6340_v20 = vsub.f32 %v6322_v50, %v6336_v24  ;;  %v7517_v50 = vld [vmem:[%s11206_s9 + $0xb0] sm:$0xff] }
0x1ca5   :  { %v8743_v54 = vpack.c.bf16 %v7518_v62, %v7517_v50 }
0x1ca6   :  { %v6347_v38 = vmul.f32 1.442695, %v6340_v20 }
0x1cae   :  { %v9106_v34 = vpop.eup %9105 }
0x1caf   :  { %v6352_v21 = vsel %vm868_vm3, %v9106_v34, 0.0 }
0x1cb0   :  { %6353 = vadd.xlane.f32.xlu1 %v6352_v21 }
0x1cc1   :  { %6445 = vrot.lane.b32.xlu1 %v10491_v43, %s9162_s22 }
0x1cc5   :  { %6521 = vrot.lane.b32.xlu1 %v10522_v28, %s9162_s22 }
0x1cd8   :  { %v6351_v47 = vpop.xlane.xlu0 %6350 }
0x1cd9   :  { %9107 = vrcp.f32 %v6351_v47 }
0x1cda   :  { %9109 = vpow2.f32 %v6347_v38 }
0x1cdc   :  { %v6357_v48 = vpop.xlane.xlu0 %6356 }
0x1cdd   :  { %9111 = vrcp.f32 %v6357_v48 }
0x1ce0   :  { %v6370_v10 = vpop.permute.xlu0 %6369 }
0x1ce1   :  { %8380 = vmatpush3.msra.mxu0 %v6370_v10 }
0x1ce2   :  { %8389 = vmatprep.subr.mxu0 %v9157_v19 }
0x1ce3   :  { %v9108_v14 = vpop.eup %9107 }
0x1ce4   :  { %v6365_v37 = vmul.f32 %v9108_v14, %v9102_v52  ;;  %v9110_v60 = vpop.eup %9109  ;;  %v7523_v52 = vld [vmem:[%s11206_s9 + $0xe0] sm:$0xff]  ;;  %v8897_v10 = vpop.permute.xlu0 %8896 }
0x1ce5   :  { %v6358_v43 = vsel %vm868_vm3, %v9110_v60, 0.0 }
0x1ce6   :  { %8382 = vmatmul.mubr.msk.f32.vlgmr.msra.gmra.mrb[74].mxu0 %vm868_vm3, %v6365_v37  ;;  %v8899_v37 = vunpack.i.h.bf16 %v8897_v10 }
0x1ce7   :  { %8391 = vmatprep.mubr.msk.f32.mxu0 %vm9158_vm0, %v9157_v19  ;;  %v9112_v18 = vpop.eup %9111 }
0x1ce8   :  { %v6367_v7 = vmul.f32 %v9112_v18, %v9104_v30  ;;  %v8755_v30 = vpack.c.bf16 %v7524_v26, %v7523_v52  ;;  %v6722_v18 = vsel %vm563_vm1, %v10607_v2, %v8899_v37  ;;  %v7535_v26 = vld [vmem:[%s11208_s13 + $0x128] sm:$0xff] }
0x1ce9   :  { %6359 = vadd.xlane.f32.xlu1 %v6358_v43 }
0x1cfa   :  { %6597 = vrot.lane.b32.xlu1 %v10516_v25, %s9162_s22 }
0x1cfe   :  { %8901 = vrot.lane.b32.xlu1 %v8900_v49, %s9161_s26  ;;  %v7512_v49 = vld [vmem:[%s11206_s9 + $0x88] sm:$0xff] }
0x1cff   :  { %v8731_v53 = vpack.c.bf16 %v7512_v49, %v7511_v59 }
0x1d02   :  { %8911 = vrot.lane.b32.xlu1 %v8910_v0, %s9162_s22 }
0x1d3d   :  { %v6354_v28 = vpop.xlane.xlu1 %6353 }
0x1d3e   :  { %9113 = vrcp.f32 %v6354_v28 }
0x1d41   :  { %v6446_v22 = vpop.permute.xlu1 %6445 }
0x1d42   :  { %8385 = vmatpush3.msra.mxu1 %v6446_v22 }
0x1d43   :  { %8394 = vmatprep.subr.mxu1 %v9157_v19 }
0x1d45   :  { %v6522_v15 = vpop.permute.xlu1 %6521 }
0x1d46   :  { %8390 = vmatpush3.msra.mxu0 %v6522_v15 }
0x1d47   :  { %8392 = vmatmul.mubr.msk.f32.vlgmr.msra.gmra.mrb[76].mxu0 %vm868_vm3, %v6367_v7  ;;  %8732 = vmatprep.subr.bf16.mxu0 %v8731_v53 }
0x1d48   :  { %v9114_v25 = vpop.eup %9113  ;;  %8734 = vmatpush3.bf16.msra.mxu0 %v8731_v53 }
0x1d49   :  { %v6366_v45 = vmul.f32 %v9114_v25, %v9106_v34  ;;  %8736 = vmatprep.subr.bf16.mxu0 %v8735_v1 }
0x1d4b   :  { %8387 = vmatmul.mubr.msk.f32.vlgmr.msra.gmra.mrb[98].mxu1 %vm868_vm3, %v6366_v45 }
0x1d4c   :  { %8396 = vmatprep.mubr.msk.f32.mxu1 %vm9158_vm0, %v9157_v19  ;;  %8738 = vmatpush3.bf16.msra.mxu0 %v8735_v1 }
0x1d4d   :  { %8740 = vmatprep.subr.bf16.mxu0 %v8739_v46 }
0x1d50   :  { %8742 = vmatpush3.bf16.msra.mxu0 %v8739_v46 }
0x1d51   :  { %8744 = vmatprep.subr.bf16.mxu0 %v8743_v54 }
0x1d54   :  { %8746 = vmatpush3.bf16.msra.mxu0 %v8743_v54 }
0x1d55   :  { %8748 = vmatprep.subr.bf16.mxu0 %v8747_v16 }
0x1d58   :  { %8750 = vmatpush3.bf16.msra.mxu0 %v8747_v16 }
0x1d59   :  { %8752 = vmatprep.subr.bf16.mxu0 %v8751_v63 }
0x1d5c   :  { %8754 = vmatpush3.bf16.msra.mxu0 %v8751_v63 }
0x1d5d   :  { %8756 = vmatprep.subr.bf16.mxu0 %v8755_v30 }
0x1d60   :  { %8758 = vmatpush3.bf16.msra.mxu0 %v8755_v30  ;;  %v7537_v30 = vld [vmem:[%s11208_s13 + $0x138] sm:$0xff] }
0x1d61   :  { %8760 = vmatprep.subr.bf16.mxu0 %v8759_v56  ;;  %v8767_v33 = vpack.c.bf16 %v7537_v30, %v7535_v26 }
0x1d64   :  { %8762 = vmatpush3.bf16.msra.mxu0 %v8759_v56  ;;  %v7534_v56 = vld [vmem:[%s11208_s13 + $0x120] sm:$0xff] }
0x1d76   :  { %v6360_v27 = vpop.xlane.xlu1 %6359 }
0x1d77   :  { %9115 = vrcp.f32 %v6360_v27 }
0x1d7a   :  { %v6598_v29 = vpop.permute.xlu1 %6597 }
0x1d7b   :  { %8395 = vmatpush3.msra.mxu1 %v6598_v29 }
0x1d7e   :  { %v8902_v14 = vpop.permute.xlu1 %8901 }
0x1d7f   :  { %v8904_v43 = vunpack.i.h.bf16 %v8902_v14  ;;  %v8903_v28 = vunpack.i.l.bf16 %v8902_v14 }
0x1d81   :  { %v9116_v0 = vpop.eup %9115 }
0x1d82   :  { %v6368_v44 = vmul.f32 %v9116_v0, %v9110_v60  ;;  %v8898_v60 = vunpack.i.l.bf16 %v8897_v10  ;;  %v8912_v27 = vpop.permute.xlu1 %8911 }
0x1d83   :  { %v8914_v0 = vunpack.i.h.bf16 %v8912_v27 }
0x1d84   :  { %8397 = vmatmul.mubr.msk.f32.vlgmr.msra.gmra.mrb[100].mxu1 %vm868_vm3, %v6368_v44  ;;  %v6721_v39 = vsel %vm563_vm1, %v10605_v23, %v8898_v60  ;;  %v8913_v44 = vunpack.i.l.bf16 %v8912_v27  ;;  %v7549_v27 = vld [vmem:[%s11208_s13 + $0x198] sm:$0xff] }
0x1d85   :  { %7016 = vmatprep.mubr.f32.mxu1 %v9157_v19  ;;  %v6725_v40 = vsel %vm3241_vm4, %v6721_v39, %v8903_v28  ;;  %v6724_v42 = vsel %vm563_vm1, %v10615_v35, %v8914_v0 }
0x1d86   :  { %v6723_v23 = vsel %vm563_vm1, %v10609_v8, %v8913_v44  ;;  %v7548_v44 = vld [vmem:[%s11208_s13 + $0x190] sm:$0xff] }
0x1db9   :  { %v6441_v4 = vpop.f32.mrb[74].mxu0 }
0x1dba   :  { %v8383_v13 = vpop.f32.mrb[75].mxu0 }
0x1e1a   :  { %v6593_v11 = vpop.f32.mrb[76].mxu0 }
0x1e1b   :  { %v8393_v34 = vpop.f32.mrb[77].mxu0 }
0x1e1c   :  { %v7539_v34 = vld [vmem:[%s11208_s13 + $0x148] sm:$0xff] }
0x1e1e   :  { %v6517_v21 = vpop.f32.mrb[98].mxu1 }
0x1e1f   :  { %v8905_v24 = vpack.i.bf16 %v6517_v21, %v6441_v4  ;;  %v8388_v20 = vpop.f32.mrb[99].mxu1  ;;  %v7541_v21 = vld [vmem:[%s11208_s13 + $0x158] sm:$0xff] }
0x1e20   :  { %v8771_v20 = vpack.c.bf16 %v7541_v21, %v7539_v34 }
0x1e21   :  { %8906 = vrot.lane.b32.xlu0 %v8905_v24, %s9160_s0 }
0x1e25   :  { %8916 = vrot.lane.b32.xlu0 %v8915_v55, %s9161_s26  ;;  %v6726_v55 = vsel %vm3241_vm4, %v6722_v18, %v8904_v43 }
0x1e57   :  { %v6669_v38 = vpop.f32.mrb[100].mxu1 }
0x1e58   :  { %v8920_v47 = vpack.i.bf16 %v6669_v38, %v6593_v11  ;;  %v8398_v48 = vpop.f32.mrb[101].mxu1  ;;  %v7536_v11 = vld [vmem:[%s11208_s13 + $0x130] sm:$0xff]  ;;  %v7538_v38 = vld [vmem:[%s11208_s13 + $0x140] sm:$0xff] }
0x1e59   :  { %v8769_v24 = vpack.c.bf16 %v7536_v11, %v7534_v56 }
0x1e5a   :  { %8921 = vrot.lane.b32.xlu1 %v8920_v47, %s9160_s0  ;;  %v7540_v47 = vld [vmem:[%s11208_s13 + $0x150] sm:$0xff] }
0x1e5b   :  { %v8773_v48 = vpack.c.bf16 %v7540_v47, %v7538_v38  ;;  %v7528_v38 = vld [vmem:[%s11209_s11 + $0x1] ss:$0 sm:$0xff] }
0x1e93   :  { %v8907_v22 = vpop.permute.xlu0 %8906 }
0x1e94   :  { %v8909_v7 = vunpack.i.h.bf16 %v8907_v22  ;;  %v8908_v15 = vunpack.i.l.bf16 %v8907_v22 }
0x1e96   :  { %v6729_v25 = vsel %vm3246_vm5, %v6725_v40, %v8908_v15  ;;  %v6730_v45 = vsel %vm3246_vm5, %v6726_v55, %v8909_v7  ;;  %v7543_v7 = vld [vmem:[%s11208_s13 + $0x168] sm:$0xff]  ;;  %v7545_v15 = vld [vmem:[%s11208_s13 + $0x178] sm:$0xff]  ;;  %v7542_v40 = vld [vmem:[%s11208_s13 + $0x160] sm:$0xff] }
0x1e97   :  { %8431 = vmatprep.mubr.f32.mxu0 %v6729_v25  ;;  %v8917_v29 = vpop.permute.xlu0 %8916  ;;  %v8775_v39 = vpack.c.bf16 %v7545_v15, %v7543_v7  ;;  %v7544_v55 = vld [vmem:[%s11208_s13 + $0x170] sm:$0xff] }
0x1e98   :  { %8432 = vmatmul.mubr.f32.vlgmr.msra.gmra.mrb[78].mxu0 %v6730_v45  ;;  %v8919_v2 = vunpack.i.h.bf16 %v8917_v29  ;;  %v8918_v4 = vunpack.i.l.bf16 %v8917_v29  ;;  %v8777_v25 = vpack.c.bf16 %v7544_v55, %v7542_v40  ;;  %v7547_v45 = vld [vmem:[%s11208_s13 + $0x188] sm:$0xff]  ;;  %v7546_v29 = vld [vmem:[%s11208_s13 + $0x180] sm:$0xff] }
0x1e99   :  { %v8779_v0 = vpack.c.bf16 %v7549_v27, %v7547_v45 }
0x1e9a   :  { %v6727_v53 = vsel %vm3241_vm4, %v6723_v23, %v8918_v4  ;;  %v6728_v41 = vsel %vm3241_vm4, %v6724_v42, %v8919_v2  ;;  %v7551_v2 = vld [vmem:[%s11208_s13 + $0x1a8] sm:$0xff]  ;;  %v7553_v4 = vld [vmem:[%s11208_s13 + $0x1b8] sm:$0xff]  ;;  %v7552_v23 = vld [vmem:[%s11208_s13 + $0x1b0] sm:$0xff] }
0x1e9b   :  { %v7555_v42 = vld [vmem:[%s11208_s13 + $0x1c8] sm:$0xff] }
0x1ecc   :  { %v8922_v13 = vpop.permute.xlu1 %8921 }
0x1ecd   :  { %v8924_v59 = vunpack.i.h.bf16 %v8922_v13  ;;  %v8923_v49 = vunpack.i.l.bf16 %v8922_v13  ;;  %v8781_v13 = vpack.c.bf16 %v7548_v44, %v7546_v29 }
0x1ecf   :  { %v6731_v1 = vsel %vm3246_vm5, %v6727_v53, %v8923_v49  ;;  %v6732_v3 = vsel %vm3246_vm5, %v6728_v41, %v8924_v59  ;;  %v8783_v59 = vpack.c.bf16 %v7553_v4, %v7551_v2  ;;  %v7550_v49 = vld [vmem:[%s11208_s13 + $0x1a0] sm:$0xff]  ;;  %v7557_v53 = vld [vmem:[%s11208_s13 + $0x1d8] sm:$0xff]  ;;  %v7588_v4 = vld [vmem:[%s11211_s15 + $0x188] sm:$0xff] }
0x1ed0   :  { %8434 = vmatprep.mubr.f32.mxu0 %v6731_v1  ;;  %v8785_v41 = vpack.c.bf16 %v7552_v23, %v7550_v49  ;;  %v8787_v1 = vpack.c.bf16 %v7557_v53, %v7555_v42  ;;  %v7587_v2 = vld [vmem:[%s11211_s15 + $0x180] sm:$0xff]  ;;  %v7572_v49 = vld [vmem:[%s11211_s15 + $0x108] sm:$0xff]  ;;  %v7589_v23 = vld [vmem:[%s11211_s15 + $0x190] sm:$0xff] }
0x1ed1   :  { %8435 = vmatmul.mubr.f32.gmra.mrb[80].mxu0 %v6732_v3  ;;  %v7554_v3 = vld [vmem:[%s11208_s13 + $0x1c0] sm:$0xff]  ;;  %v7590_v42 = vld [vmem:[%s11211_s15 + $0x198] sm:$0xff] }
0x1ed2   :  { %v8799_v53 = vpack.c.bf16 %v7590_v42, %v7589_v23 }
0x1f6b   :  { %v8433_v46 = vpop.f32.mrb[78].mxu0 }
0x1f6c   :  { %v6827_v50 = vadd.f32 %v8433_v46, %v7527_v5  ;;  %v6821_v8 = vpop.f32.mrb[79].mxu0  ;;  %v7559_v46 = vld [vmem:[%s11208_s13 + $0x1e8] sm:$0xff] }
0x1f6d   :  { %v6822_v62 = vadd.f32 %v7527_v5, %v6821_v8 }
0x1f6e   :  { %v10892_v35 = vadd.f32 %v6827_v50, %v10284_v12  ;;  %v7533_v12 = vld [vmem:[%s11208_s13 + $0x118] sm:$0xff] }
0x1f6f   :  { %v10895_v54 = vadd.f32 %v6822_v62, %v10280_v6  ;;  %v7531_v6 = vld [vmem:[%s11208_s13 + $0x108] sm:$0xff]  ;;  %v7561_v50 = vld [vmem:[%s11208_s13 + $0x1f8] sm:$0xff] }
0x1f70   :  { %6848 = vadd.xlane.f32.xlu1 %v10892_v35  ;;  %v8763_v52 = vpack.c.bf16 %v7533_v12, %v7531_v6  ;;  %v8791_v62 = vpack.c.bf16 %v7561_v50, %v7559_v46  ;;  %v7592_v46 = vld [vmem:[%s11211_s15 + $0x1a8] sm:$0xff] }
0x1f71   :  { %6846 = vadd.xlane.f32.xlu0 %v10895_v54 }
0x1f72   :  { %8764 = vmatprep.subr.bf16.mxu1 %v8763_v52 }
0x1fa4   :  { %v8436_v9 = vpop.f32.mrb[80].mxu0 }
0x1fa5   :  { %v6831_v57 = vpop.f32.mrb[81].mxu0  ;;  %v6837_v51 = vadd.f32 %v8436_v9, %v7527_v5  ;;  %v7558_v9 = vld [vmem:[%s11208_s13 + $0x1e0] sm:$0xff] }
0x1fa6   :  { %v6832_v16 = vadd.f32 %v7527_v5, %v6831_v57  ;;  %v7556_v5 = vld [vmem:[%s11208_s13 + $0x1d0] sm:$0xff] }
0x1fa7   :  { %v10904_v63 = vadd.f32 %v6837_v51, %v10292_v36  ;;  %v7532_v36 = vld [vmem:[%s11208_s13 + $0x110] sm:$0xff]  ;;  %v8789_v8 = vpack.c.bf16 %v7556_v5, %v7554_v3  ;;  %v7591_v5 = vld [vmem:[%s11211_s15 + $0x1a0] sm:$0xff] }
0x1fa8   :  { %v10900_v58 = vadd.f32 %v6832_v16, %v10288_v17  ;;  %v7530_v17 = vld [vmem:[%s11208_s13 + $0x100] sm:$0xff]  ;;  %v7560_v57 = vld [vmem:[%s11208_s13 + $0x1f0] sm:$0xff]  ;;  %v8803_v50 = vpack.c.bf16 %v7592_v46, %v7591_v5 }
0x1fa9   :  { %v8765_v31 = vpack.c.bf16 %v7532_v36, %v7530_v17  ;;  %v8793_v16 = vpack.c.bf16 %v7560_v57, %v7558_v9  ;;  %v7593_v57 = vld [vmem:[%s11211_s15 + $0x1b0] sm:$0xff] }
0x1faa   :  { %6850 = vadd.xlane.f32.xlu0 %v10900_v58 }
0x1fab   :  { %8766 = vmatpush1.bf16.msra.mxu1 %v8765_v31 }
0x1fac   :  { %8768 = vmatprep.subr.bf16.mxu1 %v8767_v33 }
0x1fae   :  { %6852 = vadd.xlane.f32.xlu0 %v10904_v63 }
0x1faf   :  { %8770 = vmatpush1.bf16.msra.mxu1 %v8769_v24 }
0x1fb0   :  { %8772 = vmatprep.subr.bf16.mxu1 %v8771_v20 }
0x1fb3   :  { %8774 = vmatpush1.bf16.msra.mxu1 %v8773_v48 }
0x1fb4   :  { %8776 = vmatprep.subr.bf16.mxu1 %v8775_v39 }
0x1fb7   :  { %8778 = vmatpush1.bf16.msra.mxu1 %v8777_v25 }
0x1fb8   :  { %8780 = vmatprep.subr.bf16.mxu1 %v8779_v0 }
0x1fbb   :  { %8782 = vmatpush1.bf16.msra.mxu1 %v8781_v13  ;;  %v8795_v13 = vpack.c.bf16 %v7588_v4, %v7587_v2  ;;  %v7239_v2 = vld [vmem:[%s11214_s17 + $0x38] sm:$0xff] }
0x1fbc   :  { %8784 = vmatprep.subr.bf16.mxu1 %v8783_v59  ;;  %v7571_v59 = vld [vmem:[%s11211_s15 + $0x100] sm:$0xff] }
0x1fbd   :  { %8796 = vmatprep.subr.bf16.mxu0 %v8795_v13  ;;  %v7240_v13 = vld [vmem:[%s11214_s17 + $0x40] sm:$0xff] }
0x1fbf   :  { %8786 = vmatpush1.bf16.msra.mxu1 %v8785_v41  ;;  %v7573_v41 = vld [vmem:[%s11211_s15 + $0x110] sm:$0xff] }
0x1fc0   :  { %8788 = vmatprep.subr.bf16.mxu1 %v8787_v1  ;;  %v7574_v1 = vld [vmem:[%s11211_s15 + $0x118] sm:$0xff] }
0x1fc1   :  { %v8801_v3 = vpack.c.bf16 %v7574_v1, %v7573_v41 }
0x1fc3   :  { %8790 = vmatpush1.bf16.msra.mxu1 %v8789_v8  ;;  %v7575_v8 = vld [vmem:[%s11211_s15 + $0x120] sm:$0xff] }
0x1fc4   :  { %8792 = vmatprep.subr.bf16.mxu1 %v8791_v62  ;;  %v7576_v62 = vld [vmem:[%s11211_s15 + $0x128] sm:$0xff] }
0x1fc5   :  { %v8805_v9 = vpack.c.bf16 %v7576_v62, %v7575_v8 }
0x1fc7   :  { %8794 = vmatpush1.bf16.msra.mxu1 %v8793_v16  ;;  %v7594_v16 = vld [vmem:[%s11211_s15 + $0x1b8] sm:$0xff] }
0x1ffd   :  { %v6849_v10 = vpop.xlane.xlu1 %6848 }
0x1ffe   :  { %v6855_v14 = vmul.f32 0.0078125, %v6849_v10  ;;  %v6847_v37 = vpop.xlane.xlu0 %6846  ;;  %v7529_v10 = vld [vmem:[%s11210_s12 + $0x1] ss:$0 sm:$0xff] }
0x1fff   :  { %v6854_v60 = vmul.f32 0.0078125, %v6847_v37 }
0x2000   :  { %v10944_v43 = vsub.f32 %v10892_v35, %v6855_v14 }
0x2001   :  { %v10947_v28 = vsub.f32 %v10895_v54, %v6854_v60 }
0x2002   :  { %v6863_v22 = vmul.f32 %v10944_v43, %v10944_v43 }
0x2003   :  { %v6862_v18 = vmul.f32 %v10947_v28, %v10947_v28 }
0x2004   :  { %6868 = vadd.xlane.f32.xlu1 %v6863_v22 }
0x2005   :  { %6866 = vadd.xlane.f32.xlu0 %v6862_v18 }
0x2037   :  { %v6851_v51 = vpop.xlane.xlu0 %6850 }
0x2038   :  { %v6856_v6 = vmul.f32 0.0078125, %v6851_v51  ;;  %v8807_v51 = vpack.c.bf16 %v7594_v16, %v7593_v57 }
0x203a   :  { %v6860_v12 = vsub.f32 %v10900_v58, %v6856_v6  ;;  %v7577_v6 = vld [vmem:[%s11211_s15 + $0x130] sm:$0xff] }
0x203b   :  { %v6853_v17 = vpop.xlane.xlu0 %6852 }
0x203c   :  { %v6857_v52 = vmul.f32 0.0078125, %v6853_v17  ;;  %v6864_v36 = vmul.f32 %v6860_v12, %v6860_v12 }
0x203e   :  { %v6861_v26 = vsub.f32 %v10904_v63, %v6857_v52  ;;  %6870 = vadd.xlane.f32.xlu0 %v6864_v36  ;;  %v7595_v52 = vld [vmem:[%s11211_s15 + $0x1c0] sm:$0xff]  ;;  %v7596_v36 = vld [vmem:[%s11211_s15 + $0x1c8] sm:$0xff] }
0x2040   :  { %v6865_v30 = vmul.f32 %v6861_v26, %v6861_v26 }
0x2042   :  { %6872 = vadd.xlane.f32.xlu1 %v6865_v30  ;;  %v7579_v30 = vld [vmem:[%s11211_s15 + $0x140] sm:$0xff] }
0x2091   :  { %v6869_v31 = vpop.xlane.xlu1 %6868 }
0x2092   :  { %v6875_v33 = vmul.f32 0.0078125, %v6869_v31  ;;  %v6867_v56 = vpop.xlane.xlu0 %6866  ;;  %v7580_v31 = vld [vmem:[%s11211_s15 + $0x148] sm:$0xff] }
0x2093   :  { %v6874_v11 = vmul.f32 0.0078125, %v6867_v56  ;;  %v7597_v56 = vld [vmem:[%s11211_s15 + $0x1d0] sm:$0xff] }
0x2094   :  { %v6879_v34 = vadd.f32 1e-05, %v6875_v33  ;;  %v8813_v33 = vpack.c.bf16 %v7580_v31, %v7579_v30 }
0x2095   :  { %v6878_v21 = vadd.f32 1e-05, %v6874_v11  ;;  %v7598_v11 = vld [vmem:[%s11211_s15 + $0x1d8] sm:$0xff] }
0x2096   :  { %9117 = vrsqrt.f32 %v6879_v34  ;;  %v8815_v34 = vpack.c.bf16 %v7598_v11, %v7597_v56 }
0x2097   :  { %9119 = vrsqrt.f32 %v6878_v21  ;;  %v7581_v21 = vld [vmem:[%s11211_s15 + $0x150] sm:$0xff] }
0x20a0   :  { %v9118_v24 = vpop.eup %9117 }
0x20a1   :  { %v9120_v20 = vpop.eup %9119  ;;  %v6887_v48 = vmul.f32 %v9118_v24, %v10944_v43  ;;  %v7582_v24 = vld [vmem:[%s11211_s15 + $0x158] sm:$0xff] }
0x20a2   :  { %v6886_v47 = vmul.f32 %v9120_v20, %v10947_v28  ;;  %v8817_v20 = vpack.c.bf16 %v7582_v24, %v7581_v21 }
0x20a3   :  { %v6895_v60 = vmul.f32 %v7528_v38, %v6887_v48 }
0x20a4   :  { %v6894_v14 = vmul.f32 %v7528_v38, %v6886_v47  ;;  %v7600_v47 = vld [vmem:[%s11211_s15 + $0x1e8] sm:$0xff] }
0x20a5   :  { %v6903_v22 = vadd.f32 %v7529_v10, %v6895_v60  ;;  %v7601_v60 = vld [vmem:[%s11211_s15 + $0x1f0] sm:$0xff] }
0x20a6   :  { %v6902_v37 = vadd.f32 %v7529_v10, %v6894_v14  ;;  %v7584_v14 = vld [vmem:[%s11211_s15 + $0x168] sm:$0xff] }
0x20a8   :  { %7017 = vmatmul.mubr.f32.vlgmr.msra.gmra.mrb[102].mxu1 %v6902_v37 }
0x20a9   :  { %7022 = vmatprep.mubr.f32.mxu1 %v9157_v19 }
0x20ac   :  { %7023 = vmatmul.mubr.f32.gmra.mrb[104].mxu1 %v6903_v22  ;;  %v7602_v22 = vld [vmem:[%s11211_s15 + $0x1f8] sm:$0xff] }
0x20ad   :  { %7028 = vmatprep.mubr.f32.mxu1 %v9157_v19 }
0x20cb   :  { %v6871_v18 = vpop.xlane.xlu0 %6870 }
0x20cc   :  { %v6876_v7 = vmul.f32 0.0078125, %v6871_v18  ;;  %v8823_v18 = vpack.c.bf16 %v7602_v22, %v7601_v60 }
0x20ce   :  { %v6880_v15 = vadd.f32 1e-05, %v6876_v7  ;;  %v7585_v7 = vld [vmem:[%s11211_s15 + $0x170] sm:$0xff] }
0x20cf   :  { %v6873_v28 = vpop.xlane.xlu1 %6872 }
0x20d0   :  { %9121 = vrsqrt.f32 %v6880_v15  ;;  %v6877_v43 = vmul.f32 0.0078125, %v6873_v28  ;;  %v7586_v15 = vld [vmem:[%s11211_s15 + $0x178] sm:$0xff] }
0x20d1   :  { %v8825_v28 = vpack.c.bf16 %v7586_v15, %v7585_v7 }
0x20d2   :  { %v6881_v39 = vadd.f32 1e-05, %v6877_v43  ;;  %v7232_v43 = vld [vmem:[%s11214_s17] sm:$0xff] }
0x20d4   :  { %9123 = vrsqrt.f32 %v6881_v39  ;;  %v7233_v39 = vld [vmem:[%s11214_s17 + $0x8] sm:$0xff] }
0x20da   :  { %v9122_v40 = vpop.eup %9121 }
0x20db   :  { %v6888_v55 = vmul.f32 %v9122_v40, %v6860_v12  ;;  %v7578_v12 = vld [vmem:[%s11211_s15 + $0x138] sm:$0xff]  ;;  %v7234_v40 = vld [vmem:[%s11214_s17 + $0x10] sm:$0xff] }
0x20dc   :  { %v8809_v17 = vpack.c.bf16 %v7578_v12, %v7577_v6 }
0x20dd   :  { %v6896_v25 = vmul.f32 %v7528_v38, %v6888_v55  ;;  %v8827_v55 = vpack.c.bf16 %v7233_v39, %v7232_v43 }
0x20de   :  { %v9124_v45 = vpop.eup %9123 }
0x20df   :  { %v6904_v27 = vadd.f32 %v7529_v10, %v6896_v25  ;;  %v6889_v29 = vmul.f32 %v9124_v45, %v6861_v26  ;;  %v8811_v26 = vpack.c.bf16 %v7596_v36, %v7595_v52  ;;  %v7235_v25 = vld [vmem:[%s11214_s17 + $0x18] sm:$0xff]  ;;  %8828 = vmatprep.subr.bf16.mxu1 %v8827_v55 }
0x20e0   :  { %v8831_v45 = vpack.c.bf16 %v7235_v25, %v7234_v40  ;;  %8830 = vmatpush3.bf16.msra.mxu1 %v8827_v55 }
0x20e1   :  { %7029 = vmatmul.mubr.f32.gmra.mrb[106].mxu1 %v6904_v27  ;;  %v6897_v0 = vmul.f32 %v7528_v38, %v6889_v29  ;;  %v7599_v38 = vld [vmem:[%s11211_s15 + $0x1e0] sm:$0xff]  ;;  %v7237_v29 = vld [vmem:[%s11214_s17 + $0x28] sm:$0xff] }
0x20e2   :  { %7034 = vmatprep.mubr.f32.mxu1 %v9157_v19  ;;  %v8797_v19 = vpack.c.bf16 %v7572_v49, %v7571_v59  ;;  %v8819_v48 = vpack.c.bf16 %v7600_v47, %v7599_v38  ;;  %v7236_v27 = vld [vmem:[%s11214_s17 + $0x20] sm:$0xff]  ;;  %8832 = vmatprep.subr.bf16.mxu1 %v8831_v45  ;;  %v7241_v59 = vld [vmem:[%s11214_s17 + $0x48] sm:$0xff] }
0x20e3   :  { %v6905_v44 = vadd.f32 %v7529_v10, %v6897_v0  ;;  %v7583_v10 = vld [vmem:[%s11211_s15 + $0x160] sm:$0xff]  ;;  %v8835_v0 = vpack.c.bf16 %v7237_v29, %v7236_v27  ;;  %v8843_v49 = vpack.c.bf16 %v7241_v59, %v7240_v13 }
0x20e4   :  { %8798 = vmatpush3.bf16.msra.mxu0 %v8797_v19  ;;  %v8821_v37 = vpack.c.bf16 %v7584_v14, %v7583_v10  ;;  %8834 = vmatpush3.bf16.msra.mxu1 %v8831_v45  ;;  %v7562_v19 = vld [vmem:[%s11212_s14 + $0x1] ss:$2 sm:$0x3] }
0x20e5   :  { %7035 = vmatmul.mubr.f32.gmra.mrb[108].mxu1 %v6905_v44  ;;  %8800 = vmatprep.subr.bf16.mxu0 %v8799_v53  ;;  %v7238_v44 = vld [vmem:[%s11214_s17 + $0x30] sm:$0xff]  ;;  %v6945_v23 = vrot.slane %v7562_v19, %v9606_v61  ;;  %v6949_v42 = vrot.slane %v7562_v19, %v9600_v32 }
0x20e6   :  { %8836 = vmatprep.subr.bf16.mxu1 %v8835_v0  ;;  %v8839_v4 = vpack.c.bf16 %v7239_v2, %v7238_v44 }
0x20e8   :  { %8802 = vmatpush3.bf16.msra.mxu0 %v8801_v3  ;;  %8838 = vmatpush3.bf16.msra.mxu1 %v8835_v0 }
0x20e9   :  { %8804 = vmatprep.subr.bf16.mxu0 %v8803_v50  ;;  %8840 = vmatprep.subr.bf16.mxu1 %v8839_v4 }
0x20ec   :  { %8806 = vmatpush3.bf16.msra.mxu0 %v8805_v9  ;;  %8842 = vmatpush3.bf16.msra.mxu1 %v8839_v4 }
0x20ed   :  { %8808 = vmatprep.subr.bf16.mxu0 %v8807_v51  ;;  %8844 = vmatprep.subr.bf16.mxu1 %v8843_v49 }
0x20f0   :  { %8810 = vmatpush3.bf16.msra.mxu0 %v8809_v17  ;;  %8846 = vmatpush3.bf16.msra.mxu1 %v8843_v49 }
0x20f1   :  { %8812 = vmatprep.subr.bf16.mxu0 %v8811_v26 }
0x20f4   :  { %8814 = vmatpush3.bf16.msra.mxu0 %v8813_v33 }
0x20f5   :  { %8816 = vmatprep.subr.bf16.mxu0 %v8815_v34 }
0x20f8   :  { %8818 = vmatpush3.bf16.msra.mxu0 %v8817_v20 }
0x20f9   :  { %8820 = vmatprep.subr.bf16.mxu0 %v8819_v48 }
0x20fc   :  { %8822 = vmatpush3.bf16.msra.mxu0 %v8821_v37 }
0x20fd   :  { %8824 = vmatprep.subr.bf16.mxu0 %v8823_v18 }
0x2100   :  { %8826 = vmatpush3.bf16.msra.mxu0 %v8825_v28 }
0x217b   :  { %v7018_v53 = vpop.f32.mrb[102].mxu1 }
0x217c   :  { %v7019_v41 = vadd.f32 %v7018_v53, %v6945_v23  ;;  %v7020_v1 = vpop.f32.mrb[103].mxu1 }
0x217d   :  { %v7021_v3 = vadd.f32 %v7020_v1, %v6949_v42 }
0x217e   :  { %v7563_v5 = vmul.f32 -1.702, %v7019_v41 }
0x217f   :  { %v7564_v46 = vmul.f32 -1.702, %v7021_v3  ;;  %v7024_v50 = vpop.f32.mrb[104].mxu1 }
0x2180   :  { %v7057_v8 = vmul.f32 1.442695, %v7563_v5  ;;  %v7025_v62 = vadd.f32 %v7024_v50, %v6945_v23  ;;  %v7026_v9 = vpop.f32.mrb[105].mxu1  ;;  %v7242_v5 = vld [vmem:[%s11214_s17 + $0x50] sm:$0xff] }
0x2181   :  { %v7059_v57 = vmul.f32 1.442695, %v7564_v46  ;;  %v7027_v16 = vadd.f32 %v7026_v9, %v6949_v42  ;;  %v7243_v46 = vld [vmem:[%s11214_s17 + $0x58] sm:$0xff] }
0x2182   :  { %9125 = vpow2.f32 %v7057_v8  ;;  %v7565_v51 = vmul.f32 -1.702, %v7025_v62  ;;  %v8847_v50 = vpack.c.bf16 %v7243_v46, %v7242_v5  ;;  %v7244_v8 = vld [vmem:[%s11214_s17 + $0x60] sm:$0xff] }
0x2183   :  { %9127 = vpow2.f32 %v7059_v57  ;;  %v7566_v6 = vmul.f32 -1.702, %v7027_v16  ;;  %v7246_v57 = vld [vmem:[%s11214_s17 + $0x70] sm:$0xff] }
0x2184   :  { %v7061_v12 = vmul.f32 1.442695, %v7565_v51  ;;  %8848 = vmatprep.subr.bf16.mxu1 %v8847_v50 }
0x2185   :  { %v7063_v61 = vmul.f32 1.442695, %v7566_v6  ;;  %8850 = vmatpush3.bf16.msra.mxu1 %v8847_v50 }
0x2186   :  { %9129 = vpow2.f32 %v7061_v12  ;;  %v7603_v12 = vld [vmem:[%s11213_s16 + $0x1] ss:$0 sm:$0xff] }
0x2187   :  { %9131 = vpow2.f32 %v7063_v61 }
0x218c   :  { %v9126_v32 = vpop.eup %9125 }
0x218d   :  { %v9128_v17 = vpop.eup %9127  ;;  %v7073_v52 = vadd.f32 1.0, %v9126_v32 }
0x218e   :  { %v7074_v36 = vadd.f32 1.0, %v9128_v17 }
0x218f   :  { %9133 = vrcp.f32 %v7073_v52 }
0x2190   :  { %v9130_v26 = vpop.eup %9129  ;;  %9135 = vrcp.f32 %v7074_v36 }
0x2191   :  { %v9132_v30 = vpop.eup %9131  ;;  %v7075_v31 = vadd.f32 1.0, %v9130_v26 }
0x2192   :  { %v7076_v33 = vadd.f32 1.0, %v9132_v30 }
0x2193   :  { %9137 = vrcp.f32 %v7075_v31 }
0x2194   :  { %9139 = vrcp.f32 %v7076_v33 }
0x2199   :  { %v9134_v56 = vpop.eup %9133 }
0x219a   :  { %v9136_v11 = vpop.eup %9135  ;;  %v7097_v21 = vmul.f32 %v9134_v56, %v7019_v41 }
0x219b   :  { %v7098_v34 = vmul.f32 %v9136_v11, %v7021_v3 }
0x219d   :  { %v9138_v24 = vpop.eup %9137  ;;  %7207 = vmatprep.mubr.f32.mxu0 %v7098_v34 }
0x219e   :  { %v9140_v20 = vpop.eup %9139  ;;  %7208 = vmatmul.mubr.f32.vlgmr.msra.gmra.mrb[82].mxu0 %v7097_v21  ;;  %v7099_v47 = vmul.f32 %v9138_v24, %v7025_v62  ;;  %v7245_v62 = vld [vmem:[%s11214_s17 + $0x68] sm:$0xff] }
0x219f   :  { %v7100_v38 = vmul.f32 %v9140_v20, %v7027_v16  ;;  %v8851_v9 = vpack.c.bf16 %v7245_v62, %v7244_v8  ;;  %v7247_v16 = vld [vmem:[%s11214_s17 + $0x78] sm:$0xff] }
0x21a0   :  { %v8855_v51 = vpack.c.bf16 %v7247_v16, %v7246_v57 }
0x21a1   :  { %7212 = vmatprep.mubr.f32.mxu0 %v7100_v38  ;;  %8852 = vmatprep.subr.bf16.mxu1 %v8851_v9 }
0x21a2   :  { %7213 = vmatmul.mubr.f32.gmra.mrb[84].mxu0 %v7099_v47  ;;  %8854 = vmatpush3.bf16.msra.mxu1 %v8851_v9 }
0x21a3   :  { %8856 = vmatprep.subr.bf16.mxu1 %v8855_v51 }
0x21a6   :  { %8858 = vmatpush3.bf16.msra.mxu1 %v8855_v51 }
0x21b4   :  { %v7030_v48 = vpop.f32.mrb[106].mxu1 }
0x21b5   :  { %v7031_v10 = vadd.f32 %v7030_v48, %v6945_v23  ;;  %v7032_v14 = vpop.f32.mrb[107].mxu1 }
0x21b6   :  { %v7033_v37 = vadd.f32 %v7032_v14, %v6949_v42 }
0x21b7   :  { %v7567_v60 = vmul.f32 -1.702, %v7031_v10 }
0x21b8   :  { %v7568_v22 = vmul.f32 -1.702, %v7033_v37  ;;  %v7036_v18 = vpop.f32.mrb[108].mxu1 }
0x21b9   :  { %v7065_v7 = vmul.f32 1.442695, %v7567_v60  ;;  %v7037_v15 = vadd.f32 %v7036_v18, %v6945_v23  ;;  %v7038_v28 = vpop.f32.mrb[109].mxu1 }
0x21ba   :  { %v7067_v43 = vmul.f32 1.442695, %v7568_v22  ;;  %v7039_v39 = vadd.f32 %v7038_v28, %v6949_v42 }
0x21bb   :  { %9141 = vpow2.f32 %v7065_v7  ;;  %v7569_v40 = vmul.f32 -1.702, %v7037_v15 }
0x21bc   :  { %9143 = vpow2.f32 %v7067_v43  ;;  %v7570_v55 = vmul.f32 -1.702, %v7039_v39 }
0x21bd   :  { %v7069_v25 = vmul.f32 1.442695, %v7569_v40 }
0x21be   :  { %v7071_v45 = vmul.f32 1.442695, %v7570_v55 }
0x21bf   :  { %9145 = vpow2.f32 %v7069_v25 }
0x21c0   :  { %9147 = vpow2.f32 %v7071_v45 }
0x21c5   :  { %v9142_v27 = vpop.eup %9141 }
0x21c6   :  { %v9144_v29 = vpop.eup %9143  ;;  %v7077_v0 = vadd.f32 1.0, %v9142_v27 }
0x21c7   :  { %v7078_v44 = vadd.f32 1.0, %v9144_v29 }
0x21c8   :  { %9149 = vrcp.f32 %v7077_v0 }
0x21c9   :  { %v9146_v2 = vpop.eup %9145  ;;  %9151 = vrcp.f32 %v7078_v44 }
0x21ca   :  { %v9148_v4 = vpop.eup %9147  ;;  %v7079_v13 = vadd.f32 1.0, %v9146_v2 }
0x21cb   :  { %v7080_v59 = vadd.f32 1.0, %v9148_v4 }
0x21cc   :  { %9153 = vrcp.f32 %v7079_v13 }
0x21cd   :  { %9155 = vrcp.f32 %v7080_v59 }
0x21d2   :  { %v9150_v49 = vpop.eup %9149 }
0x21d3   :  { %v9152_v19 = vpop.eup %9151  ;;  %v7101_v42 = vmul.f32 %v9150_v49, %v7031_v10 }
0x21d4   :  { %v7102_v23 = vmul.f32 %v9152_v19, %v7033_v37 }
0x21d6   :  { %v9154_v53 = vpop.eup %9153  ;;  %7217 = vmatprep.mubr.f32.mxu0 %v7102_v23 }
0x21d7   :  { %v9156_v41 = vpop.eup %9155  ;;  %7218 = vmatmul.mubr.f32.gmra.mrb[86].mxu0 %v7101_v42  ;;  %v7103_v3 = vmul.f32 %v9154_v53, %v7037_v15 }
0x21d8   :  { %v7104_v1 = vmul.f32 %v9156_v41, %v7039_v39 }
0x21da   :  { %7222 = vmatprep.mubr.f32.mxu0 %v7104_v1 }
0x21db   :  { %7223 = vmatmul.mubr.f32.gmra.mrb[88].mxu0 %v7103_v3 }
0x2271   :  { %v7933_v6 = vpop.f32.mrb[82].mxu0 }
0x2272   :  { %v7934_v61 = vpop.f32.mrb[83].mxu0 }
0x2273   :  { %v7935_v32 = vadd.f32 %v7934_v61, %v7933_v6 }
0x2275   :  { %v7210_v17 = vadd.f32 %v7935_v32, %v7603_v12  ;;  %v7936_v52 = vpop.f32.mrb[84].mxu0 }
0x2276   :  { %v7937_v36 = vpop.f32.mrb[85].mxu0 }
0x2277   :  { %v7938_v26 = vadd.f32 %v7937_v36, %v7936_v52  ;;  %v7228_v30 = vadd.f32 %v7210_v17, %v10895_v54  ;;  %v7604_v54 = vld [vmem:[%s11215_s18] ss:$0 sm:$0xff] }
0x2279   :  { %v7215_v31 = vadd.f32 %v7938_v26, %v7603_v12  ;;  %8469 = vmatprep.mubr.f32.mxu1 %v7228_v30 }
0x227b   :  { %v7229_v33 = vadd.f32 %v7215_v31, %v10892_v35 }
0x227d   :  { %8470 = vmatmul.mubr.f32.vlgmr.msra.gmra.mrb[110].mxu1 %v7229_v33 }
0x22aa   :  { %v7939_v56 = vpop.f32.mrb[86].mxu0 }
0x22ab   :  { %v7940_v11 = vpop.f32.mrb[87].mxu0 }
0x22ac   :  { %v7941_v34 = vadd.f32 %v7940_v11, %v7939_v56 }
0x22ae   :  { %v7220_v21 = vadd.f32 %v7941_v34, %v7603_v12  ;;  %v7942_v24 = vpop.f32.mrb[88].mxu0 }
0x22af   :  { %v7943_v20 = vpop.f32.mrb[89].mxu0 }
0x22b0   :  { %v7944_v38 = vadd.f32 %v7943_v20, %v7942_v24  ;;  %v7230_v47 = vadd.f32 %v7220_v21, %v10900_v58 }
0x22b2   :  { %v7225_v48 = vadd.f32 %v7944_v38, %v7603_v12  ;;  %8472 = vmatprep.mubr.f32.mxu1 %v7230_v47 }
0x22b4   :  { %v7231_v10 = vadd.f32 %v7225_v48, %v10904_v63 }
0x22b6   :  { %8473 = vmatmul.mubr.f32.gmra.mrb[112].mxu1 %v7231_v10 }
0x2350   :  { %v8471_v35 = vpop.f32.mrb[110].mxu1 }
0x2351   :  { %v7327_v14 = vadd.f32 %v8471_v35, %v7604_v54  ;;  %v7321_v37 = vpop.f32.mrb[111].mxu1 }
0x2352   :  { %v7322_v60 = vadd.f32 %v7604_v54, %v7321_v37 }
0x2353   :  { %7341 = vst [vmem:[%s11216_s19 + $0x8] sm:$0xff] %v7327_v14 }
0x2354   :  { %7340 = vst [vmem:[%s11216_s19] sm:$0xff] %v7322_v60 }
0x2389   :  { %v8474_v58 = vpop.f32.mrb[112].mxu1 }
0x238a   :  { %v7337_v22 = vadd.f32 %v8474_v58, %v7604_v54  ;;  %v7331_v63 = vpop.f32.mrb[113].mxu1 }
0x238b   :  { %v7332_v18 = vadd.f32 %v7604_v54, %v7331_v63 }
0x238c   :  { %7343 = vst [vmem:[%s11216_s19 + $0x18] sm:$0xff] %v7337_v22 }
0x238d   :  { %7342 = vst [vmem:[%s11216_s19 + $0x10] sm:$0xff] %v7332_v18 }

</bundles_post_ra>
